<compile_context>
chip_gen: v7x
topology: tpu7x:2x2x1
jax: 0.10.0
libtpu: 0.0.40
codegen_flags: <defaults>
</compile_context>

<pallas_src>
import jax
import jax.numpy as jnp
from jax import lax
from jax.experimental import pallas as pl
from jax.experimental.pallas import tpu as pltpu


def lstm_model_kernel(x_ref, w1_ref, b1_ref,
                      wih0_ref, whh0_ref, b0_ref,
                      wih1_ref, whh1_ref, bl1_ref,
                      w2a_ref, w2b_ref, b2_ref,
                      out_ref):
    B, T, IN = x_ref.shape
    HP = whh0_ref.shape[0]                  # lane-padded hidden width (128)

    # ---- hoisted weight / bias loads (once per kernel call) ----------------
    w1 = w1_ref[...]
    b1 = b1_ref[...]
    wih0 = wih0_ref[...]
    whh0 = whh0_ref[...]
    b0 = b0_ref[...]
    wih1 = wih1_ref[...]
    whh1 = whh1_ref[...]
    bl1 = bl1_ref[...]

    # ---- time-batched input projections (hoisted out of the recurrence) ----
    x2 = x_ref[...].reshape(B * T, IN)                                  # (B*T, IN)
    xt = jnp.maximum(
        jnp.dot(x2, w1, preferred_element_type=jnp.float32) + b1, 0.0)  # (B*T, HP)
    xg0 = jnp.dot(xt, wih0, preferred_element_type=jnp.float32) + b0    # (B*T, 4HP)
    xg0 = xg0.reshape(B, T, 4 * HP)

    def gates_to_hc(g, c_prev):
        # Each slice is a full 128-lane tile (padded layout) -> no XLU relayout.
        i = jax.nn.sigmoid(g[:, 0 * HP:1 * HP])
        f = jax.nn.sigmoid(g[:, 1 * HP:2 * HP])
        gg = jnp.tanh(g[:, 2 * HP:3 * HP])
        o = jax.nn.sigmoid(g[:, 3 * HP:4 * HP])
        c_new = f * c_prev + i * gg
        h_new = o * jnp.tanh(c_new)
        return h_new, c_new

    # ---- layer-0 recurrence: only h @ whh0 + elementwise per step ----------
    h = jnp.zeros((B, HP), jnp.float32)
    c = jnp.zeros((B, HP), jnp.float32)
    h0_steps = []
    for t in range(T):                      # static full unroll (T is compile-time)
        g = xg0[:, t, :] + jnp.dot(h, whh0, preferred_element_type=jnp.float32)
        h, c = gates_to_hc(g, c)
        h0_steps.append(h)
    h0_final = h

    # ---- layer-1: batch the input projection over all timesteps ------------
    h0_all = jnp.stack(h0_steps, axis=1).reshape(B * T, HP)             # (B*T, HP)
    xg1 = jnp.dot(h0_all, wih1, preferred_element_type=jnp.float32) + bl1
    xg1 = xg1.reshape(B, T, 4 * HP)

    h = jnp.zeros((B, HP), jnp.float32)
    c = jnp.zeros((B, HP), jnp.float32)
    for t in range(T):
        g = xg1[:, t, :] + jnp.dot(h, whh1, preferred_element_type=jnp.float32)
        h, c = gates_to_hc(g, c)
    h1_final = h

    # h_n.permute(1,0,2).reshape(B,-1) @ w2 == h0@w2[:H] + h1@w2[H:2H].
    # Dropout (p=0.2) is identity at inference.
    # TODO(synk): training-mode dropout (p=0.2) not implemented in-kernel.
    out_ref[...] = (jnp.dot(h0_final, w2a_ref[...], preferred_element_type=jnp.float32)
                    + jnp.dot(h1_final, w2b_ref[...], preferred_element_type=jnp.float32)
                    + b2_ref[...])


def prepare_params(params, lane=128):
    """Zero-pad hidden dim H -> HP=lane so every LSTM gate occupies its own
    128-lane tile.  Exact: padded gate pre-activations are 0, so padded lanes
    of h/c remain identically 0 through the recurrence."""
    H = params["w1"].shape[1]
    HP = lane
    assert HP >= H

    def pad_lanes(a):                       # (r, H) -> (r, HP)
        return jnp.pad(a, ((0, 0), (0, HP - a.shape[-1])))

    def pad_gate_mat(w):                    # (K, 4H) -> (HP, 4HP), per-gate pad
        K = w.shape[0]
        w = w.reshape(K, 4, H)
        w = jnp.pad(w, ((0, HP - K), (0, 0), (0, HP - H)))
        return w.reshape(HP, 4 * HP)

    def pad_gate_bias(b):                   # (1, 4H) -> (1, 4HP)
        b = b.reshape(1, 4, H)
        b = jnp.pad(b, ((0, 0), (0, 0), (0, HP - H)))
        return b.reshape(1, 4 * HP)

    w2 = params["w2"]
    return {
        "w1": pad_lanes(params["w1"]),                       # (IN, HP)
        "b1": pad_lanes(params["b1"]),                       # (1, HP)
        "wih0": pad_gate_mat(params["wih0"]),                # (HP, 4HP)
        "whh0": pad_gate_mat(params["whh0"]),
        "b0": pad_gate_bias(params["b0"]),
        "wih1": pad_gate_mat(params["wih1"]),
        "whh1": pad_gate_mat(params["whh1"]),
        "bl1": pad_gate_bias(params["bl1"]),
        "w2a": jnp.pad(w2[:H], ((0, HP - H), (0, 0))),       # (HP, O)
        "w2b": jnp.pad(w2[H:2 * H], ((0, HP - H), (0, 0))),  # (HP, O)
        "b2": params["b2"],                                  # (1, O)
    }


def lstm_model_forward(x, pp):
    """x: (B, T, IN) batch-first float32 (PyTorch batch_first=True).
    pp: output of prepare_params (lane-padded weights)."""
    B, T, IN = x.shape
    O = pp["w2a"].shape[1]

    args = (x.astype(jnp.float32),
            pp["w1"], pp["b1"],
            pp["wih0"], pp["whh0"], pp["b0"],
            pp["wih1"], pp["whh1"], pp["bl1"],
            pp["w2a"], pp["w2b"], pp["b2"])

    def spec(arr):
        nd = arr.ndim
        return pl.BlockSpec(arr.shape, lambda i, _nd=nd: (0,) * _nd)

    out = pl.pallas_call(
        lstm_model_kernel,
        out_shape=jax.ShapeDtypeStruct((B, O), jnp.float32),
        grid=(1,),
        in_specs=[spec(a) for a in args],
        out_specs=pl.BlockSpec((B, O), lambda i: (0, 0)),
        compiler_params=pltpu.CompilerParams(
            dimension_semantics=("arbitrary",)),
    )(*args)
    return out[:, -1]                        # predictions[:, -1]


def init_params(key, input_size=1, hidden=32, output_size=1):
    """Deterministic init mirroring LSTMModel.__init__/init_weights shapes.
    All matrices stored transposed: (in_features, out_features)."""
    H = hidden
    k_w1, k_b1, k_ih0, k_hh0, k_ih1, k_hh1, k_w2, k_b2 = jax.random.split(key, 8)

    def uniform(k, shape, fan_in):           # PyTorch Linear default
        bound = 1.0 / jnp.sqrt(jnp.float32(fan_in))
        return jax.random.uniform(k, shape, jnp.float32, -bound, bound)

    def kaiming(k, shape):                   # stored transposed: fan_in = shape[0]
        std = jnp.sqrt(2.0 / shape[0])
        return std * jax.random.normal(k, shape, jnp.float32)

    ortho = jax.nn.initializers.orthogonal()

    return {
        # linear_1: (input_size -> H)
        "w1": uniform(k_w1, (input_size, H), input_size),
        "b1": uniform(k_b1, (1, H), input_size),
        # LSTM layer 0: weight_ih kaiming-normal, weight_hh orthogonal, biases 0
        "wih0": kaiming(k_ih0, (H, 4 * H)),
        "whh0": jnp.transpose(ortho(k_hh0, (4 * H, H), jnp.float32)),
        "b0": jnp.zeros((1, 4 * H), jnp.float32),
        # LSTM layer 1
        "wih1": kaiming(k_ih1, (H, 4 * H)),
        "whh1": jnp.transpose(ortho(k_hh1, (4 * H, H), jnp.float32)),
        "bl1": jnp.zeros((1, 4 * H), jnp.float32),
        # linear_2: (2H -> output_size)
        "w2": uniform(k_w2, (2 * H, output_size), 2 * H),
        "b2": uniform(k_b2, (1, output_size), 2 * H),
    }


def reference_forward(x, params):
    """Pure-JAX reference (unpadded) for correctness checking."""
    B, T, IN = x.shape
    H = params["w1"].shape[1]
    xt = jnp.maximum(jnp.einsum("bti,ih->bth", x, params["w1"]) + params["b1"][0], 0.0)

    def make_step(wih, whh, b):
        def step(carry, x_t):
            h, c = carry
            gates = x_t @ wih + h @ whh + b[0]
            i = jax.nn.sigmoid(gates[:, :H])
            f = jax.nn.sigmoid(gates[:, H:2 * H])
            g = jnp.tanh(gates[:, 2 * H:3 * H])
            o = jax.nn.sigmoid(gates[:, 3 * H:])
            c = f * c + i * g
            h = o * jnp.tanh(c)
            return (h, c), h
        return step

    h = jnp.zeros((B, H), jnp.float32)
    c = jnp.zeros((B, H), jnp.float32)
    (h0f, _), hs0 = lax.scan(make_step(params["wih0"], params["whh0"], params["b0"]),
                             (h, c), jnp.transpose(xt, (1, 0, 2)))
    (h1f, _), _ = lax.scan(make_step(params["wih1"], params["whh1"], params["bl1"]),
                           (h, c), hs0)
    feat = jnp.concatenate([h0f, h1f], axis=-1)          # (B, 2H)
    pred = feat @ params["w2"] + params["b2"]
    return pred[:, -1]


if __name__ == "__main__":
    key = jax.random.PRNGKey(0)
    k_param, k_x = jax.random.split(key)

    B, T, IN, H, O = 2, 8, 1, 32, 1
    params = init_params(k_param, input_size=IN, hidden=H, output_size=O)
    x = jax.random.normal(k_x, (B, T, IN), jnp.float32)

    padded = prepare_params(params, lane=128)            # one-time weight prep
    out = lstm_model_forward(x, padded)
    out = jax.block_until_ready(out)

    ref = reference_forward(x, params)
    assert out.shape == (B,), out.shape
    assert jnp.allclose(out, ref, atol=1e-4, rtol=1e-4), (out, ref)

    print("KERNEL_OK")
</pallas_src>

<mosaic_0001>
module attributes {stable_mosaic.version = 11 : i64} {
  func.func @lstm_model_kernel(%arg0: i32, %arg1: memref<2x8x1xf32, #tpu.memory_space<vmem>>, %arg2: memref<1x128xf32, #tpu.memory_space<vmem>>, %arg3: memref<1x128xf32, #tpu.memory_space<vmem>>, %arg4: memref<128x512xf32, #tpu.memory_space<vmem>>, %arg5: memref<128x512xf32, #tpu.memory_space<vmem>>, %arg6: memref<1x512xf32, #tpu.memory_space<vmem>>, %arg7: memref<128x512xf32, #tpu.memory_space<vmem>>, %arg8: memref<128x512xf32, #tpu.memory_space<vmem>>, %arg9: memref<1x512xf32, #tpu.memory_space<vmem>>, %arg10: memref<128x1xf32, #tpu.memory_space<vmem>>, %arg11: memref<128x1xf32, #tpu.memory_space<vmem>>, %arg12: memref<1x1xf32, #tpu.memory_space<vmem>>, %arg13: memref<2x1xf32, #tpu.memory_space<vmem>>) attributes {dimension_semantics = [#tpu.dimension_semantics<arbitrary>], iteration_bounds = array<i64: 1>, scalar_prefetch = 0 : i64, scratch_operands = 0 : i64, tpu.core_type = #tpu.core_type<tc>, window_params = [{pipeline_mode = #tpu.pipeline_mode<synchronous>, transform_indices = @transform_0, window_bounds = array<i64: 2, 8, 1>}, {pipeline_mode = #tpu.pipeline_mode<synchronous>, transform_indices = @transform_1, window_bounds = array<i64: 1, 128>}, {pipeline_mode = #tpu.pipeline_mode<synchronous>, transform_indices = @transform_2, window_bounds = array<i64: 1, 128>}, {pipeline_mode = #tpu.pipeline_mode<synchronous>, transform_indices = @transform_3, window_bounds = array<i64: 128, 512>}, {pipeline_mode = #tpu.pipeline_mode<synchronous>, transform_indices = @transform_4, window_bounds = array<i64: 128, 512>}, {pipeline_mode = #tpu.pipeline_mode<synchronous>, transform_indices = @transform_5, window_bounds = array<i64: 1, 512>}, {pipeline_mode = #tpu.pipeline_mode<synchronous>, transform_indices = @transform_6, window_bounds = array<i64: 128, 512>}, {pipeline_mode = #tpu.pipeline_mode<synchronous>, transform_indices = @transform_7, window_bounds = array<i64: 128, 512>}, {pipeline_mode = #tpu.pipeline_mode<synchronous>, transform_indices = @transform_8, window_bounds = array<i64: 1, 512>}, {pipeline_mode = #tpu.pipeline_mode<synchronous>, transform_indices = @transform_9, window_bounds = array<i64: 128, 1>}, {pipeline_mode = #tpu.pipeline_mode<synchronous>, transform_indices = @transform_10, window_bounds = array<i64: 128, 1>}, {pipeline_mode = #tpu.pipeline_mode<synchronous>, transform_indices = @transform_11, window_bounds = array<i64: 1, 1>}, {pipeline_mode = #tpu.pipeline_mode<synchronous>, transform_indices = @transform_12, window_bounds = array<i64: 2, 1>}]} {
    %c0 = arith.constant 0 : index
    %c0_0 = arith.constant 0 : index
    %0 = vector.load %arg2[%c0, %c0_0] : memref<1x128xf32, #tpu.memory_space<vmem>>, vector<1x128xf32>
    %c0_1 = arith.constant 0 : index
    %c0_2 = arith.constant 0 : index
    %1 = vector.load %arg3[%c0_1, %c0_2] : memref<1x128xf32, #tpu.memory_space<vmem>>, vector<1x128xf32>
    %c0_3 = arith.constant 0 : index
    %c0_4 = arith.constant 0 : index
    %2 = vector.load %arg4[%c0_3, %c0_4] : memref<128x512xf32, #tpu.memory_space<vmem>>, vector<128x512xf32>
    %c0_5 = arith.constant 0 : index
    %c0_6 = arith.constant 0 : index
    %3 = vector.load %arg5[%c0_5, %c0_6] : memref<128x512xf32, #tpu.memory_space<vmem>>, vector<128x512xf32>
    %c0_7 = arith.constant 0 : index
    %c0_8 = arith.constant 0 : index
    %4 = vector.load %arg6[%c0_7, %c0_8] : memref<1x512xf32, #tpu.memory_space<vmem>>, vector<1x512xf32>
    %c0_9 = arith.constant 0 : index
    %c0_10 = arith.constant 0 : index
    %5 = vector.load %arg7[%c0_9, %c0_10] : memref<128x512xf32, #tpu.memory_space<vmem>>, vector<128x512xf32>
    %c0_11 = arith.constant 0 : index
    %c0_12 = arith.constant 0 : index
    %6 = vector.load %arg8[%c0_11, %c0_12] : memref<128x512xf32, #tpu.memory_space<vmem>>, vector<128x512xf32>
    %c0_13 = arith.constant 0 : index
    %c0_14 = arith.constant 0 : index
    %7 = vector.load %arg9[%c0_13, %c0_14] : memref<1x512xf32, #tpu.memory_space<vmem>>, vector<1x512xf32>
    %c0_15 = arith.constant 0 : index
    %c0_16 = arith.constant 0 : index
    %c0_17 = arith.constant 0 : index
    %8 = vector.load %arg1[%c0_15, %c0_16, %c0_17] : memref<2x8x1xf32, #tpu.memory_space<vmem>>, vector<2x8x1xf32>
    %9 = vector.shape_cast %8 : vector<2x8x1xf32> to vector<16x1xf32>
    %cst = arith.constant dense<0.000000e+00> : vector<16x128xf32>
    %10 = tpu.matmul %9, %0, %cst {dimension_numbers = #tpu.dot_dimension_numbers<[1], [0], [0], [1], [0, 0, 1, 1], [], []>} : vector<16x1xf32>, vector<1x128xf32>, vector<16x128xf32> -> vector<16x128xf32>
    %11 = vector.broadcast %1 : vector<1x128xf32> to vector<16x128xf32>
    %12 = arith.addf %10, %11 : vector<16x128xf32>
    %cst_18 = arith.constant 0.000000e+00 : f32
    %13 = vector.broadcast %cst_18 : f32 to vector<16x128xf32>
    %14 = arith.maximumf %12, %13 : vector<16x128xf32>
    %cst_19 = arith.constant dense<0.000000e+00> : vector<16x512xf32>
    %15 = tpu.matmul %14, %2, %cst_19 {dimension_numbers = #tpu.dot_dimension_numbers<[1], [0], [0], [1], [0, 0, 1, 1], [], []>} : vector<16x128xf32>, vector<128x512xf32>, vector<16x512xf32> -> vector<16x512xf32>
    %16 = vector.broadcast %4 : vector<1x512xf32> to vector<16x512xf32>
    %17 = arith.addf %15, %16 : vector<16x512xf32>
    %18 = vector.shape_cast %17 : vector<16x512xf32> to vector<2x8x512xf32>
    %cst_20 = arith.constant 0.000000e+00 : f32
    %19 = vector.broadcast %cst_20 : f32 to vector<2x128xf32>
    %cst_21 = arith.constant 0.000000e+00 : f32
    %20 = vector.broadcast %cst_21 : f32 to vector<2x128xf32>
    %21 = vector.extract_strided_slice %18 {offsets = [0, 0, 0], sizes = [2, 1, 512], strides = [1, 1, 1]} : vector<2x8x512xf32> to vector<2x1x512xf32>
    %22 = vector.shape_cast %21 : vector<2x1x512xf32> to vector<2x512xf32>
    %cst_22 = arith.constant dense<0.000000e+00> : vector<2x512xf32>
    %23 = tpu.matmul %19, %3, %cst_22 {dimension_numbers = #tpu.dot_dimension_numbers<[1], [0], [0], [1], [0, 0, 1, 1], [], []>} : vector<2x128xf32>, vector<128x512xf32>, vector<2x512xf32> -> vector<2x512xf32>
    %24 = arith.addf %22, %23 : vector<2x512xf32>
    %25 = vector.extract_strided_slice %24 {offsets = [0, 0], sizes = [2, 128], strides = [1, 1]} : vector<2x512xf32> to vector<2x128xf32>
    %26 = arith.negf %25 : vector<2x128xf32>
    %27 = math.exp %26 : vector<2x128xf32>
    %cst_23 = arith.constant 1.000000e+00 : f32
    %28 = vector.broadcast %cst_23 : f32 to vector<2x128xf32>
    %29 = arith.addf %28, %27 : vector<2x128xf32>
    %30 = arith.divf %28, %29 : vector<2x128xf32>
    %31 = vector.extract_strided_slice %24 {offsets = [0, 128], sizes = [2, 128], strides = [1, 1]} : vector<2x512xf32> to vector<2x128xf32>
    %32 = arith.negf %31 : vector<2x128xf32>
    %33 = math.exp %32 : vector<2x128xf32>
    %cst_24 = arith.constant 1.000000e+00 : f32
    %34 = vector.broadcast %cst_24 : f32 to vector<2x128xf32>
    %35 = arith.addf %34, %33 : vector<2x128xf32>
    %36 = arith.divf %34, %35 : vector<2x128xf32>
    %37 = vector.extract_strided_slice %24 {offsets = [0, 256], sizes = [2, 128], strides = [1, 1]} : vector<2x512xf32> to vector<2x128xf32>
    %38 = math.tanh %37 : vector<2x128xf32>
    %39 = vector.extract_strided_slice %24 {offsets = [0, 384], sizes = [2, 128], strides = [1, 1]} : vector<2x512xf32> to vector<2x128xf32>
    %40 = arith.negf %39 : vector<2x128xf32>
    %41 = math.exp %40 : vector<2x128xf32>
    %cst_25 = arith.constant 1.000000e+00 : f32
    %42 = vector.broadcast %cst_25 : f32 to vector<2x128xf32>
    %43 = arith.addf %42, %41 : vector<2x128xf32>
    %44 = arith.divf %42, %43 : vector<2x128xf32>
    %45 = arith.mulf %36, %20 : vector<2x128xf32>
    %46 = arith.mulf %30, %38 : vector<2x128xf32>
    %47 = arith.addf %45, %46 : vector<2x128xf32>
    %48 = math.tanh %47 : vector<2x128xf32>
    %49 = arith.mulf %44, %48 : vector<2x128xf32>
    %50 = vector.extract_strided_slice %18 {offsets = [0, 1, 0], sizes = [2, 1, 512], strides = [1, 1, 1]} : vector<2x8x512xf32> to vector<2x1x512xf32>
    %51 = vector.shape_cast %50 : vector<2x1x512xf32> to vector<2x512xf32>
    %cst_26 = arith.constant dense<0.000000e+00> : vector<2x512xf32>
    %52 = tpu.matmul %49, %3, %cst_26 {dimension_numbers = #tpu.dot_dimension_numbers<[1], [0], [0], [1], [0, 0, 1, 1], [], []>} : vector<2x128xf32>, vector<128x512xf32>, vector<2x512xf32> -> vector<2x512xf32>
    %53 = arith.addf %51, %52 : vector<2x512xf32>
    %54 = vector.extract_strided_slice %53 {offsets = [0, 0], sizes = [2, 128], strides = [1, 1]} : vector<2x512xf32> to vector<2x128xf32>
    %55 = arith.negf %54 : vector<2x128xf32>
    %56 = math.exp %55 : vector<2x128xf32>
    %cst_27 = arith.constant 1.000000e+00 : f32
    %57 = vector.broadcast %cst_27 : f32 to vector<2x128xf32>
    %58 = arith.addf %57, %56 : vector<2x128xf32>
    %59 = arith.divf %57, %58 : vector<2x128xf32>
    %60 = vector.extract_strided_slice %53 {offsets = [0, 128], sizes = [2, 128], strides = [1, 1]} : vector<2x512xf32> to vector<2x128xf32>
    %61 = arith.negf %60 : vector<2x128xf32>
    %62 = math.exp %61 : vector<2x128xf32>
    %cst_28 = arith.constant 1.000000e+00 : f32
    %63 = vector.broadcast %cst_28 : f32 to vector<2x128xf32>
    %64 = arith.addf %63, %62 : vector<2x128xf32>
    %65 = arith.divf %63, %64 : vector<2x128xf32>
    %66 = vector.extract_strided_slice %53 {offsets = [0, 256], sizes = [2, 128], strides = [1, 1]} : vector<2x512xf32> to vector<2x128xf32>
    %67 = math.tanh %66 : vector<2x128xf32>
    %68 = vector.extract_strided_slice %53 {offsets = [0, 384], sizes = [2, 128], strides = [1, 1]} : vector<2x512xf32> to vector<2x128xf32>
    %69 = arith.negf %68 : vector<2x128xf32>
    %70 = math.exp %69 : vector<2x128xf32>
    %cst_29 = arith.constant 1.000000e+00 : f32
    %71 = vector.broadcast %cst_29 : f32 to vector<2x128xf32>
    %72 = arith.addf %71, %70 : vector<2x128xf32>
    %73 = arith.divf %71, %72 : vector<2x128xf32>
    %74 = arith.mulf %65, %47 : vector<2x128xf32>
    %75 = arith.mulf %59, %67 : vector<2x128xf32>
    %76 = arith.addf %74, %75 : vector<2x128xf32>
    %77 = math.tanh %76 : vector<2x128xf32>
    %78 = arith.mulf %73, %77 : vector<2x128xf32>
    %79 = vector.extract_strided_slice %18 {offsets = [0, 2, 0], sizes = [2, 1, 512], strides = [1, 1, 1]} : vector<2x8x512xf32> to vector<2x1x512xf32>
    %80 = vector.shape_cast %79 : vector<2x1x512xf32> to vector<2x512xf32>
    %cst_30 = arith.constant dense<0.000000e+00> : vector<2x512xf32>
    %81 = tpu.matmul %78, %3, %cst_30 {dimension_numbers = #tpu.dot_dimension_numbers<[1], [0], [0], [1], [0, 0, 1, 1], [], []>} : vector<2x128xf32>, vector<128x512xf32>, vector<2x512xf32> -> vector<2x512xf32>
    %82 = arith.addf %80, %81 : vector<2x512xf32>
    %83 = vector.extract_strided_slice %82 {offsets = [0, 0], sizes = [2, 128], strides = [1, 1]} : vector<2x512xf32> to vector<2x128xf32>
    %84 = arith.negf %83 : vector<2x128xf32>
    %85 = math.exp %84 : vector<2x128xf32>
    %cst_31 = arith.constant 1.000000e+00 : f32
    %86 = vector.broadcast %cst_31 : f32 to vector<2x128xf32>
    %87 = arith.addf %86, %85 : vector<2x128xf32>
    %88 = arith.divf %86, %87 : vector<2x128xf32>
    %89 = vector.extract_strided_slice %82 {offsets = [0, 128], sizes = [2, 128], strides = [1, 1]} : vector<2x512xf32> to vector<2x128xf32>
    %90 = arith.negf %89 : vector<2x128xf32>
    %91 = math.exp %90 : vector<2x128xf32>
    %cst_32 = arith.constant 1.000000e+00 : f32
    %92 = vector.broadcast %cst_32 : f32 to vector<2x128xf32>
    %93 = arith.addf %92, %91 : vector<2x128xf32>
    %94 = arith.divf %92, %93 : vector<2x128xf32>
    %95 = vector.extract_strided_slice %82 {offsets = [0, 256], sizes = [2, 128], strides = [1, 1]} : vector<2x512xf32> to vector<2x128xf32>
    %96 = math.tanh %95 : vector<2x128xf32>
    %97 = vector.extract_strided_slice %82 {offsets = [0, 384], sizes = [2, 128], strides = [1, 1]} : vector<2x512xf32> to vector<2x128xf32>
    %98 = arith.negf %97 : vector<2x128xf32>
    %99 = math.exp %98 : vector<2x128xf32>
    %cst_33 = arith.constant 1.000000e+00 : f32
    %100 = vector.broadcast %cst_33 : f32 to vector<2x128xf32>
    %101 = arith.addf %100, %99 : vector<2x128xf32>
    %102 = arith.divf %100, %101 : vector<2x128xf32>
    %103 = arith.mulf %94, %76 : vector<2x128xf32>
    %104 = arith.mulf %88, %96 : vector<2x128xf32>
    %105 = arith.addf %103, %104 : vector<2x128xf32>
    %106 = math.tanh %105 : vector<2x128xf32>
    %107 = arith.mulf %102, %106 : vector<2x128xf32>
    %108 = vector.extract_strided_slice %18 {offsets = [0, 3, 0], sizes = [2, 1, 512], strides = [1, 1, 1]} : vector<2x8x512xf32> to vector<2x1x512xf32>
    %109 = vector.shape_cast %108 : vector<2x1x512xf32> to vector<2x512xf32>
    %cst_34 = arith.constant dense<0.000000e+00> : vector<2x512xf32>
    %110 = tpu.matmul %107, %3, %cst_34 {dimension_numbers = #tpu.dot_dimension_numbers<[1], [0], [0], [1], [0, 0, 1, 1], [], []>} : vector<2x128xf32>, vector<128x512xf32>, vector<2x512xf32> -> vector<2x512xf32>
    %111 = arith.addf %109, %110 : vector<2x512xf32>
    %112 = vector.extract_strided_slice %111 {offsets = [0, 0], sizes = [2, 128], strides = [1, 1]} : vector<2x512xf32> to vector<2x128xf32>
    %113 = arith.negf %112 : vector<2x128xf32>
    %114 = math.exp %113 : vector<2x128xf32>
    %cst_35 = arith.constant 1.000000e+00 : f32
    %115 = vector.broadcast %cst_35 : f32 to vector<2x128xf32>
    %116 = arith.addf %115, %114 : vector<2x128xf32>
    %117 = arith.divf %115, %116 : vector<2x128xf32>
    %118 = vector.extract_strided_slice %111 {offsets = [0, 128], sizes = [2, 128], strides = [1, 1]} : vector<2x512xf32> to vector<2x128xf32>
    %119 = arith.negf %118 : vector<2x128xf32>
    %120 = math.exp %119 : vector<2x128xf32>
    %cst_36 = arith.constant 1.000000e+00 : f32
    %121 = vector.broadcast %cst_36 : f32 to vector<2x128xf32>
    %122 = arith.addf %121, %120 : vector<2x128xf32>
    %123 = arith.divf %121, %122 : vector<2x128xf32>
    %124 = vector.extract_strided_slice %111 {offsets = [0, 256], sizes = [2, 128], strides = [1, 1]} : vector<2x512xf32> to vector<2x128xf32>
    %125 = math.tanh %124 : vector<2x128xf32>
    %126 = vector.extract_strided_slice %111 {offsets = [0, 384], sizes = [2, 128], strides = [1, 1]} : vector<2x512xf32> to vector<2x128xf32>
    %127 = arith.negf %126 : vector<2x128xf32>
    %128 = math.exp %127 : vector<2x128xf32>
    %cst_37 = arith.constant 1.000000e+00 : f32
    %129 = vector.broadcast %cst_37 : f32 to vector<2x128xf32>
    %130 = arith.addf %129, %128 : vector<2x128xf32>
    %131 = arith.divf %129, %130 : vector<2x128xf32>
    %132 = arith.mulf %123, %105 : vector<2x128xf32>
    %133 = arith.mulf %117, %125 : vector<2x128xf32>
    %134 = arith.addf %132, %133 : vector<2x128xf32>
    %135 = math.tanh %134 : vector<2x128xf32>
    %136 = arith.mulf %131, %135 : vector<2x128xf32>
    %137 = vector.extract_strided_slice %18 {offsets = [0, 4, 0], sizes = [2, 1, 512], strides = [1, 1, 1]} : vector<2x8x512xf32> to vector<2x1x512xf32>
    %138 = vector.shape_cast %137 : vector<2x1x512xf32> to vector<2x512xf32>
    %cst_38 = arith.constant dense<0.000000e+00> : vector<2x512xf32>
    %139 = tpu.matmul %136, %3, %cst_38 {dimension_numbers = #tpu.dot_dimension_numbers<[1], [0], [0], [1], [0, 0, 1, 1], [], []>} : vector<2x128xf32>, vector<128x512xf32>, vector<2x512xf32> -> vector<2x512xf32>
    %140 = arith.addf %138, %139 : vector<2x512xf32>
    %141 = vector.extract_strided_slice %140 {offsets = [0, 0], sizes = [2, 128], strides = [1, 1]} : vector<2x512xf32> to vector<2x128xf32>
    %142 = arith.negf %141 : vector<2x128xf32>
    %143 = math.exp %142 : vector<2x128xf32>
    %cst_39 = arith.constant 1.000000e+00 : f32
    %144 = vector.broadcast %cst_39 : f32 to vector<2x128xf32>
    %145 = arith.addf %144, %143 : vector<2x128xf32>
    %146 = arith.divf %144, %145 : vector<2x128xf32>
    %147 = vector.extract_strided_slice %140 {offsets = [0, 128], sizes = [2, 128], strides = [1, 1]} : vector<2x512xf32> to vector<2x128xf32>
    %148 = arith.negf %147 : vector<2x128xf32>
    %149 = math.exp %148 : vector<2x128xf32>
    %cst_40 = arith.constant 1.000000e+00 : f32
    %150 = vector.broadcast %cst_40 : f32 to vector<2x128xf32>
    %151 = arith.addf %150, %149 : vector<2x128xf32>
    %152 = arith.divf %150, %151 : vector<2x128xf32>
    %153 = vector.extract_strided_slice %140 {offsets = [0, 256], sizes = [2, 128], strides = [1, 1]} : vector<2x512xf32> to vector<2x128xf32>
    %154 = math.tanh %153 : vector<2x128xf32>
    %155 = vector.extract_strided_slice %140 {offsets = [0, 384], sizes = [2, 128], strides = [1, 1]} : vector<2x512xf32> to vector<2x128xf32>
    %156 = arith.negf %155 : vector<2x128xf32>
    %157 = math.exp %156 : vector<2x128xf32>
    %cst_41 = arith.constant 1.000000e+00 : f32
    %158 = vector.broadcast %cst_41 : f32 to vector<2x128xf32>
    %159 = arith.addf %158, %157 : vector<2x128xf32>
    %160 = arith.divf %158, %159 : vector<2x128xf32>
    %161 = arith.mulf %152, %134 : vector<2x128xf32>
    %162 = arith.mulf %146, %154 : vector<2x128xf32>
    %163 = arith.addf %161, %162 : vector<2x128xf32>
    %164 = math.tanh %163 : vector<2x128xf32>
    %165 = arith.mulf %160, %164 : vector<2x128xf32>
    %166 = vector.extract_strided_slice %18 {offsets = [0, 5, 0], sizes = [2, 1, 512], strides = [1, 1, 1]} : vector<2x8x512xf32> to vector<2x1x512xf32>
    %167 = vector.shape_cast %166 : vector<2x1x512xf32> to vector<2x512xf32>
    %cst_42 = arith.constant dense<0.000000e+00> : vector<2x512xf32>
    %168 = tpu.matmul %165, %3, %cst_42 {dimension_numbers = #tpu.dot_dimension_numbers<[1], [0], [0], [1], [0, 0, 1, 1], [], []>} : vector<2x128xf32>, vector<128x512xf32>, vector<2x512xf32> -> vector<2x512xf32>
    %169 = arith.addf %167, %168 : vector<2x512xf32>
    %170 = vector.extract_strided_slice %169 {offsets = [0, 0], sizes = [2, 128], strides = [1, 1]} : vector<2x512xf32> to vector<2x128xf32>
    %171 = arith.negf %170 : vector<2x128xf32>
    %172 = math.exp %171 : vector<2x128xf32>
    %cst_43 = arith.constant 1.000000e+00 : f32
    %173 = vector.broadcast %cst_43 : f32 to vector<2x128xf32>
    %174 = arith.addf %173, %172 : vector<2x128xf32>
    %175 = arith.divf %173, %174 : vector<2x128xf32>
    %176 = vector.extract_strided_slice %169 {offsets = [0, 128], sizes = [2, 128], strides = [1, 1]} : vector<2x512xf32> to vector<2x128xf32>
    %177 = arith.negf %176 : vector<2x128xf32>
    %178 = math.exp %177 : vector<2x128xf32>
    %cst_44 = arith.constant 1.000000e+00 : f32
    %179 = vector.broadcast %cst_44 : f32 to vector<2x128xf32>
    %180 = arith.addf %179, %178 : vector<2x128xf32>
    %181 = arith.divf %179, %180 : vector<2x128xf32>
    %182 = vector.extract_strided_slice %169 {offsets = [0, 256], sizes = [2, 128], strides = [1, 1]} : vector<2x512xf32> to vector<2x128xf32>
    %183 = math.tanh %182 : vector<2x128xf32>
    %184 = vector.extract_strided_slice %169 {offsets = [0, 384], sizes = [2, 128], strides = [1, 1]} : vector<2x512xf32> to vector<2x128xf32>
    %185 = arith.negf %184 : vector<2x128xf32>
    %186 = math.exp %185 : vector<2x128xf32>
    %cst_45 = arith.constant 1.000000e+00 : f32
    %187 = vector.broadcast %cst_45 : f32 to vector<2x128xf32>
    %188 = arith.addf %187, %186 : vector<2x128xf32>
    %189 = arith.divf %187, %188 : vector<2x128xf32>
    %190 = arith.mulf %181, %163 : vector<2x128xf32>
    %191 = arith.mulf %175, %183 : vector<2x128xf32>
    %192 = arith.addf %190, %191 : vector<2x128xf32>
    %193 = math.tanh %192 : vector<2x128xf32>
    %194 = arith.mulf %189, %193 : vector<2x128xf32>
    %195 = vector.extract_strided_slice %18 {offsets = [0, 6, 0], sizes = [2, 1, 512], strides = [1, 1, 1]} : vector<2x8x512xf32> to vector<2x1x512xf32>
    %196 = vector.shape_cast %195 : vector<2x1x512xf32> to vector<2x512xf32>
    %cst_46 = arith.constant dense<0.000000e+00> : vector<2x512xf32>
    %197 = tpu.matmul %194, %3, %cst_46 {dimension_numbers = #tpu.dot_dimension_numbers<[1], [0], [0], [1], [0, 0, 1, 1], [], []>} : vector<2x128xf32>, vector<128x512xf32>, vector<2x512xf32> -> vector<2x512xf32>
    %198 = arith.addf %196, %197 : vector<2x512xf32>
    %199 = vector.extract_strided_slice %198 {offsets = [0, 0], sizes = [2, 128], strides = [1, 1]} : vector<2x512xf32> to vector<2x128xf32>
    %200 = arith.negf %199 : vector<2x128xf32>
    %201 = math.exp %200 : vector<2x128xf32>
    %cst_47 = arith.constant 1.000000e+00 : f32
    %202 = vector.broadcast %cst_47 : f32 to vector<2x128xf32>
    %203 = arith.addf %202, %201 : vector<2x128xf32>
    %204 = arith.divf %202, %203 : vector<2x128xf32>
    %205 = vector.extract_strided_slice %198 {offsets = [0, 128], sizes = [2, 128], strides = [1, 1]} : vector<2x512xf32> to vector<2x128xf32>
    %206 = arith.negf %205 : vector<2x128xf32>
    %207 = math.exp %206 : vector<2x128xf32>
    %cst_48 = arith.constant 1.000000e+00 : f32
    %208 = vector.broadcast %cst_48 : f32 to vector<2x128xf32>
    %209 = arith.addf %208, %207 : vector<2x128xf32>
    %210 = arith.divf %208, %209 : vector<2x128xf32>
    %211 = vector.extract_strided_slice %198 {offsets = [0, 256], sizes = [2, 128], strides = [1, 1]} : vector<2x512xf32> to vector<2x128xf32>
    %212 = math.tanh %211 : vector<2x128xf32>
    %213 = vector.extract_strided_slice %198 {offsets = [0, 384], sizes = [2, 128], strides = [1, 1]} : vector<2x512xf32> to vector<2x128xf32>
    %214 = arith.negf %213 : vector<2x128xf32>
    %215 = math.exp %214 : vector<2x128xf32>
    %cst_49 = arith.constant 1.000000e+00 : f32
    %216 = vector.broadcast %cst_49 : f32 to vector<2x128xf32>
    %217 = arith.addf %216, %215 : vector<2x128xf32>
    %218 = arith.divf %216, %217 : vector<2x128xf32>
    %219 = arith.mulf %210, %192 : vector<2x128xf32>
    %220 = arith.mulf %204, %212 : vector<2x128xf32>
    %221 = arith.addf %219, %220 : vector<2x128xf32>
    %222 = math.tanh %221 : vector<2x128xf32>
    %223 = arith.mulf %218, %222 : vector<2x128xf32>
    %224 = vector.extract_strided_slice %18 {offsets = [0, 7, 0], sizes = [2, 1, 512], strides = [1, 1, 1]} : vector<2x8x512xf32> to vector<2x1x512xf32>
    %225 = vector.shape_cast %224 : vector<2x1x512xf32> to vector<2x512xf32>
    %cst_50 = arith.constant dense<0.000000e+00> : vector<2x512xf32>
    %226 = tpu.matmul %223, %3, %cst_50 {dimension_numbers = #tpu.dot_dimension_numbers<[1], [0], [0], [1], [0, 0, 1, 1], [], []>} : vector<2x128xf32>, vector<128x512xf32>, vector<2x512xf32> -> vector<2x512xf32>
    %227 = arith.addf %225, %226 : vector<2x512xf32>
    %228 = vector.extract_strided_slice %227 {offsets = [0, 0], sizes = [2, 128], strides = [1, 1]} : vector<2x512xf32> to vector<2x128xf32>
    %229 = arith.negf %228 : vector<2x128xf32>
    %230 = math.exp %229 : vector<2x128xf32>
    %cst_51 = arith.constant 1.000000e+00 : f32
    %231 = vector.broadcast %cst_51 : f32 to vector<2x128xf32>
    %232 = arith.addf %231, %230 : vector<2x128xf32>
    %233 = arith.divf %231, %232 : vector<2x128xf32>
    %234 = vector.extract_strided_slice %227 {offsets = [0, 128], sizes = [2, 128], strides = [1, 1]} : vector<2x512xf32> to vector<2x128xf32>
    %235 = arith.negf %234 : vector<2x128xf32>
    %236 = math.exp %235 : vector<2x128xf32>
    %cst_52 = arith.constant 1.000000e+00 : f32
    %237 = vector.broadcast %cst_52 : f32 to vector<2x128xf32>
    %238 = arith.addf %237, %236 : vector<2x128xf32>
    %239 = arith.divf %237, %238 : vector<2x128xf32>
    %240 = vector.extract_strided_slice %227 {offsets = [0, 256], sizes = [2, 128], strides = [1, 1]} : vector<2x512xf32> to vector<2x128xf32>
    %241 = math.tanh %240 : vector<2x128xf32>
    %242 = vector.extract_strided_slice %227 {offsets = [0, 384], sizes = [2, 128], strides = [1, 1]} : vector<2x512xf32> to vector<2x128xf32>
    %243 = arith.negf %242 : vector<2x128xf32>
    %244 = math.exp %243 : vector<2x128xf32>
    %cst_53 = arith.constant 1.000000e+00 : f32
    %245 = vector.broadcast %cst_53 : f32 to vector<2x128xf32>
    %246 = arith.addf %245, %244 : vector<2x128xf32>
    %247 = arith.divf %245, %246 : vector<2x128xf32>
    %248 = arith.mulf %239, %221 : vector<2x128xf32>
    %249 = arith.mulf %233, %241 : vector<2x128xf32>
    %250 = arith.addf %248, %249 : vector<2x128xf32>
    %251 = math.tanh %250 : vector<2x128xf32>
    %252 = arith.mulf %247, %251 : vector<2x128xf32>
    %253 = vector.shape_cast %49 : vector<2x128xf32> to vector<2x1x128xf32>
    %254 = vector.shape_cast %78 : vector<2x128xf32> to vector<2x1x128xf32>
    %255 = vector.shape_cast %107 : vector<2x128xf32> to vector<2x1x128xf32>
    %256 = vector.shape_cast %136 : vector<2x128xf32> to vector<2x1x128xf32>
    %257 = vector.shape_cast %165 : vector<2x128xf32> to vector<2x1x128xf32>
    %258 = vector.shape_cast %194 : vector<2x128xf32> to vector<2x1x128xf32>
    %259 = vector.shape_cast %223 : vector<2x128xf32> to vector<2x1x128xf32>
    %260 = vector.shape_cast %252 : vector<2x128xf32> to vector<2x1x128xf32>
    %261 = tpu.concatenate %253, %254, %255, %256, %257, %258, %259, %260 in 1 : vector<2x1x128xf32>, vector<2x1x128xf32>, vector<2x1x128xf32>, vector<2x1x128xf32>, vector<2x1x128xf32>, vector<2x1x128xf32>, vector<2x1x128xf32>, vector<2x1x128xf32> -> vector<2x8x128xf32>
    %262 = vector.shape_cast %261 : vector<2x8x128xf32> to vector<16x128xf32>
    %cst_54 = arith.constant dense<0.000000e+00> : vector<16x512xf32>
    %263 = tpu.matmul %262, %5, %cst_54 {dimension_numbers = #tpu.dot_dimension_numbers<[1], [0], [0], [1], [0, 0, 1, 1], [], []>} : vector<16x128xf32>, vector<128x512xf32>, vector<16x512xf32> -> vector<16x512xf32>
    %264 = vector.broadcast %7 : vector<1x512xf32> to vector<16x512xf32>
    %265 = arith.addf %263, %264 : vector<16x512xf32>
    %266 = vector.shape_cast %265 : vector<16x512xf32> to vector<2x8x512xf32>
    %cst_55 = arith.constant 0.000000e+00 : f32
    %267 = vector.broadcast %cst_55 : f32 to vector<2x128xf32>
    %cst_56 = arith.constant 0.000000e+00 : f32
    %268 = vector.broadcast %cst_56 : f32 to vector<2x128xf32>
    %269 = vector.extract_strided_slice %266 {offsets = [0, 0, 0], sizes = [2, 1, 512], strides = [1, 1, 1]} : vector<2x8x512xf32> to vector<2x1x512xf32>
    %270 = vector.shape_cast %269 : vector<2x1x512xf32> to vector<2x512xf32>
    %cst_57 = arith.constant dense<0.000000e+00> : vector<2x512xf32>
    %271 = tpu.matmul %267, %6, %cst_57 {dimension_numbers = #tpu.dot_dimension_numbers<[1], [0], [0], [1], [0, 0, 1, 1], [], []>} : vector<2x128xf32>, vector<128x512xf32>, vector<2x512xf32> -> vector<2x512xf32>
    %272 = arith.addf %270, %271 : vector<2x512xf32>
    %273 = vector.extract_strided_slice %272 {offsets = [0, 0], sizes = [2, 128], strides = [1, 1]} : vector<2x512xf32> to vector<2x128xf32>
    %274 = arith.negf %273 : vector<2x128xf32>
    %275 = math.exp %274 : vector<2x128xf32>
    %cst_58 = arith.constant 1.000000e+00 : f32
    %276 = vector.broadcast %cst_58 : f32 to vector<2x128xf32>
    %277 = arith.addf %276, %275 : vector<2x128xf32>
    %278 = arith.divf %276, %277 : vector<2x128xf32>
    %279 = vector.extract_strided_slice %272 {offsets = [0, 128], sizes = [2, 128], strides = [1, 1]} : vector<2x512xf32> to vector<2x128xf32>
    %280 = arith.negf %279 : vector<2x128xf32>
    %281 = math.exp %280 : vector<2x128xf32>
    %cst_59 = arith.constant 1.000000e+00 : f32
    %282 = vector.broadcast %cst_59 : f32 to vector<2x128xf32>
    %283 = arith.addf %282, %281 : vector<2x128xf32>
    %284 = arith.divf %282, %283 : vector<2x128xf32>
    %285 = vector.extract_strided_slice %272 {offsets = [0, 256], sizes = [2, 128], strides = [1, 1]} : vector<2x512xf32> to vector<2x128xf32>
    %286 = math.tanh %285 : vector<2x128xf32>
    %287 = vector.extract_strided_slice %272 {offsets = [0, 384], sizes = [2, 128], strides = [1, 1]} : vector<2x512xf32> to vector<2x128xf32>
    %288 = arith.negf %287 : vector<2x128xf32>
    %289 = math.exp %288 : vector<2x128xf32>
    %cst_60 = arith.constant 1.000000e+00 : f32
    %290 = vector.broadcast %cst_60 : f32 to vector<2x128xf32>
    %291 = arith.addf %290, %289 : vector<2x128xf32>
    %292 = arith.divf %290, %291 : vector<2x128xf32>
    %293 = arith.mulf %284, %268 : vector<2x128xf32>
    %294 = arith.mulf %278, %286 : vector<2x128xf32>
    %295 = arith.addf %293, %294 : vector<2x128xf32>
    %296 = math.tanh %295 : vector<2x128xf32>
    %297 = arith.mulf %292, %296 : vector<2x128xf32>
    %298 = vector.extract_strided_slice %266 {offsets = [0, 1, 0], sizes = [2, 1, 512], strides = [1, 1, 1]} : vector<2x8x512xf32> to vector<2x1x512xf32>
    %299 = vector.shape_cast %298 : vector<2x1x512xf32> to vector<2x512xf32>
    %cst_61 = arith.constant dense<0.000000e+00> : vector<2x512xf32>
    %300 = tpu.matmul %297, %6, %cst_61 {dimension_numbers = #tpu.dot_dimension_numbers<[1], [0], [0], [1], [0, 0, 1, 1], [], []>} : vector<2x128xf32>, vector<128x512xf32>, vector<2x512xf32> -> vector<2x512xf32>
    %301 = arith.addf %299, %300 : vector<2x512xf32>
    %302 = vector.extract_strided_slice %301 {offsets = [0, 0], sizes = [2, 128], strides = [1, 1]} : vector<2x512xf32> to vector<2x128xf32>
    %303 = arith.negf %302 : vector<2x128xf32>
    %304 = math.exp %303 : vector<2x128xf32>
    %cst_62 = arith.constant 1.000000e+00 : f32
    %305 = vector.broadcast %cst_62 : f32 to vector<2x128xf32>
    %306 = arith.addf %305, %304 : vector<2x128xf32>
    %307 = arith.divf %305, %306 : vector<2x128xf32>
    %308 = vector.extract_strided_slice %301 {offsets = [0, 128], sizes = [2, 128], strides = [1, 1]} : vector<2x512xf32> to vector<2x128xf32>
    %309 = arith.negf %308 : vector<2x128xf32>
    %310 = math.exp %309 : vector<2x128xf32>
    %cst_63 = arith.constant 1.000000e+00 : f32
    %311 = vector.broadcast %cst_63 : f32 to vector<2x128xf32>
    %312 = arith.addf %311, %310 : vector<2x128xf32>
    %313 = arith.divf %311, %312 : vector<2x128xf32>
    %314 = vector.extract_strided_slice %301 {offsets = [0, 256], sizes = [2, 128], strides = [1, 1]} : vector<2x512xf32> to vector<2x128xf32>
    %315 = math.tanh %314 : vector<2x128xf32>
    %316 = vector.extract_strided_slice %301 {offsets = [0, 384], sizes = [2, 128], strides = [1, 1]} : vector<2x512xf32> to vector<2x128xf32>
    %317 = arith.negf %316 : vector<2x128xf32>
    %318 = math.exp %317 : vector<2x128xf32>
    %cst_64 = arith.constant 1.000000e+00 : f32
    %319 = vector.broadcast %cst_64 : f32 to vector<2x128xf32>
    %320 = arith.addf %319, %318 : vector<2x128xf32>
    %321 = arith.divf %319, %320 : vector<2x128xf32>
    %322 = arith.mulf %313, %295 : vector<2x128xf32>
    %323 = arith.mulf %307, %315 : vector<2x128xf32>
    %324 = arith.addf %322, %323 : vector<2x128xf32>
    %325 = math.tanh %324 : vector<2x128xf32>
    %326 = arith.mulf %321, %325 : vector<2x128xf32>
    %327 = vector.extract_strided_slice %266 {offsets = [0, 2, 0], sizes = [2, 1, 512], strides = [1, 1, 1]} : vector<2x8x512xf32> to vector<2x1x512xf32>
    %328 = vector.shape_cast %327 : vector<2x1x512xf32> to vector<2x512xf32>
    %cst_65 = arith.constant dense<0.000000e+00> : vector<2x512xf32>
    %329 = tpu.matmul %326, %6, %cst_65 {dimension_numbers = #tpu.dot_dimension_numbers<[1], [0], [0], [1], [0, 0, 1, 1], [], []>} : vector<2x128xf32>, vector<128x512xf32>, vector<2x512xf32> -> vector<2x512xf32>
    %330 = arith.addf %328, %329 : vector<2x512xf32>
    %331 = vector.extract_strided_slice %330 {offsets = [0, 0], sizes = [2, 128], strides = [1, 1]} : vector<2x512xf32> to vector<2x128xf32>
    %332 = arith.negf %331 : vector<2x128xf32>
    %333 = math.exp %332 : vector<2x128xf32>
    %cst_66 = arith.constant 1.000000e+00 : f32
    %334 = vector.broadcast %cst_66 : f32 to vector<2x128xf32>
    %335 = arith.addf %334, %333 : vector<2x128xf32>
    %336 = arith.divf %334, %335 : vector<2x128xf32>
    %337 = vector.extract_strided_slice %330 {offsets = [0, 128], sizes = [2, 128], strides = [1, 1]} : vector<2x512xf32> to vector<2x128xf32>
    %338 = arith.negf %337 : vector<2x128xf32>
    %339 = math.exp %338 : vector<2x128xf32>
    %cst_67 = arith.constant 1.000000e+00 : f32
    %340 = vector.broadcast %cst_67 : f32 to vector<2x128xf32>
    %341 = arith.addf %340, %339 : vector<2x128xf32>
    %342 = arith.divf %340, %341 : vector<2x128xf32>
    %343 = vector.extract_strided_slice %330 {offsets = [0, 256], sizes = [2, 128], strides = [1, 1]} : vector<2x512xf32> to vector<2x128xf32>
    %344 = math.tanh %343 : vector<2x128xf32>
    %345 = vector.extract_strided_slice %330 {offsets = [0, 384], sizes = [2, 128], strides = [1, 1]} : vector<2x512xf32> to vector<2x128xf32>
    %346 = arith.negf %345 : vector<2x128xf32>
    %347 = math.exp %346 : vector<2x128xf32>
    %cst_68 = arith.constant 1.000000e+00 : f32
    %348 = vector.broadcast %cst_68 : f32 to vector<2x128xf32>
    %349 = arith.addf %348, %347 : vector<2x128xf32>
    %350 = arith.divf %348, %349 : vector<2x128xf32>
    %351 = arith.mulf %342, %324 : vector<2x128xf32>
    %352 = arith.mulf %336, %344 : vector<2x128xf32>
    %353 = arith.addf %351, %352 : vector<2x128xf32>
    %354 = math.tanh %353 : vector<2x128xf32>
    %355 = arith.mulf %350, %354 : vector<2x128xf32>
    %356 = vector.extract_strided_slice %266 {offsets = [0, 3, 0], sizes = [2, 1, 512], strides = [1, 1, 1]} : vector<2x8x512xf32> to vector<2x1x512xf32>
    %357 = vector.shape_cast %356 : vector<2x1x512xf32> to vector<2x512xf32>
    %cst_69 = arith.constant dense<0.000000e+00> : vector<2x512xf32>
    %358 = tpu.matmul %355, %6, %cst_69 {dimension_numbers = #tpu.dot_dimension_numbers<[1], [0], [0], [1], [0, 0, 1, 1], [], []>} : vector<2x128xf32>, vector<128x512xf32>, vector<2x512xf32> -> vector<2x512xf32>
    %359 = arith.addf %357, %358 : vector<2x512xf32>
    %360 = vector.extract_strided_slice %359 {offsets = [0, 0], sizes = [2, 128], strides = [1, 1]} : vector<2x512xf32> to vector<2x128xf32>
    %361 = arith.negf %360 : vector<2x128xf32>
    %362 = math.exp %361 : vector<2x128xf32>
    %cst_70 = arith.constant 1.000000e+00 : f32
    %363 = vector.broadcast %cst_70 : f32 to vector<2x128xf32>
    %364 = arith.addf %363, %362 : vector<2x128xf32>
    %365 = arith.divf %363, %364 : vector<2x128xf32>
    %366 = vector.extract_strided_slice %359 {offsets = [0, 128], sizes = [2, 128], strides = [1, 1]} : vector<2x512xf32> to vector<2x128xf32>
    %367 = arith.negf %366 : vector<2x128xf32>
    %368 = math.exp %367 : vector<2x128xf32>
    %cst_71 = arith.constant 1.000000e+00 : f32
    %369 = vector.broadcast %cst_71 : f32 to vector<2x128xf32>
    %370 = arith.addf %369, %368 : vector<2x128xf32>
    %371 = arith.divf %369, %370 : vector<2x128xf32>
    %372 = vector.extract_strided_slice %359 {offsets = [0, 256], sizes = [2, 128], strides = [1, 1]} : vector<2x512xf32> to vector<2x128xf32>
    %373 = math.tanh %372 : vector<2x128xf32>
    %374 = vector.extract_strided_slice %359 {offsets = [0, 384], sizes = [2, 128], strides = [1, 1]} : vector<2x512xf32> to vector<2x128xf32>
    %375 = arith.negf %374 : vector<2x128xf32>
    %376 = math.exp %375 : vector<2x128xf32>
    %cst_72 = arith.constant 1.000000e+00 : f32
    %377 = vector.broadcast %cst_72 : f32 to vector<2x128xf32>
    %378 = arith.addf %377, %376 : vector<2x128xf32>
    %379 = arith.divf %377, %378 : vector<2x128xf32>
    %380 = arith.mulf %371, %353 : vector<2x128xf32>
    %381 = arith.mulf %365, %373 : vector<2x128xf32>
    %382 = arith.addf %380, %381 : vector<2x128xf32>
    %383 = math.tanh %382 : vector<2x128xf32>
    %384 = arith.mulf %379, %383 : vector<2x128xf32>
    %385 = vector.extract_strided_slice %266 {offsets = [0, 4, 0], sizes = [2, 1, 512], strides = [1, 1, 1]} : vector<2x8x512xf32> to vector<2x1x512xf32>
    %386 = vector.shape_cast %385 : vector<2x1x512xf32> to vector<2x512xf32>
    %cst_73 = arith.constant dense<0.000000e+00> : vector<2x512xf32>
    %387 = tpu.matmul %384, %6, %cst_73 {dimension_numbers = #tpu.dot_dimension_numbers<[1], [0], [0], [1], [0, 0, 1, 1], [], []>} : vector<2x128xf32>, vector<128x512xf32>, vector<2x512xf32> -> vector<2x512xf32>
    %388 = arith.addf %386, %387 : vector<2x512xf32>
    %389 = vector.extract_strided_slice %388 {offsets = [0, 0], sizes = [2, 128], strides = [1, 1]} : vector<2x512xf32> to vector<2x128xf32>
    %390 = arith.negf %389 : vector<2x128xf32>
    %391 = math.exp %390 : vector<2x128xf32>
    %cst_74 = arith.constant 1.000000e+00 : f32
    %392 = vector.broadcast %cst_74 : f32 to vector<2x128xf32>
    %393 = arith.addf %392, %391 : vector<2x128xf32>
    %394 = arith.divf %392, %393 : vector<2x128xf32>
    %395 = vector.extract_strided_slice %388 {offsets = [0, 128], sizes = [2, 128], strides = [1, 1]} : vector<2x512xf32> to vector<2x128xf32>
    %396 = arith.negf %395 : vector<2x128xf32>
    %397 = math.exp %396 : vector<2x128xf32>
    %cst_75 = arith.constant 1.000000e+00 : f32
    %398 = vector.broadcast %cst_75 : f32 to vector<2x128xf32>
    %399 = arith.addf %398, %397 : vector<2x128xf32>
    %400 = arith.divf %398, %399 : vector<2x128xf32>
    %401 = vector.extract_strided_slice %388 {offsets = [0, 256], sizes = [2, 128], strides = [1, 1]} : vector<2x512xf32> to vector<2x128xf32>
    %402 = math.tanh %401 : vector<2x128xf32>
    %403 = vector.extract_strided_slice %388 {offsets = [0, 384], sizes = [2, 128], strides = [1, 1]} : vector<2x512xf32> to vector<2x128xf32>
    %404 = arith.negf %403 : vector<2x128xf32>
    %405 = math.exp %404 : vector<2x128xf32>
    %cst_76 = arith.constant 1.000000e+00 : f32
    %406 = vector.broadcast %cst_76 : f32 to vector<2x128xf32>
    %407 = arith.addf %406, %405 : vector<2x128xf32>
    %408 = arith.divf %406, %407 : vector<2x128xf32>
    %409 = arith.mulf %400, %382 : vector<2x128xf32>
    %410 = arith.mulf %394, %402 : vector<2x128xf32>
    %411 = arith.addf %409, %410 : vector<2x128xf32>
    %412 = math.tanh %411 : vector<2x128xf32>
    %413 = arith.mulf %408, %412 : vector<2x128xf32>
    %414 = vector.extract_strided_slice %266 {offsets = [0, 5, 0], sizes = [2, 1, 512], strides = [1, 1, 1]} : vector<2x8x512xf32> to vector<2x1x512xf32>
    %415 = vector.shape_cast %414 : vector<2x1x512xf32> to vector<2x512xf32>
    %cst_77 = arith.constant dense<0.000000e+00> : vector<2x512xf32>
    %416 = tpu.matmul %413, %6, %cst_77 {dimension_numbers = #tpu.dot_dimension_numbers<[1], [0], [0], [1], [0, 0, 1, 1], [], []>} : vector<2x128xf32>, vector<128x512xf32>, vector<2x512xf32> -> vector<2x512xf32>
    %417 = arith.addf %415, %416 : vector<2x512xf32>
    %418 = vector.extract_strided_slice %417 {offsets = [0, 0], sizes = [2, 128], strides = [1, 1]} : vector<2x512xf32> to vector<2x128xf32>
    %419 = arith.negf %418 : vector<2x128xf32>
    %420 = math.exp %419 : vector<2x128xf32>
    %cst_78 = arith.constant 1.000000e+00 : f32
    %421 = vector.broadcast %cst_78 : f32 to vector<2x128xf32>
    %422 = arith.addf %421, %420 : vector<2x128xf32>
    %423 = arith.divf %421, %422 : vector<2x128xf32>
    %424 = vector.extract_strided_slice %417 {offsets = [0, 128], sizes = [2, 128], strides = [1, 1]} : vector<2x512xf32> to vector<2x128xf32>
    %425 = arith.negf %424 : vector<2x128xf32>
    %426 = math.exp %425 : vector<2x128xf32>
    %cst_79 = arith.constant 1.000000e+00 : f32
    %427 = vector.broadcast %cst_79 : f32 to vector<2x128xf32>
    %428 = arith.addf %427, %426 : vector<2x128xf32>
    %429 = arith.divf %427, %428 : vector<2x128xf32>
    %430 = vector.extract_strided_slice %417 {offsets = [0, 256], sizes = [2, 128], strides = [1, 1]} : vector<2x512xf32> to vector<2x128xf32>
    %431 = math.tanh %430 : vector<2x128xf32>
    %432 = vector.extract_strided_slice %417 {offsets = [0, 384], sizes = [2, 128], strides = [1, 1]} : vector<2x512xf32> to vector<2x128xf32>
    %433 = arith.negf %432 : vector<2x128xf32>
    %434 = math.exp %433 : vector<2x128xf32>
    %cst_80 = arith.constant 1.000000e+00 : f32
    %435 = vector.broadcast %cst_80 : f32 to vector<2x128xf32>
    %436 = arith.addf %435, %434 : vector<2x128xf32>
    %437 = arith.divf %435, %436 : vector<2x128xf32>
    %438 = arith.mulf %429, %411 : vector<2x128xf32>
    %439 = arith.mulf %423, %431 : vector<2x128xf32>
    %440 = arith.addf %438, %439 : vector<2x128xf32>
    %441 = math.tanh %440 : vector<2x128xf32>
    %442 = arith.mulf %437, %441 : vector<2x128xf32>
    %443 = vector.extract_strided_slice %266 {offsets = [0, 6, 0], sizes = [2, 1, 512], strides = [1, 1, 1]} : vector<2x8x512xf32> to vector<2x1x512xf32>
    %444 = vector.shape_cast %443 : vector<2x1x512xf32> to vector<2x512xf32>
    %cst_81 = arith.constant dense<0.000000e+00> : vector<2x512xf32>
    %445 = tpu.matmul %442, %6, %cst_81 {dimension_numbers = #tpu.dot_dimension_numbers<[1], [0], [0], [1], [0, 0, 1, 1], [], []>} : vector<2x128xf32>, vector<128x512xf32>, vector<2x512xf32> -> vector<2x512xf32>
    %446 = arith.addf %444, %445 : vector<2x512xf32>
    %447 = vector.extract_strided_slice %446 {offsets = [0, 0], sizes = [2, 128], strides = [1, 1]} : vector<2x512xf32> to vector<2x128xf32>
    %448 = arith.negf %447 : vector<2x128xf32>
    %449 = math.exp %448 : vector<2x128xf32>
    %cst_82 = arith.constant 1.000000e+00 : f32
    %450 = vector.broadcast %cst_82 : f32 to vector<2x128xf32>
    %451 = arith.addf %450, %449 : vector<2x128xf32>
    %452 = arith.divf %450, %451 : vector<2x128xf32>
    %453 = vector.extract_strided_slice %446 {offsets = [0, 128], sizes = [2, 128], strides = [1, 1]} : vector<2x512xf32> to vector<2x128xf32>
    %454 = arith.negf %453 : vector<2x128xf32>
    %455 = math.exp %454 : vector<2x128xf32>
    %cst_83 = arith.constant 1.000000e+00 : f32
    %456 = vector.broadcast %cst_83 : f32 to vector<2x128xf32>
    %457 = arith.addf %456, %455 : vector<2x128xf32>
    %458 = arith.divf %456, %457 : vector<2x128xf32>
    %459 = vector.extract_strided_slice %446 {offsets = [0, 256], sizes = [2, 128], strides = [1, 1]} : vector<2x512xf32> to vector<2x128xf32>
    %460 = math.tanh %459 : vector<2x128xf32>
    %461 = vector.extract_strided_slice %446 {offsets = [0, 384], sizes = [2, 128], strides = [1, 1]} : vector<2x512xf32> to vector<2x128xf32>
    %462 = arith.negf %461 : vector<2x128xf32>
    %463 = math.exp %462 : vector<2x128xf32>
    %cst_84 = arith.constant 1.000000e+00 : f32
    %464 = vector.broadcast %cst_84 : f32 to vector<2x128xf32>
    %465 = arith.addf %464, %463 : vector<2x128xf32>
    %466 = arith.divf %464, %465 : vector<2x128xf32>
    %467 = arith.mulf %458, %440 : vector<2x128xf32>
    %468 = arith.mulf %452, %460 : vector<2x128xf32>
    %469 = arith.addf %467, %468 : vector<2x128xf32>
    %470 = math.tanh %469 : vector<2x128xf32>
    %471 = arith.mulf %466, %470 : vector<2x128xf32>
    %472 = vector.extract_strided_slice %266 {offsets = [0, 7, 0], sizes = [2, 1, 512], strides = [1, 1, 1]} : vector<2x8x512xf32> to vector<2x1x512xf32>
    %473 = vector.shape_cast %472 : vector<2x1x512xf32> to vector<2x512xf32>
    %cst_85 = arith.constant dense<0.000000e+00> : vector<2x512xf32>
    %474 = tpu.matmul %471, %6, %cst_85 {dimension_numbers = #tpu.dot_dimension_numbers<[1], [0], [0], [1], [0, 0, 1, 1], [], []>} : vector<2x128xf32>, vector<128x512xf32>, vector<2x512xf32> -> vector<2x512xf32>
    %475 = arith.addf %473, %474 : vector<2x512xf32>
    %476 = vector.extract_strided_slice %475 {offsets = [0, 0], sizes = [2, 128], strides = [1, 1]} : vector<2x512xf32> to vector<2x128xf32>
    %477 = arith.negf %476 : vector<2x128xf32>
    %478 = math.exp %477 : vector<2x128xf32>
    %cst_86 = arith.constant 1.000000e+00 : f32
    %479 = vector.broadcast %cst_86 : f32 to vector<2x128xf32>
    %480 = arith.addf %479, %478 : vector<2x128xf32>
    %481 = arith.divf %479, %480 : vector<2x128xf32>
    %482 = vector.extract_strided_slice %475 {offsets = [0, 128], sizes = [2, 128], strides = [1, 1]} : vector<2x512xf32> to vector<2x128xf32>
    %483 = arith.negf %482 : vector<2x128xf32>
    %484 = math.exp %483 : vector<2x128xf32>
    %cst_87 = arith.constant 1.000000e+00 : f32
    %485 = vector.broadcast %cst_87 : f32 to vector<2x128xf32>
    %486 = arith.addf %485, %484 : vector<2x128xf32>
    %487 = arith.divf %485, %486 : vector<2x128xf32>
    %488 = vector.extract_strided_slice %475 {offsets = [0, 256], sizes = [2, 128], strides = [1, 1]} : vector<2x512xf32> to vector<2x128xf32>
    %489 = math.tanh %488 : vector<2x128xf32>
    %490 = vector.extract_strided_slice %475 {offsets = [0, 384], sizes = [2, 128], strides = [1, 1]} : vector<2x512xf32> to vector<2x128xf32>
    %491 = arith.negf %490 : vector<2x128xf32>
    %492 = math.exp %491 : vector<2x128xf32>
    %cst_88 = arith.constant 1.000000e+00 : f32
    %493 = vector.broadcast %cst_88 : f32 to vector<2x128xf32>
    %494 = arith.addf %493, %492 : vector<2x128xf32>
    %495 = arith.divf %493, %494 : vector<2x128xf32>
    %496 = arith.mulf %487, %469 : vector<2x128xf32>
    %497 = arith.mulf %481, %489 : vector<2x128xf32>
    %498 = arith.addf %496, %497 : vector<2x128xf32>
    %499 = math.tanh %498 : vector<2x128xf32>
    %500 = arith.mulf %495, %499 : vector<2x128xf32>
    %c0_89 = arith.constant 0 : index
    %c0_90 = arith.constant 0 : index
    %501 = vector.load %arg10[%c0_89, %c0_90] : memref<128x1xf32, #tpu.memory_space<vmem>>, vector<128x1xf32>
    %cst_91 = arith.constant dense<0.000000e+00> : vector<2x1xf32>
    %502 = tpu.matmul %252, %501, %cst_91 {dimension_numbers = #tpu.dot_dimension_numbers<[1], [0], [0], [1], [0, 0, 1, 1], [], []>} : vector<2x128xf32>, vector<128x1xf32>, vector<2x1xf32> -> vector<2x1xf32>
    %c0_92 = arith.constant 0 : index
    %c0_93 = arith.constant 0 : index
    %503 = vector.load %arg11[%c0_92, %c0_93] : memref<128x1xf32, #tpu.memory_space<vmem>>, vector<128x1xf32>
    %cst_94 = arith.constant dense<0.000000e+00> : vector<2x1xf32>
    %504 = tpu.matmul %500, %503, %cst_94 {dimension_numbers = #tpu.dot_dimension_numbers<[1], [0], [0], [1], [0, 0, 1, 1], [], []>} : vector<2x128xf32>, vector<128x1xf32>, vector<2x1xf32> -> vector<2x1xf32>
    %505 = arith.addf %502, %504 : vector<2x1xf32>
    %c0_95 = arith.constant 0 : index
    %c0_96 = arith.constant 0 : index
    %506 = vector.load %arg12[%c0_95, %c0_96] : memref<1x1xf32, #tpu.memory_space<vmem>>, vector<1x1xf32>
    %507 = vector.broadcast %506 : vector<1x1xf32> to vector<2x1xf32>
    %508 = arith.addf %505, %507 : vector<2x1xf32>
    %c0_97 = arith.constant 0 : index
    %c0_98 = arith.constant 0 : index
    %509 = vector.load %arg13[%c0_97, %c0_98] : memref<2x1xf32, #tpu.memory_space<vmem>>, vector<2x1xf32>
    tpu.vector_store %arg13[%c0_97, %c0_98], %508 {strides = array<i32>} : memref<2x1xf32, #tpu.memory_space<vmem>>, vector<2x1xf32>,
    return
  }
  func.func @transform_0(%arg0: i32) -> (i32, i32, i32) {
    %c0_i32 = arith.constant 0 : i32
    %c0_i32_0 = arith.constant 0 : i32
    %c0_i32_1 = arith.constant 0 : i32
    %c0_i32_2 = arith.constant 0 : i32
    return %c0_i32, %c0_i32_0, %c0_i32_1 : i32, i32, i32
  }
  func.func @transform_1(%arg0: i32) -> (i32, i32) {
    %c0_i32 = arith.constant 0 : i32
    %c0_i32_0 = arith.constant 0 : i32
    %c0_i32_1 = arith.constant 0 : i32
    return %c0_i32, %c0_i32_0 : i32, i32
  }
  func.func @transform_2(%arg0: i32) -> (i32, i32) {
    %c0_i32 = arith.constant 0 : i32
    %c0_i32_0 = arith.constant 0 : i32
    %c0_i32_1 = arith.constant 0 : i32
    return %c0_i32, %c0_i32_0 : i32, i32
  }
  func.func @transform_3(%arg0: i32) -> (i32, i32) {
    %c0_i32 = arith.constant 0 : i32
    %c0_i32_0 = arith.constant 0 : i32
    %c0_i32_1 = arith.constant 0 : i32
    return %c0_i32, %c0_i32_0 : i32, i32
  }
  func.func @transform_4(%arg0: i32) -> (i32, i32) {
    %c0_i32 = arith.constant 0 : i32
    %c0_i32_0 = arith.constant 0 : i32
    %c0_i32_1 = arith.constant 0 : i32
    return %c0_i32, %c0_i32_0 : i32, i32
  }
  func.func @transform_5(%arg0: i32) -> (i32, i32) {
    %c0_i32 = arith.constant 0 : i32
    %c0_i32_0 = arith.constant 0 : i32
    %c0_i32_1 = arith.constant 0 : i32
    return %c0_i32, %c0_i32_0 : i32, i32
  }
  func.func @transform_6(%arg0: i32) -> (i32, i32) {
    %c0_i32 = arith.constant 0 : i32
    %c0_i32_0 = arith.constant 0 : i32
    %c0_i32_1 = arith.constant 0 : i32
    return %c0_i32, %c0_i32_0 : i32, i32
  }
  func.func @transform_7(%arg0: i32) -> (i32, i32) {
    %c0_i32 = arith.constant 0 : i32
    %c0_i32_0 = arith.constant 0 : i32
    %c0_i32_1 = arith.constant 0 : i32
    return %c0_i32, %c0_i32_0 : i32, i32
  }
  func.func @transform_8(%arg0: i32) -> (i32, i32) {
    %c0_i32 = arith.constant 0 : i32
    %c0_i32_0 = arith.constant 0 : i32
    %c0_i32_1 = arith.constant 0 : i32
    return %c0_i32, %c0_i32_0 : i32, i32
  }
  func.func @transform_9(%arg0: i32) -> (i32, i32) {
    %c0_i32 = arith.constant 0 : i32
    %c0_i32_0 = arith.constant 0 : i32
    %c0_i32_1 = arith.constant 0 : i32
    return %c0_i32, %c0_i32_0 : i32, i32
  }
  func.func @transform_10(%arg0: i32) -> (i32, i32) {
    %c0_i32 = arith.constant 0 : i32
    %c0_i32_0 = arith.constant 0 : i32
    %c0_i32_1 = arith.constant 0 : i32
    return %c0_i32, %c0_i32_0 : i32, i32
  }
  func.func @transform_11(%arg0: i32) -> (i32, i32) {
    %c0_i32 = arith.constant 0 : i32
    %c0_i32_0 = arith.constant 0 : i32
    %c0_i32_1 = arith.constant 0 : i32
    return %c0_i32, %c0_i32_0 : i32, i32
  }
  func.func @transform_12(%arg0: i32) -> (i32, i32) {
    %c0_i32 = arith.constant 0 : i32
    %c0_i32_0 = arith.constant 0 : i32
    %c0_i32_1 = arith.constant 0 : i32
    return %c0_i32, %c0_i32_0 : i32, i32
  }
}

</mosaic_0001>

<bundles_post_ra>
// kernel: tpu_custom_call.1
= control target key start
LH: loop header
LB: loop body
LE: loop exit
PB: predicated region body
PF: predicated region fallthrough
CT: control target
= control target key end

     0   :  { %s8025_s0 = inlined_call_operand.vmem [shape: f32[2,8,1], index: 0, kind: input, shape index: {}]   ;;  %s8026_s1 = inlined_call_operand.vmem [shape: f32[1,128], index: 1, kind: input, shape index: {}]   ;;  %s8027_s2 = inlined_call_operand.vmem [shape: f32[1,128], index: 2, kind: input, shape index: {}]   ;;  %s8028_s3 = inlined_call_operand.hbm [shape: f32[128,512], index: 3, kind: input, shape index: {}]   ;;  %s8029_s4 = inlined_call_operand.hbm [shape: f32[128,512], index: 4, kind: input, shape index: {}]   ;;  %s8030_s5 = inlined_call_operand.vmem [shape: f32[1,512], index: 5, kind: input, shape index: {}]   ;;  %s8031_s6 = inlined_call_operand.hbm [shape: f32[128,512], index: 6, kind: input, shape index: {}]   ;;  %s8032_s7 = inlined_call_operand.hbm [shape: f32[128,512], index: 7, kind: input, shape index: {}]   ;;  %s8033_s8 = inlined_call_operand.vmem [shape: f32[1,512], index: 8, kind: input, shape index: {}]   ;;  %s8034_s9 = inlined_call_operand.vmem [shape: f32[128,1], index: 9, kind: input, shape index: {}]   ;;  %s8035_s10 = inlined_call_operand.vmem [shape: f32[128,1], index: 10, kind: input, shape index: {}]   ;;  %s8036_s11 = inlined_call_operand.<no memory space> [shape: f32[1,1], index: 11, kind: input, shape index: {}]   ;;  %s8037_s12 = inlined_call_operand.vmem [shape: f32[2,1], index: 12, kind: output, shape index: {}]  }
   0x1   :  { %v17_v0 = vstv %s8036_s11 }
   0x2   :  { %18 = vst [vmem:[#allocation2] sm:$0x1] %v17_v0 }
   0x3   :  { %19 = vsyncpa [#allocation4], 0 }
   0x4   :  { %20 = vsyncpa [#allocation6], 0 }
   0x5   :  { %21 = vsyncpa [#allocation9], 0  ;;  %s6690_s23 = smov [#allocation5]   ;;  %s6691_s25 = smov [#allocation3]  }
   0x6   :  { %s45_s24 = sshll.u32 %s6690_s23, 4  ;;  %s33_s26 = sshll.u32 %s6691_s25, 4  ;;  %s46_s24 = int_to_ptr.vmem [resolvable:$true] %s45_s24  ;;  %s6767_s26 = int_to_ptr.vmem [resolvable:$true] %s33_s26 }
   0x7   :  { %s6596_s29 = scalar_lea.hbm %s8029_s4, 8192 }
   0x8   :  { %p6597_p0 = scmp.ne.s32.totalorder %s8029_s4, %s6596_s29  ;;  %p6600_p1 = scmp.lt.u32.totalorder %s6596_s29, %s8029_s4 }
   0xa   :  { %p6602_p2 = pnand %p6600_p1, %p6597_p0 }
   0xc   :  { %6605 = shalt.err (!%p6602_p2)
}
   0xd   :  { %s6606_s15 = scalar_lea.vmem %s46_s24, 8192  ;;  %p6611_p4 = scmp.lt.s32.totalorder %s46_s24, %s46_s24 }
   0xe   :  { %p6607_p3 = scmp.ne.s32.totalorder %s46_s24, %s6606_s15  ;;  %p6612_p5 = scmp.lt.s32.totalorder %s6606_s15, %s6606_s15 }
  0x10   :  { %p6613_p6 = por %p6612_p5, %p6611_p4 }
  0x12   :  { %p6614_p7 = pnand %p6613_p6, %p6607_p3 }
  0x14   :  { %6617 = shalt.err (!%p6614_p7)
}
  0x15   :  { %s6692_s16 = smov 512   ;;  %s6693_s17 = smov 32  }
  0x16   :  { %51 = dma.hbm_to_vmem [thread:$0]  %s8029_s4, 8192, %s46_s24, [#allocation6], %s6692_s16, %s6692_s16, %s6693_s17  }
  0x17   :  { %s6618_s22 = scalar_lea.hbm %s8028_s3, 8192 }
  0x18   :  { %p6619_p8 = scmp.ne.s32.totalorder %s8028_s3, %s6618_s22  ;;  %p6622_p9 = scmp.lt.u32.totalorder %s6618_s22, %s8028_s3 }
  0x1a   :  { %p6624_p10 = pnand %p6622_p9, %p6619_p8 }
  0x1c   :  { %6627 = shalt.err (!%p6624_p10)
}
  0x1d   :  { %s6628_s29 = scalar_lea.vmem %s6767_s26, 8192  ;;  %p6633_p12 = scmp.lt.s32.totalorder %s6767_s26, %s6767_s26 }
  0x1e   :  { %p6629_p11 = scmp.ne.s32.totalorder %s6767_s26, %s6628_s29  ;;  %p6634_p13 = scmp.lt.s32.totalorder %s6628_s29, %s6628_s29 }
  0x20   :  { %p6635_p0 = por %p6634_p13, %p6633_p12 }
  0x22   :  { %p6636_p1 = pnand %p6635_p0, %p6629_p11 }
  0x24   :  { %6639 = shalt.err (!%p6636_p1)
}
  0x25   :  { %39 = dma.hbm_to_vmem [thread:$0]  %s8028_s3, 8192, %s6767_s26, [#allocation4], %s6692_s16, %s6692_s16, %s6693_s17  }
  0x26   :  { %s6694_s30 = smov [#allocation7]   ;;  %s6695_s11 = smov [#allocation8]  }
  0x27   :  { %s59_s13 = sshll.u32 %s6694_s30, 4  ;;  %s71_s14 = sshll.u32 %s6695_s11, 4  ;;  %s60_s13 = int_to_ptr.vmem [resolvable:$true] %s59_s13  ;;  %s6804_s14 = int_to_ptr.vmem [resolvable:$true] %s71_s14 }
  0x28   :  { %s6640_s19 = scalar_lea.hbm %s8031_s6, 8192 }
  0x29   :  { %p6641_p2 = scmp.ne.s32.totalorder %s8031_s6, %s6640_s19  ;;  %p6644_p3 = scmp.lt.u32.totalorder %s6640_s19, %s8031_s6 }
  0x2b   :  { %p6646_p4 = pnand %p6644_p3, %p6641_p2 }
  0x2d   :  { %6649 = shalt.err (!%p6646_p4)
}
  0x2e   :  { %s6650_s3 = scalar_lea.vmem %s60_s13, 8192  ;;  %p6655_p6 = scmp.lt.s32.totalorder %s60_s13, %s60_s13 }
  0x2f   :  { %p6651_p5 = scmp.ne.s32.totalorder %s60_s13, %s6650_s3  ;;  %p6656_p7 = scmp.lt.s32.totalorder %s6650_s3, %s6650_s3 }
  0x31   :  { %p6657_p8 = por %p6656_p7, %p6655_p6 }
  0x33   :  { %p6658_p9 = pnand %p6657_p8, %p6651_p5 }
  0x35   :  { %6661 = shalt.err (!%p6658_p9)
}
  0x36   :  { %65 = dma.hbm_to_vmem [thread:$0]  %s8031_s6, 8192, %s60_s13, [#allocation6], %s6692_s16, %s6692_s16, %s6693_s17  }
  0x37   :  { %s6662_s29 = scalar_lea.hbm %s8032_s7, 8192 }
  0x38   :  { %p6663_p10 = scmp.ne.s32.totalorder %s8032_s7, %s6662_s29  ;;  %p6666_p11 = scmp.lt.u32.totalorder %s6662_s29, %s8032_s7 }
  0x3a   :  { %p6668_p12 = pnand %p6666_p11, %p6663_p10 }
  0x3c   :  { %6671 = shalt.err (!%p6668_p12)
}
  0x3d   :  { %s6672_s15 = scalar_lea.vmem %s6804_s14, 8192  ;;  %p6677_p0 = scmp.lt.s32.totalorder %s6804_s14, %s6804_s14 }
  0x3e   :  { %p6673_p13 = scmp.ne.s32.totalorder %s6804_s14, %s6672_s15  ;;  %p6678_p1 = scmp.lt.s32.totalorder %s6672_s15, %s6672_s15 }
  0x40   :  { %p6679_p2 = por %p6678_p1, %p6677_p0 }
  0x42   :  { %p6680_p3 = pnand %p6679_p2, %p6673_p13 }
  0x44   :  { %6683 = shalt.err (!%p6680_p3)
}
  0x45   :  { %77 = dma.hbm_to_vmem [thread:$0]  %s8032_s7, 8192, %s6804_s14, [#allocation9], %s6692_s16, %s6692_s16, %s6693_s17  }
  0x46   :  { %6684 = dma.done.wait [#allocation4], 8192  }
  0x47   :  { %6685 = vsyncadd [#allocation4], 4294959104 }
  0x48   :  { %6686 = dma.done.wait [#allocation6], 16384  }
  0x49   :  { %6687 = vsyncadd [#allocation6], 4294950912 }
  0x4a   :  { %6688 = dma.done.wait [#allocation9], 8192  }
  0x4b   :  { %6689 = vsyncadd [#allocation9], 4294959104  ;;  %vm373_vm0 = vcmask 1040384   ;;  %vm366_vm1 = vcmask 7168   ;;  %v98_v1 = vld [vmem:[%s8026_s1] sm:$0x1] }
  0x4c   :  { %v358_v2 = vld [vmem:[%s8025_s0] sm:$0xff]  ;;  %v359_v3 = vld [vmem:[%s8025_s0 + $0x8] sm:$0xff]  ;;  %4800 = vmatprep.subr.msk.mxu0 %vm373_vm0, %v98_v1  ;;  %v102_v13 = vld [vmem:[#allocation3 + $0x10] sm:$0xff]  ;;  %vm846_vm2 = vcmask 1041409   ;;  %vm2450_vm3 = vcmask 1041408   ;;  %vm2453_vm4 = vcmask 1042432  }
  0x4d   :  { %4802 = vmatprep.mubr.msk.f32.mxu0 %vm366_vm1, %v358_v2  ;;  %v101_v4 = vld [vmem:[#allocation3 + $0x8] sm:$0xff]  ;;  %v103_v6 = vld [vmem:[#allocation3 + $0x18] sm:$0xff]  ;;  %4801 = vmatpush3.msk.msra.mxu0 %vm373_vm0, %v98_v1  ;;  %v100_v9 = vld [vmem:[#allocation3] sm:$0xff]  ;;  %vm2456_vm5 = vcmask 1043456   ;;  %vm2459_vm6 = vcmask 1044480   ;;  %vm2462_vm7 = vcmask 1045504  }
  0x4e   :  { %v105_v5 = vld [vmem:[#allocation3 + $0x28] sm:$0xff]  ;;  %v107_v8 = vld [vmem:[#allocation3 + $0x38] sm:$0xff]  ;;  %v104_v10 = vld [vmem:[#allocation3 + $0x20] sm:$0xff]  ;;  %4803 = vmatmul.mubr.msk.f32.vlgmr.msra.gmra.mrb[0].mxu0 %vm366_vm1, %v359_v3  ;;  %vm2465_vm8 = vcmask 1046528   ;;  %vm6698_vm9 = vmmov 0   ;;  %vm4653_vm10 = vcmask 1024  }
  0x4f   :  { %v4875_v7 = vpack.c.bf16 %v105_v5, %v101_v4  ;;  %v4907_v11 = vpack.c.bf16 %v107_v8, %v103_v6  ;;  %v4877_v12 = vpack.c.bf16 %v104_v10, %v100_v9  ;;  %v106_v14 = vld [vmem:[#allocation3 + $0x30] sm:$0xff]  ;;  %v109_v15 = vld [vmem:[#allocation3 + $0x48] sm:$0xff]  ;;  %v111_v18 = vld [vmem:[#allocation3 + $0x58] sm:$0xff] }
  0x50   :  { %v4909_v16 = vpack.c.bf16 %v106_v14, %v102_v13  ;;  %v113_v17 = vld [vmem:[#allocation3 + $0x68] sm:$0xff]  ;;  %v115_v19 = vld [vmem:[#allocation3 + $0x78] sm:$0xff]  ;;  %v108_v22 = vld [vmem:[#allocation3 + $0x40] sm:$0xff] }
  0x51   :  { %4876 = vmatprep.subr.bf16.mxu1 %v4875_v7  ;;  %4908 = vmatprep.subr.bf16.mxu0 %v4907_v11  ;;  %v4879_v20 = vpack.c.bf16 %v113_v17, %v109_v15  ;;  %v4911_v21 = vpack.c.bf16 %v115_v19, %v111_v18  ;;  %v112_v23 = vld [vmem:[#allocation3 + $0x60] sm:$0xff]  ;;  %v110_v24 = vld [vmem:[#allocation3 + $0x50] sm:$0xff]  ;;  %v117_v27 = vld [vmem:[#allocation3 + $0x88] sm:$0xff] }
  0x52   :  { %4878 = vmatpush1.bf16.msra.mxu1 %v4877_v12  ;;  %4910 = vmatpush1.bf16.msra.mxu0 %v4909_v16  ;;  %v4881_v25 = vpack.c.bf16 %v112_v23, %v108_v22  ;;  %v114_v26 = vld [vmem:[#allocation3 + $0x70] sm:$0xff]  ;;  %v121_v28 = vld [vmem:[#allocation3 + $0xa8] sm:$0xff]  ;;  %v119_v31 = vld [vmem:[#allocation3 + $0x98] sm:$0xff] }
  0x53   :  { %4880 = vmatprep.subr.bf16.mxu1 %v4879_v20  ;;  %4912 = vmatprep.subr.bf16.mxu0 %v4911_v21  ;;  %v4913_v29 = vpack.c.bf16 %v114_v26, %v110_v24  ;;  %v4883_v30 = vpack.c.bf16 %v121_v28, %v117_v27  ;;  %v123_v32 = vld [vmem:[#allocation3 + $0xb8] sm:$0xff]  ;;  %v116_v33 = vld [vmem:[#allocation3 + $0x80] sm:$0xff]  ;;  %v118_v36 = vld [vmem:[#allocation3 + $0x90] sm:$0xff] }
  0x54   :  { %v4915_v34 = vpack.c.bf16 %v123_v32, %v119_v31  ;;  %v120_v35 = vld [vmem:[#allocation3 + $0xa0] sm:$0xff]  ;;  %v122_v37 = vld [vmem:[#allocation3 + $0xb0] sm:$0xff]  ;;  %v125_v39 = vld [vmem:[#allocation3 + $0xc8] sm:$0xff] }
  0x55   :  { %v4885_v38 = vpack.c.bf16 %v120_v35, %v116_v33  ;;  %v129_v40 = vld [vmem:[#allocation3 + $0xe8] sm:$0xff]  ;;  %v127_v41 = vld [vmem:[#allocation3 + $0xd8] sm:$0xff]  ;;  %v4917_v42 = vpack.c.bf16 %v122_v37, %v118_v36  ;;  %v124_v45 = vld [vmem:[#allocation3 + $0xc0] sm:$0xff] }
  0x56   :  { %4882 = vmatpush1.bf16.msra.mxu1 %v4881_v25  ;;  %4914 = vmatpush1.bf16.msra.mxu0 %v4913_v29  ;;  %v4887_v43 = vpack.c.bf16 %v129_v40, %v125_v39  ;;  %v131_v44 = vld [vmem:[#allocation3 + $0xf8] sm:$0xff]  ;;  %v128_v46 = vld [vmem:[#allocation3 + $0xe0] sm:$0xff]  ;;  %v126_v48 = vld [vmem:[#allocation3 + $0xd0] sm:$0xff] }
  0x57   :  { %4884 = vmatprep.subr.bf16.mxu1 %v4883_v30  ;;  %4916 = vmatprep.subr.bf16.mxu0 %v4915_v34  ;;  %v4919_v47 = vpack.c.bf16 %v131_v44, %v127_v41  ;;  %v130_v49 = vld [vmem:[#allocation3 + $0xf0] sm:$0xff]  ;;  %v133_v50 = vld [vmem:[#allocation3 + $0x108] sm:$0xff]  ;;  %v135_v52 = vld [vmem:[#allocation3 + $0x118] sm:$0xff]  ;;  %v4889_v54 = vpack.c.bf16 %v128_v46, %v124_v45 }
  0x58   :  { %v137_v51 = vld [vmem:[#allocation3 + $0x128] sm:$0xff]  ;;  %v139_v53 = vld [vmem:[#allocation3 + $0x138] sm:$0xff]  ;;  %v4921_v55 = vpack.c.bf16 %v130_v49, %v126_v48  ;;  %v132_v57 = vld [vmem:[#allocation3 + $0x100] sm:$0xff] }
  0x59   :  { %v4891_v56 = vpack.c.bf16 %v137_v51, %v133_v50  ;;  %v136_v58 = vld [vmem:[#allocation3 + $0x120] sm:$0xff]  ;;  %v134_v59 = vld [vmem:[#allocation3 + $0x110] sm:$0xff]  ;;  %v4923_v60 = vpack.c.bf16 %v139_v53, %v135_v52  ;;  %v141_v62 = vld [vmem:[#allocation3 + $0x148] sm:$0xff] }
  0x5a   :  { %4886 = vmatpush1.bf16.msra.mxu1 %v4885_v38  ;;  %4918 = vmatpush1.bf16.msra.mxu0 %v4917_v42  ;;  %v138_v61 = vld [vmem:[#allocation3 + $0x130] sm:$0xff]  ;;  %v145_v63 = vld [vmem:[#allocation3 + $0x168] sm:$0xff]  ;;  %v143_v0 = vld [vmem:[#allocation3 + $0x158] sm:$0xff]  ;;  %v4893_v2 = vpack.c.bf16 %v136_v58, %v132_v57  ;;  %v8042_v42 = vmov 0.0  }
  0x5b   :  { %4888 = vmatprep.subr.bf16.mxu1 %v4887_v43  ;;  %4920 = vmatprep.subr.bf16.mxu0 %v4919_v47  ;;  %v147_v1 = vld [vmem:[#allocation3 + $0x178] sm:$0xff]  ;;  %v4925_v3 = vpack.c.bf16 %v138_v61, %v134_v59  ;;  %v4895_v4 = vpack.c.bf16 %v145_v63, %v141_v62  ;;  %v140_v5 = vld [vmem:[#allocation3 + $0x140] sm:$0xff]  ;;  %v142_v7 = vld [vmem:[#allocation3 + $0x150] sm:$0xff] }
  0x5c   :  { %v144_v6 = vld [vmem:[#allocation3 + $0x160] sm:$0xff]  ;;  %v4927_v8 = vpack.c.bf16 %v147_v1, %v143_v0  ;;  %v146_v9 = vld [vmem:[#allocation3 + $0x170] sm:$0xff]  ;;  %v149_v10 = vld [vmem:[#allocation3 + $0x188] sm:$0xff]  ;;  %539 = vmatprep.mubr.f32.mxu1 %v8042_v42  ;;  %616 = vmatprep.mubr.f32.mxu0 %v8042_v42 }
  0x5d   :  { %v153_v11 = vld [vmem:[#allocation3 + $0x1a8] sm:$0xff]  ;;  %v151_v12 = vld [vmem:[#allocation3 + $0x198] sm:$0xff]  ;;  %v4897_v14 = vpack.c.bf16 %v144_v6, %v140_v5  ;;  %v4929_v15 = vpack.c.bf16 %v146_v9, %v142_v7  ;;  %v148_v17 = vld [vmem:[#allocation3 + $0x180] sm:$0xff] }
  0x5e   :  { %4890 = vmatpush1.bf16.msra.mxu1 %v4889_v54  ;;  %4922 = vmatpush1.bf16.msra.mxu0 %v4921_v55  ;;  %v155_v13 = vld [vmem:[#allocation3 + $0x1b8] sm:$0xff]  ;;  %v4899_v16 = vpack.c.bf16 %v153_v11, %v149_v10  ;;  %v152_v18 = vld [vmem:[#allocation3 + $0x1a0] sm:$0xff]  ;;  %v150_v20 = vld [vmem:[#allocation3 + $0x190] sm:$0xff] }
  0x5f   :  { %4892 = vmatprep.subr.bf16.mxu1 %v4891_v56  ;;  %4924 = vmatprep.subr.bf16.mxu0 %v4923_v60  ;;  %v4931_v19 = vpack.c.bf16 %v155_v13, %v151_v12  ;;  %v154_v21 = vld [vmem:[#allocation3 + $0x1b0] sm:$0xff]  ;;  %v4901_v22 = vpack.c.bf16 %v152_v18, %v148_v17  ;;  %v157_v24 = vld [vmem:[#allocation3 + $0x1c8] sm:$0xff]  ;;  %v159_v26 = vld [vmem:[#allocation3 + $0x1d8] sm:$0xff] }
  0x60   :  { %v4933_v23 = vpack.c.bf16 %v154_v21, %v150_v20  ;;  %v161_v25 = vld [vmem:[#allocation3 + $0x1e8] sm:$0xff]  ;;  %v163_v28 = vld [vmem:[#allocation3 + $0x1f8] sm:$0xff]  ;;  %v156_v29 = vld [vmem:[#allocation3 + $0x1c0] sm:$0xff] }
  0x61   :  { %v4903_v27 = vpack.c.bf16 %v161_v25, %v157_v24  ;;  %v160_v30 = vld [vmem:[#allocation3 + $0x1e0] sm:$0xff]  ;;  %v4935_v31 = vpack.c.bf16 %v163_v28, %v159_v26  ;;  %v158_v33 = vld [vmem:[#allocation3 + $0x1d0] sm:$0xff]  ;;  %v165_v36 = vld [vmem:[#allocation5 + $0x8] sm:$0xff] }
  0x62   :  { %4894 = vmatpush1.bf16.msra.mxu1 %v4893_v2  ;;  %4926 = vmatpush1.bf16.msra.mxu0 %v4925_v3  ;;  %v4905_v32 = vpack.c.bf16 %v160_v30, %v156_v29  ;;  %v162_v34 = vld [vmem:[#allocation3 + $0x1f0] sm:$0xff]  ;;  %v169_v37 = vld [vmem:[#allocation5 + $0x28] sm:$0xff]  ;;  %v167_v38 = vld [vmem:[#allocation5 + $0x18] sm:$0xff] }
  0x63   :  { %4896 = vmatprep.subr.bf16.mxu1 %v4895_v4  ;;  %4928 = vmatprep.subr.bf16.mxu0 %v4927_v8  ;;  %v4937_v35 = vpack.c.bf16 %v162_v34, %v158_v33  ;;  %v6852_v39 = vpack.c.bf16 %v169_v37, %v165_v36  ;;  %v171_v40 = vld [vmem:[#allocation5 + $0x38] sm:$0xff]  ;;  %v164_v44 = vld [vmem:[#allocation5] sm:$0xff]  ;;  %v166_v47 = vld [vmem:[#allocation5 + $0x10] sm:$0xff] }
  0x64   :  { %v6854_v41 = vpack.c.bf16 %v171_v40, %v167_v38  ;;  %v4662_v43 = vld [vmem:[%s8027_s2] ss:$0 sm:$0xff]  ;;  %v168_v46 = vld [vmem:[#allocation5 + $0x20] sm:$0xff]  ;;  %v170_v48 = vld [vmem:[#allocation5 + $0x30] sm:$0xff] }
  0x65   :  { %v173_v50 = vld [vmem:[#allocation5 + $0x48] sm:$0xff]  ;;  %v175_v53 = vld [vmem:[#allocation5 + $0x58] sm:$0xff]  ;;  %v6863_v55 = vpack.c.bf16 %v168_v46, %v164_v44  ;;  %v6865_v56 = vpack.c.bf16 %v170_v48, %v166_v47  ;;  %v172_v57 = vld [vmem:[#allocation5 + $0x40] sm:$0xff] }
  0x66   :  { %4898 = vmatpush1.bf16.msra.mxu1 %v4897_v14  ;;  %4930 = vmatpush1.bf16.msra.mxu0 %v4929_v15  ;;  %8048 = vst [vmem:[#allocation13_spill] sm:$0xff] %v6854_v41  ;;  %v177_v52 = vld [vmem:[#allocation5 + $0x68] sm:$0xff]  ;;  %v179_v54 = vld [vmem:[#allocation5 + $0x78] sm:$0xff]  ;;  %v176_v58 = vld [vmem:[#allocation5 + $0x60] sm:$0xff] }
  0x67   :  { %4900 = vmatprep.subr.bf16.mxu1 %v4899_v16  ;;  %4932 = vmatprep.subr.bf16.mxu0 %v4931_v19  ;;  %v174_v61 = vld [vmem:[#allocation5 + $0x50] sm:$0xff]  ;;  %v181_v63 = vld [vmem:[#allocation5 + $0x88] sm:$0xff]  ;;  %v6867_v0 = vpack.c.bf16 %v177_v52, %v173_v50  ;;  %v6869_v1 = vpack.c.bf16 %v179_v54, %v175_v53  ;;  %v183_v3 = vld [vmem:[#allocation5 + $0x98] sm:$0xff]  ;;  %v6873_v5 = vpack.c.bf16 %v176_v58, %v172_v57 }
  0x68   :  { %v178_v62 = vld [vmem:[#allocation5 + $0x70] sm:$0xff]  ;;  %v185_v2 = vld [vmem:[#allocation5 + $0xa8] sm:$0xff]  ;;  %v187_v4 = vld [vmem:[#allocation5 + $0xb8] sm:$0xff] }
  0x69   :  { %v6875_v6 = vpack.c.bf16 %v178_v62, %v174_v61  ;;  %v180_v7 = vld [vmem:[#allocation5 + $0x80] sm:$0xff]  ;;  %v6879_v10 = vpack.c.bf16 %v185_v2, %v181_v63  ;;  %v6881_v11 = vpack.c.bf16 %v187_v4, %v183_v3  ;;  %v182_v12 = vld [vmem:[#allocation5 + $0x90] sm:$0xff]  ;;  %v189_v14 = vld [vmem:[#allocation5 + $0xc8] sm:$0xff] }
  0x6a   :  { %4902 = vmatpush1.bf16.msra.mxu1 %v4901_v22  ;;  %4934 = vmatpush1.bf16.msra.mxu0 %v4933_v23  ;;  %v184_v8 = vld [vmem:[#allocation5 + $0xa0] sm:$0xff]  ;;  %v186_v13 = vld [vmem:[#allocation5 + $0xb0] sm:$0xff]  ;;  %v193_v15 = vld [vmem:[#allocation5 + $0xe8] sm:$0xff] }
  0x6b   :  { %4904 = vmatprep.subr.bf16.mxu1 %v4903_v27  ;;  %4936 = vmatprep.subr.bf16.mxu0 %v4935_v31  ;;  %v191_v16 = vld [vmem:[#allocation5 + $0xd8] sm:$0xff]  ;;  %v6887_v18 = vpack.c.bf16 %v184_v8, %v180_v7  ;;  %v6889_v19 = vpack.c.bf16 %v186_v13, %v182_v12  ;;  %v188_v20 = vld [vmem:[#allocation5 + $0xc0] sm:$0xff]  ;;  %v6893_v22 = vpack.c.bf16 %v193_v15, %v189_v14  ;;  %v190_v24 = vld [vmem:[#allocation5 + $0xd0] sm:$0xff] }
  0x6c   :  { %v195_v17 = vld [vmem:[#allocation5 + $0xf8] sm:$0xff]  ;;  %v192_v21 = vld [vmem:[#allocation5 + $0xe0] sm:$0xff]  ;;  %v194_v25 = vld [vmem:[#allocation5 + $0xf0] sm:$0xff] }
  0x6d   :  { %v6895_v23 = vpack.c.bf16 %v195_v17, %v191_v16  ;;  %v197_v26 = vld [vmem:[#allocation5 + $0x108] sm:$0xff]  ;;  %v199_v28 = vld [vmem:[#allocation5 + $0x118] sm:$0xff]  ;;  %v6901_v30 = vpack.c.bf16 %v192_v21, %v188_v20  ;;  %v6903_v31 = vpack.c.bf16 %v194_v25, %v190_v24  ;;  %v200_v33 = vld [vmem:[#allocation5 + $0x120] sm:$0xff] }
  0x6e   :  { %4906 = vmatpush1.bf16.msra.mxu1 %v4905_v32  ;;  %4938 = vmatpush1.bf16.msra.mxu0 %v4937_v35  ;;  %v201_v27 = vld [vmem:[#allocation5 + $0x128] sm:$0xff]  ;;  %v203_v29 = vld [vmem:[#allocation5 + $0x138] sm:$0xff]  ;;  %v196_v32 = vld [vmem:[#allocation5 + $0x100] sm:$0xff] }
  0x6f   :  { %4940 = vmatprep.subr.bf16.mxu1 %v6852_v39  ;;  %4972 = vmatprep.subr.bf16.mxu0 %v6854_v41  ;;  %v6907_v34 = vpack.c.bf16 %v201_v27, %v197_v26  ;;  %v6909_v35 = vpack.c.bf16 %v203_v29, %v199_v28  ;;  %v198_v36 = vld [vmem:[#allocation5 + $0x110] sm:$0xff]  ;;  %v205_v38 = vld [vmem:[#allocation5 + $0x148] sm:$0xff]  ;;  %v211_v44 = vld [vmem:[#allocation5 + $0x178] sm:$0xff] }
  0x70   :  { %v202_v37 = vld [vmem:[#allocation5 + $0x130] sm:$0xff]  ;;  %v209_v40 = vld [vmem:[#allocation5 + $0x168] sm:$0xff]  ;;  %v204_v47 = vld [vmem:[#allocation5 + $0x140] sm:$0xff] }
  0x71   :  { %v6915_v46 = vpack.c.bf16 %v202_v37, %v198_v36  ;;  %v208_v48 = vld [vmem:[#allocation5 + $0x160] sm:$0xff]  ;;  %v210_v52 = vld [vmem:[#allocation5 + $0x170] sm:$0xff]  ;;  %v213_v53 = vld [vmem:[#allocation5 + $0x188] sm:$0xff] }
  0x72   :  { %v217_v54 = vld [vmem:[#allocation5 + $0x1a8] sm:$0xff]  ;;  %v215_v57 = vld [vmem:[#allocation5 + $0x198] sm:$0xff]  ;;  %v212_v61 = vld [vmem:[#allocation5 + $0x180] sm:$0xff] }
  0x73   :  { %v219_v58 = vld [vmem:[#allocation5 + $0x1b8] sm:$0xff]  ;;  %v216_v62 = vld [vmem:[#allocation5 + $0x1a0] sm:$0xff]  ;;  %v6931_v63 = vpack.c.bf16 %v217_v54, %v213_v53  ;;  %v214_v3 = vld [vmem:[#allocation5 + $0x190] sm:$0xff] }
  0x74   :  { %v6933_v2 = vpack.c.bf16 %v219_v58, %v215_v57  ;;  %v218_v4 = vld [vmem:[#allocation5 + $0x1b0] sm:$0xff]  ;;  %v221_v7 = vld [vmem:[#allocation5 + $0x1c8] sm:$0xff]  ;;  %v227_v12 = vld [vmem:[#allocation5 + $0x1f8] sm:$0xff]  ;;  %v6937_v13 = vpack.c.bf16 %v216_v62, %v212_v61 }
  0x75   :  { %v225_v8 = vld [vmem:[#allocation5 + $0x1e8] sm:$0xff]  ;;  %v6939_v14 = vpack.c.bf16 %v218_v4, %v214_v3  ;;  %v220_v15 = vld [vmem:[#allocation5 + $0x1c0] sm:$0xff]  ;;  %v222_v21 = vld [vmem:[#allocation5 + $0x1d0] sm:$0xff] }
  0x76   :  { %v6943_v16 = vpack.c.bf16 %v225_v8, %v221_v7  ;;  %v224_v20 = vld [vmem:[#allocation5 + $0x1e0] sm:$0xff]  ;;  %v226_v24 = vld [vmem:[#allocation5 + $0x1f0] sm:$0xff] }
  0x77   :  { %v6949_v25 = vpack.c.bf16 %v224_v20, %v220_v15  ;;  %v6951_v26 = vpack.c.bf16 %v226_v24, %v222_v21 }
 0x121   :  { %v4804_v45 = vpop.f32.mrb[0].mxu0 }
 0x122   :  { %v443_v49 = vpop.f32.mrb[1].mxu0  ;;  %v449_v59 = vadd.f32 %v4804_v45, %v4662_v43  ;;  %v6913_v45 = vpack.c.bf16 %v200_v33, %v196_v32 }
 0x123   :  { %v444_v51 = vadd.f32 %v4662_v43, %v443_v49  ;;  %v207_v43 = vld [vmem:[#allocation5 + $0x158] sm:$0xff]  ;;  %v6919_v49 = vpack.c.bf16 %v209_v40, %v205_v38  ;;  %v455_v40 = vlaneseq }
 0x124   :  { %v453_v9 = vmax.f32 %v449_v59, 0.0  ;;  %v6921_v50 = vpack.c.bf16 %v211_v44, %v207_v43  ;;  %v6925_v59 = vpack.c.bf16 %v208_v48, %v204_v47  ;;  %v228_v47 = vld [vmem:[%s8030_s5] sm:$0xf] }
 0x125   :  { %v452_v60 = vmax.f32 %v444_v51, 0.0  ;;  %v206_v51 = vld [vmem:[#allocation5 + $0x150] sm:$0xff]  ;;  %v6995_v43 = vshrl.u32 %v455_v40, 7 }
 0x127   :  { %540 = vmatmul.mubr.f32.vlgmr.msra.gmra.mrb[0].mxu1 %v452_v60  ;;  %617 = vmatmul.mubr.f32.vlgmr.msra.gmra.mrb[2].mxu0 %v452_v60  ;;  %v6927_v60 = vpack.c.bf16 %v210_v52, %v206_v51  ;;  %8049 = vst [vmem:[#allocation14_spill] sm:$0xff] %v6995_v43  ;;  %v8041_v44 = vsub.s32 0, %v6995_v43  ;;  %v8038_v48 = vsub.s32 1, %v6995_v43  ;;  %v8039_v53 = vsub.s32 3, %v6995_v43 }
 0x128   :  { %4942 = vmatpush1.bf16.msra.mxu1 %v6863_v55  ;;  %4974 = vmatpush1.bf16.msra.mxu0 %v6865_v56  ;;  %v8040_v62 = vsub.s32 2, %v6995_v43 }
 0x129   :  { %545 = vmatprep.mubr.f32.mxu1 %v8042_v42  ;;  %622 = vmatprep.mubr.f32.mxu0 %v8042_v42  ;;  %v458_v51 = vrot.slane %v228_v47, %v8041_v44  ;;  %v462_v52 = vrot.slane %v228_v47, %v8038_v48 }
 0x12a   :  { %4944 = vmatprep.subr.bf16.mxu1 %v6867_v0  ;;  %4976 = vmatprep.subr.bf16.mxu0 %v6869_v1  ;;  %v466_v40 = vrot.slane %v228_v47, %v8040_v62 }
 0x12b   :  { %546 = vmatmul.mubr.f32.gmra.mrb[2].mxu1 %v453_v9  ;;  %623 = vmatmul.mubr.f32.gmra.mrb[4].mxu0 %v453_v9  ;;  %v223_v9 = vld [vmem:[#allocation5 + $0x1d8] sm:$0xff] }
 0x12c   :  { %4946 = vmatpush1.bf16.msra.mxu1 %v6873_v5  ;;  %4978 = vmatpush1.bf16.msra.mxu0 %v6875_v6  ;;  %v6945_v17 = vpack.c.bf16 %v227_v12, %v223_v9  ;;  %v470_v12 = vrot.slane %v228_v47, %v8039_v53 }
 0x12d   :  { %4948 = vmatprep.subr.bf16.mxu1 %v6879_v10  ;;  %4980 = vmatprep.subr.bf16.mxu0 %v6881_v11 }
 0x12e   :  { %693 = vmatprep.mubr.f32.mxu1 %v8042_v42  ;;  %764 = vmatprep.mubr.f32.mxu0 %v8042_v42 }
 0x130   :  { %4950 = vmatpush1.bf16.msra.mxu1 %v6887_v18  ;;  %4982 = vmatpush1.bf16.msra.mxu0 %v6889_v19 }
 0x131   :  { %4952 = vmatprep.subr.bf16.mxu1 %v6893_v22  ;;  %4984 = vmatprep.subr.bf16.mxu0 %v6895_v23 }
 0x134   :  { %4954 = vmatpush1.bf16.msra.mxu1 %v6901_v30  ;;  %4986 = vmatpush1.bf16.msra.mxu0 %v6903_v31 }
 0x135   :  { %4956 = vmatprep.subr.bf16.mxu1 %v6907_v34  ;;  %4988 = vmatprep.subr.bf16.mxu0 %v6909_v35 }
 0x138   :  { %4958 = vmatpush1.bf16.msra.mxu1 %v6913_v45  ;;  %4990 = vmatpush1.bf16.msra.mxu0 %v6915_v46 }
 0x139   :  { %4960 = vmatprep.subr.bf16.mxu1 %v6919_v49  ;;  %4992 = vmatprep.subr.bf16.mxu0 %v6921_v50 }
 0x13c   :  { %4962 = vmatpush1.bf16.msra.mxu1 %v6925_v59  ;;  %4994 = vmatpush1.bf16.msra.mxu0 %v6927_v60 }
 0x13d   :  { %4964 = vmatprep.subr.bf16.mxu1 %v6931_v63  ;;  %4996 = vmatprep.subr.bf16.mxu0 %v6933_v2 }
 0x140   :  { %4966 = vmatpush1.bf16.msra.mxu1 %v6937_v13  ;;  %4998 = vmatpush1.bf16.msra.mxu0 %v6939_v14 }
 0x141   :  { %4968 = vmatprep.subr.bf16.mxu1 %v6943_v16  ;;  %5000 = vmatprep.subr.bf16.mxu0 %v6945_v17 }
 0x144   :  { %4970 = vmatpush1.bf16.msra.mxu1 %v6949_v25  ;;  %5002 = vmatpush1.bf16.msra.mxu0 %v6951_v26 }
 0x145   :  { %5004 = vmatprep.subr.bf16.mxu1 %v6852_v39  ;;  %5036 = vmatprep.subr.bf16.mxu0 %v6854_v41 }
 0x147   :  { %694 = vmatmul.mubr.f32.vlgmr.msra.gmra.mrb[4].mxu1 %v8042_v42  ;;  %765 = vmatmul.mubr.f32.vlgmr.msra.gmra.mrb[6].mxu0 %v8042_v42 }
 0x148   :  { %5006 = vmatpush1.bf16.msra.mxu1 %v6863_v55  ;;  %5038 = vmatpush1.bf16.msra.mxu0 %v6865_v56 }
 0x149   :  { %5008 = vmatprep.subr.bf16.mxu1 %v6867_v0  ;;  %5040 = vmatprep.subr.bf16.mxu0 %v6869_v1 }
 0x14a   :  { %913 = vmatprep.mubr.f32.mxu1 %v8042_v42  ;;  %984 = vmatprep.mubr.f32.mxu0 %v8042_v42 }
 0x14c   :  { %5010 = vmatpush1.bf16.msra.mxu1 %v6873_v5  ;;  %5042 = vmatpush1.bf16.msra.mxu0 %v6875_v6 }
 0x14d   :  { %5012 = vmatprep.subr.bf16.mxu1 %v6879_v10  ;;  %5044 = vmatprep.subr.bf16.mxu0 %v6881_v11 }
 0x150   :  { %5014 = vmatpush1.bf16.msra.mxu1 %v6887_v18  ;;  %5046 = vmatpush1.bf16.msra.mxu0 %v6889_v19 }
 0x151   :  { %5016 = vmatprep.subr.bf16.mxu1 %v6893_v22  ;;  %5048 = vmatprep.subr.bf16.mxu0 %v6895_v23 }
 0x154   :  { %5018 = vmatpush1.bf16.msra.mxu1 %v6901_v30  ;;  %5050 = vmatpush1.bf16.msra.mxu0 %v6903_v31 }
 0x155   :  { %5020 = vmatprep.subr.bf16.mxu1 %v6907_v34  ;;  %5052 = vmatprep.subr.bf16.mxu0 %v6909_v35 }
 0x158   :  { %5022 = vmatpush1.bf16.msra.mxu1 %v6913_v45  ;;  %5054 = vmatpush1.bf16.msra.mxu0 %v6915_v46 }
 0x159   :  { %5024 = vmatprep.subr.bf16.mxu1 %v6919_v49  ;;  %5056 = vmatprep.subr.bf16.mxu0 %v6921_v50 }
 0x15c   :  { %5026 = vmatpush1.bf16.msra.mxu1 %v6925_v59  ;;  %5058 = vmatpush1.bf16.msra.mxu0 %v6927_v60 }
 0x15d   :  { %5028 = vmatprep.subr.bf16.mxu1 %v6931_v63  ;;  %5060 = vmatprep.subr.bf16.mxu0 %v6933_v2 }
 0x160   :  { %5030 = vmatpush1.bf16.msra.mxu1 %v6937_v13  ;;  %5062 = vmatpush1.bf16.msra.mxu0 %v6939_v14 }
 0x161   :  { %5032 = vmatprep.subr.bf16.mxu1 %v6943_v16  ;;  %5064 = vmatprep.subr.bf16.mxu0 %v6945_v17 }
 0x164   :  { %5034 = vmatpush1.bf16.msra.mxu1 %v6949_v25  ;;  %5066 = vmatpush1.bf16.msra.mxu0 %v6951_v26 }
 0x165   :  { %5068 = vmatprep.subr.bf16.mxu1 %v6852_v39  ;;  %5100 = vmatprep.subr.bf16.mxu0 %v6854_v41 }
 0x1fa   :  { %v541_v27 = vpop.f32.mrb[0].mxu1  ;;  %v618_v28 = vpop.f32.mrb[2].mxu0 }
 0x1fb   :  { %v543_v29 = vpop.f32.mrb[1].mxu1  ;;  %v620_v32 = vpop.f32.mrb[3].mxu0  ;;  %v7007_v54 = vadd.f32 %v541_v27, %v458_v51 }
 0x1fc   :  { %v7009_v57 = vadd.f32 %v543_v29, %v462_v52  ;;  %v7024_v48 = vadd.f32 %v620_v32, %v470_v12 }
 0x1fe   :  { %v547_v33 = vpop.f32.mrb[2].mxu1  ;;  %v624_v36 = vpop.f32.mrb[4].mxu0 }
 0x1ff   :  { %v549_v37 = vpop.f32.mrb[3].mxu1  ;;  %v626_v38 = vpop.f32.mrb[5].mxu0  ;;  %v7012_v3 = vadd.f32 %v547_v33, %v458_v51 }
 0x200   :  { %v7017_v15 = vadd.f32 %v549_v37, %v462_v52  ;;  %v7026_v37 = vadd.f32 %v626_v38, %v470_v12 }
 0x21a   :  { %v695_v58 = vpop.f32.mrb[4].mxu1  ;;  %v766_v61 = vpop.f32.mrb[6].mxu0 }
 0x21b   :  { %v775_v4 = vrot.slane %v695_v58, 1  ;;  %v787_v7 = vadd.f32 %v695_v58, %v7007_v54  ;;  %v697_v8 = vpop.f32.mrb[5].mxu1  ;;  %v768_v9 = vpop.f32.mrb[7].mxu0 }
 0x21c   :  { %v776_v20 = vrot.slane %v697_v8, 1  ;;  %v788_v21 = vadd.f32 %v697_v8, %v7009_v57  ;;  %v778_v58 = vrot.slane %v768_v9, 1  ;;  %v790_v52 = vadd.f32 %v768_v9, %v7024_v48 }
 0x21d   :  { %v791_v24 = vadd.f32 %v775_v4, %v7012_v3  ;;  %v4666_v27 = vmul.f32 -1.442695, %v787_v7  ;;  %v7029_v4 = vadd.f32 %v618_v28, %v466_v40  ;;  %v777_v8 = vrot.slane %v766_v61, 1 }
 0x21e   :  { %v792_v29 = vadd.f32 %v776_v20, %v7017_v15  ;;  %v4668_v33 = vmul.f32 -1.442695, %v788_v21  ;;  %v794_v7 = vadd.f32 %v778_v58, %v7026_v37  ;;  %v4670_v20 = vmul.f32 -1.442695, %v790_v52 }
 0x21f   :  { %6084 = vpow2.f32 %v4666_v27  ;;  %v4667_v51 = vmul.f32 -1.442695, %v791_v24  ;;  %v789_v47 = vadd.f32 %v766_v61, %v7029_v4  ;;  %v7033_v21 = vadd.f32 %v624_v36, %v466_v40 }
 0x220   :  { %v4669_v53 = vmul.f32 -1.442695, %v792_v29  ;;  %v4671_v32 = vmul.f32 -1.442695, %v794_v7 }
 0x221   :  { %6086 = vpow2.f32 %v4667_v51  ;;  %v793_v38 = vadd.f32 %v777_v8, %v7033_v21 }
 0x222   :  { %6088 = vpow2.f32 %v4668_v33 }
 0x223   :  { %6090 = vpow2.f32 %v4669_v53 }
 0x224   :  { %6092 = vtanh.f32 %v789_v47 }
 0x225   :  { %6094 = vpow2.f32 %v4670_v20 }
 0x226   :  { %6096 = vpow2.f32 %v4671_v32 }
 0x229   :  { %v6085_v24 = vpop.eup %6084 }
 0x22a   :  { %v801_v12 = vadd.f32 1.0, %v6085_v24 }
 0x22b   :  { %v6087_v27 = vpop.eup %6086 }
 0x22c   :  { %v6089_v28 = vpop.eup %6088  ;;  %v802_v9 = vadd.f32 1.0, %v6087_v27  ;;  %6098 = vrcp.f32 %v801_v12 }
 0x22d   :  { %v6091_v53 = vpop.eup %6090  ;;  %6100 = vtanh.f32 %v793_v38  ;;  %v813_v29 = vadd.f32 1.0, %v6089_v28 }
 0x22e   :  { %6102 = vrcp.f32 %v802_v9  ;;  %v814_v61 = vadd.f32 1.0, %v6091_v53  ;;  %v6093_v36 = vpop.eup %6092 }
 0x22f   :  { %6104 = vrcp.f32 %v813_v29  ;;  %v6095_v33 = vpop.eup %6094 }
 0x230   :  { %6106 = vrcp.f32 %v814_v61  ;;  %v6097_v40 = vpop.eup %6096  ;;  %v827_v8 = vadd.f32 1.0, %v6095_v33 }
 0x231   :  { %v828_v32 = vadd.f32 1.0, %v6097_v40 }
 0x232   :  { %6108 = vrcp.f32 %v827_v8 }
 0x233   :  { %6110 = vrcp.f32 %v828_v32 }
 0x236   :  { %v6099_v51 = vpop.eup %6098 }
 0x237   :  { %v6101_v58 = vpop.eup %6100  ;;  %v835_v52 = vmul.f32 %v6099_v51, %v6093_v36 }
 0x238   :  { %v6103_v7 = vpop.eup %6102 }
 0x239   :  { %v6105_v47 = vpop.eup %6104  ;;  %v836_v20 = vmul.f32 %v6103_v7, %v6101_v58 }
 0x23a   :  { %v6107_v24 = vpop.eup %6106  ;;  %v833_v12 = vmul.f32 0.0, %v6105_v47 }
 0x23b   :  { %v834_v27 = vmul.f32 0.0, %v6107_v24 }
 0x23c   :  { %v7036_v38 = vadd.f32 %v835_v52, %v833_v12  ;;  %v6109_v9 = vpop.eup %6108 }
 0x23d   :  { %v7038_v28 = vadd.f32 %v836_v20, %v834_v27  ;;  %v6111_v53 = vpop.eup %6110 }
 0x23e   :  { %6112 = vtanh.f32 %v7036_v38 }
 0x23f   :  { %6114 = vtanh.f32 %v7038_v28 }
 0x248   :  { %v6113_v29 = vpop.eup %6112 }
 0x249   :  { %v6115_v61 = vpop.eup %6114  ;;  %v7042_v36 = vmul.f32 %v6113_v29, %v6109_v9 }
 0x24a   :  { %v7044_v33 = vmul.f32 %v6115_v61, %v6111_v53 }
 0x24c   :  { %v845_v40 = vrot.slane %v7044_v33, 7 }
 0x24e   :  { %v847_v51 = vsel %vm846_vm2, %v845_v40, %v7042_v36 }
 0x24f   :  { %914 = vmatmul.mubr.f32.vlgmr.msra.gmra.mrb[6].mxu1 %v847_v51  ;;  %985 = vmatmul.mubr.f32.vlgmr.msra.gmra.mrb[8].mxu0 %v847_v51 }
 0x250   :  { %5070 = vmatpush1.bf16.msra.mxu1 %v6863_v55  ;;  %5102 = vmatpush1.bf16.msra.mxu0 %v6865_v56 }
 0x251   :  { %5072 = vmatprep.subr.bf16.mxu1 %v6867_v0  ;;  %5104 = vmatprep.subr.bf16.mxu0 %v6869_v1 }
 0x252   :  { %1138 = vmatprep.mubr.f32.mxu1 %v8042_v42  ;;  %1209 = vmatprep.mubr.f32.mxu0 %v8042_v42 }
 0x254   :  { %5074 = vmatpush1.bf16.msra.mxu1 %v6873_v5  ;;  %5106 = vmatpush1.bf16.msra.mxu0 %v6875_v6 }
 0x255   :  { %5076 = vmatprep.subr.bf16.mxu1 %v6879_v10  ;;  %5108 = vmatprep.subr.bf16.mxu0 %v6881_v11 }
 0x258   :  { %5078 = vmatpush1.bf16.msra.mxu1 %v6887_v18  ;;  %5110 = vmatpush1.bf16.msra.mxu0 %v6889_v19 }
 0x259   :  { %5080 = vmatprep.subr.bf16.mxu1 %v6893_v22  ;;  %5112 = vmatprep.subr.bf16.mxu0 %v6895_v23 }
 0x25c   :  { %5082 = vmatpush1.bf16.msra.mxu1 %v6901_v30  ;;  %5114 = vmatpush1.bf16.msra.mxu0 %v6903_v31 }
 0x25d   :  { %5084 = vmatprep.subr.bf16.mxu1 %v6907_v34  ;;  %5116 = vmatprep.subr.bf16.mxu0 %v6909_v35 }
 0x260   :  { %5086 = vmatpush1.bf16.msra.mxu1 %v6913_v45  ;;  %5118 = vmatpush1.bf16.msra.mxu0 %v6915_v46 }
 0x261   :  { %5088 = vmatprep.subr.bf16.mxu1 %v6919_v49  ;;  %5120 = vmatprep.subr.bf16.mxu0 %v6921_v50 }
 0x264   :  { %5090 = vmatpush1.bf16.msra.mxu1 %v6925_v59  ;;  %5122 = vmatpush1.bf16.msra.mxu0 %v6927_v60 }
 0x265   :  { %5092 = vmatprep.subr.bf16.mxu1 %v6931_v63  ;;  %5124 = vmatprep.subr.bf16.mxu0 %v6933_v2 }
 0x268   :  { %5094 = vmatpush1.bf16.msra.mxu1 %v6937_v13  ;;  %5126 = vmatpush1.bf16.msra.mxu0 %v6939_v14 }
 0x269   :  { %5096 = vmatprep.subr.bf16.mxu1 %v6943_v16  ;;  %5128 = vmatprep.subr.bf16.mxu0 %v6945_v17 }
 0x26c   :  { %5098 = vmatpush1.bf16.msra.mxu1 %v6949_v25  ;;  %5130 = vmatpush1.bf16.msra.mxu0 %v6951_v26 }
 0x26d   :  { %5132 = vmatprep.subr.bf16.mxu1 %v6852_v39  ;;  %5164 = vmatprep.subr.bf16.mxu0 %v6854_v41 }
 0x322   :  { %v915_v58 = vpop.f32.mrb[6].mxu1  ;;  %v986_v52 = vpop.f32.mrb[8].mxu0 }
 0x323   :  { %v995_v7 = vrot.slane %v915_v58, 7  ;;  %v1011_v8 = vadd.f32 %v915_v58, %v7012_v3  ;;  %v917_v47 = vpop.f32.mrb[7].mxu1  ;;  %v988_v20 = vpop.f32.mrb[9].mxu0  ;;  %v997_v62 = vrot.slane %v986_v52, 7 }
 0x324   :  { %v996_v32 = vrot.slane %v917_v47, 7  ;;  %v1012_v24 = vadd.f32 %v917_v47, %v7017_v15  ;;  %v998_v53 = vrot.slane %v988_v20, 7  ;;  %v1014_v58 = vadd.f32 %v988_v20, %v7026_v37 }
 0x325   :  { %v1007_v12 = vadd.f32 %v995_v7, %v7007_v54  ;;  %v4673_v27 = vmul.f32 -1.442695, %v1011_v8  ;;  %v1013_v47 = vadd.f32 %v986_v52, %v7033_v21 }
 0x326   :  { %v1008_v9 = vadd.f32 %v996_v32, %v7009_v57  ;;  %v4675_v61 = vmul.f32 -1.442695, %v1012_v24  ;;  %v1010_v51 = vadd.f32 %v998_v53, %v7024_v48  ;;  %v4677_v7 = vmul.f32 -1.442695, %v1014_v58 }
 0x327   :  { %v4672_v29 = vmul.f32 -1.442695, %v1007_v12  ;;  %6116 = vpow2.f32 %v4673_v27  ;;  %v1009_v32 = vadd.f32 %v997_v62, %v7029_v4 }
 0x328   :  { %v4674_v40 = vmul.f32 -1.442695, %v1008_v9  ;;  %v4676_v44 = vmul.f32 -1.442695, %v1010_v51 }
 0x329   :  { %6118 = vpow2.f32 %v4672_v29 }
 0x32a   :  { %6120 = vpow2.f32 %v4674_v40 }
 0x32b   :  { %6122 = vpow2.f32 %v4675_v61 }
 0x32c   :  { %6124 = vtanh.f32 %v1013_v47 }
 0x32d   :  { %6126 = vpow2.f32 %v4676_v44  ;;  %v1055_v44 = vrot.slane %v7036_v38, 7 }
 0x32e   :  { %6128 = vpow2.f32 %v4677_v7 }
 0x331   :  { %v6117_v8 = vpop.eup %6116 }
 0x332   :  { %v1022_v12 = vadd.f32 1.0, %v6117_v8 }
 0x333   :  { %v6119_v24 = vpop.eup %6118 }
 0x334   :  { %v6121_v27 = vpop.eup %6120  ;;  %v1021_v9 = vadd.f32 1.0, %v6119_v24  ;;  %6130 = vrcp.f32 %v1022_v12  ;;  %v1056_v12 = vrot.slane %v7038_v28, 7 }
 0x335   :  { %v6123_v53 = vpop.eup %6122  ;;  %6132 = vtanh.f32 %v1009_v32  ;;  %v1033_v29 = vadd.f32 1.0, %v6121_v27 }
 0x336   :  { %6134 = vrcp.f32 %v1021_v9  ;;  %v1034_v20 = vadd.f32 1.0, %v6123_v53  ;;  %v6125_v52 = vpop.eup %6124 }
 0x337   :  { %6136 = vrcp.f32 %v1033_v29  ;;  %v6127_v61 = vpop.eup %6126 }
 0x338   :  { %6138 = vrcp.f32 %v1034_v20  ;;  %v6129_v40 = vpop.eup %6128  ;;  %v1047_v7 = vadd.f32 1.0, %v6127_v61 }
 0x339   :  { %v1048_v32 = vadd.f32 1.0, %v6129_v40 }
 0x33a   :  { %6140 = vrcp.f32 %v1047_v7 }
 0x33b   :  { %6142 = vrcp.f32 %v1048_v32 }
 0x33e   :  { %v6131_v51 = vpop.eup %6130 }
 0x33f   :  { %v6133_v62 = vpop.eup %6132  ;;  %v1062_v58 = vmul.f32 %v6131_v51, %v6125_v52 }
 0x340   :  { %v6135_v47 = vpop.eup %6134 }
 0x341   :  { %v6137_v8 = vpop.eup %6136  ;;  %v1061_v24 = vmul.f32 %v6135_v47, %v6133_v62 }
 0x342   :  { %v6139_v27 = vpop.eup %6138  ;;  %v1059_v9 = vmul.f32 %v6137_v8, %v1055_v44 }
 0x343   :  { %v1060_v53 = vmul.f32 %v6139_v27, %v1056_v12 }
 0x344   :  { %v7093_v29 = vadd.f32 %v1061_v24, %v1059_v9  ;;  %v6141_v38 = vpop.eup %6140 }
 0x345   :  { %v7095_v20 = vadd.f32 %v1062_v58, %v1060_v53  ;;  %v6143_v52 = vpop.eup %6142 }
 0x346   :  { %6144 = vtanh.f32 %v7093_v29 }
 0x347   :  { %6146 = vtanh.f32 %v7095_v20 }
 0x350   :  { %v6145_v61 = vpop.eup %6144 }
 0x351   :  { %v6147_v51 = vpop.eup %6146  ;;  %v7099_v28 = vmul.f32 %v6145_v61, %v6141_v38 }
 0x352   :  { %v7101_v40 = vmul.f32 %v6147_v51, %v6143_v52 }
 0x353   :  { %v1071_v62 = vrot.slane %v7099_v28, 1 }
 0x355   :  { %v1072_v47 = vsel %vm846_vm2, %v7101_v40, %v1071_v62 }
 0x356   :  { %1139 = vmatmul.mubr.f32.vlgmr.msra.gmra.mrb[8].mxu1 %v1072_v47  ;;  %1210 = vmatmul.mubr.f32.vlgmr.msra.gmra.mrb[10].mxu0 %v1072_v47 }
 0x357   :  { %5134 = vmatpush1.bf16.msra.mxu1 %v6863_v55  ;;  %5166 = vmatpush1.bf16.msra.mxu0 %v6865_v56 }
 0x358   :  { %5136 = vmatprep.subr.bf16.mxu1 %v6867_v0  ;;  %5168 = vmatprep.subr.bf16.mxu0 %v6869_v1 }
 0x359   :  { %1368 = vmatprep.mubr.f32.mxu1 %v8042_v42  ;;  %1439 = vmatprep.mubr.f32.mxu0 %v8042_v42 }
 0x35b   :  { %5138 = vmatpush1.bf16.msra.mxu1 %v6873_v5  ;;  %5170 = vmatpush1.bf16.msra.mxu0 %v6875_v6 }
 0x35c   :  { %5140 = vmatprep.subr.bf16.mxu1 %v6879_v10  ;;  %5172 = vmatprep.subr.bf16.mxu0 %v6881_v11 }
 0x35f   :  { %5142 = vmatpush1.bf16.msra.mxu1 %v6887_v18  ;;  %5174 = vmatpush1.bf16.msra.mxu0 %v6889_v19 }
 0x360   :  { %5144 = vmatprep.subr.bf16.mxu1 %v6893_v22  ;;  %5176 = vmatprep.subr.bf16.mxu0 %v6895_v23 }
 0x363   :  { %5146 = vmatpush1.bf16.msra.mxu1 %v6901_v30  ;;  %5178 = vmatpush1.bf16.msra.mxu0 %v6903_v31 }
 0x364   :  { %5148 = vmatprep.subr.bf16.mxu1 %v6907_v34  ;;  %5180 = vmatprep.subr.bf16.mxu0 %v6909_v35 }
 0x367   :  { %5150 = vmatpush1.bf16.msra.mxu1 %v6913_v45  ;;  %5182 = vmatpush1.bf16.msra.mxu0 %v6915_v46 }
 0x368   :  { %5152 = vmatprep.subr.bf16.mxu1 %v6919_v49  ;;  %5184 = vmatprep.subr.bf16.mxu0 %v6921_v50 }
 0x36b   :  { %5154 = vmatpush1.bf16.msra.mxu1 %v6925_v59  ;;  %5186 = vmatpush1.bf16.msra.mxu0 %v6927_v60 }
 0x36c   :  { %5156 = vmatprep.subr.bf16.mxu1 %v6931_v63  ;;  %5188 = vmatprep.subr.bf16.mxu0 %v6933_v2 }
 0x36f   :  { %5158 = vmatpush1.bf16.msra.mxu1 %v6937_v13  ;;  %5190 = vmatpush1.bf16.msra.mxu0 %v6939_v14 }
 0x370   :  { %5160 = vmatprep.subr.bf16.mxu1 %v6943_v16  ;;  %5192 = vmatprep.subr.bf16.mxu0 %v6945_v17 }
 0x373   :  { %5162 = vmatpush1.bf16.msra.mxu1 %v6949_v25  ;;  %5194 = vmatpush1.bf16.msra.mxu0 %v6951_v26 }
 0x374   :  { %5196 = vmatprep.subr.bf16.mxu1 %v6852_v39  ;;  %5228 = vmatprep.subr.bf16.mxu0 %v6854_v41 }
 0x429   :  { %v1140_v58 = vpop.f32.mrb[8].mxu1  ;;  %v1211_v44 = vpop.f32.mrb[10].mxu0 }
 0x42a   :  { %v1220_v7 = vrot.slane %v1140_v58, 6  ;;  %v1224_v8 = vrot.slane %v1140_v58, 7  ;;  %v1142_v12 = vpop.f32.mrb[9].mxu1  ;;  %v1213_v24 = vpop.f32.mrb[11].mxu0  ;;  %v1222_v58 = vrot.slane %v1211_v44, 6  ;;  %v1226_v41 = vrot.slane %v1211_v44, 7 }
 0x42b   :  { %v1221_v32 = vrot.slane %v1142_v12, 6  ;;  %v1225_v27 = vrot.slane %v1142_v12, 7  ;;  %v1223_v42 = vrot.slane %v1213_v24, 6  ;;  %v1227_v43 = vrot.slane %v1213_v24, 7 }
 0x42c   :  { %v1236_v9 = vadd.f32 %v1220_v7, %v7007_v54  ;;  %v1240_v53 = vadd.f32 %v1224_v8, %v7012_v3  ;;  %v1238_v12 = vadd.f32 %v1222_v58, %v7029_v4 }
 0x42d   :  { %v1237_v38 = vadd.f32 %v1221_v32, %v7009_v57  ;;  %v1241_v52 = vadd.f32 %v1225_v27, %v7017_v15  ;;  %v1239_v7 = vadd.f32 %v1223_v42, %v7024_v48  ;;  %v1243_v8 = vadd.f32 %v1227_v43, %v7026_v37 }
 0x42e   :  { %v4678_v61 = vmul.f32 -1.442695, %v1236_v9  ;;  %v4679_v51 = vmul.f32 -1.442695, %v1240_v53  ;;  %v1242_v32 = vadd.f32 %v1226_v41, %v7033_v21 }
 0x42f   :  { %v4680_v62 = vmul.f32 -1.442695, %v1237_v38  ;;  %v4681_v47 = vmul.f32 -1.442695, %v1241_v52  ;;  %v4682_v27 = vmul.f32 -1.442695, %v1239_v7 }
 0x430   :  { %6148 = vpow2.f32 %v4678_v61  ;;  %v4683_v9 = vmul.f32 -1.442695, %v1243_v8 }
 0x431   :  { %6150 = vpow2.f32 %v4679_v51 }
 0x432   :  { %6152 = vpow2.f32 %v4680_v62 }
 0x433   :  { %6154 = vpow2.f32 %v4681_v47 }
 0x434   :  { %6156 = vtanh.f32 %v1238_v12  ;;  %v1284_v12 = vrot.slane %v7093_v29, 7 }
 0x435   :  { %6158 = vtanh.f32 %v1242_v32 }
 0x436   :  { %6160 = vpow2.f32 %v4682_v27 }
 0x437   :  { %6162 = vpow2.f32 %v4683_v9  ;;  %v1285_v9 = vrot.slane %v7095_v20, 7 }
 0x43a   :  { %v6149_v53 = vpop.eup %6148 }
 0x43b   :  { %v6151_v38 = vpop.eup %6150  ;;  %v1250_v24 = vadd.f32 1.0, %v6149_v53 }
 0x43c   :  { %v6153_v52 = vpop.eup %6152  ;;  %v1251_v44 = vadd.f32 1.0, %v6151_v38 }
 0x43d   :  { %v6155_v61 = vpop.eup %6154  ;;  %6164 = vrcp.f32 %v1250_v24  ;;  %v1262_v42 = vadd.f32 1.0, %v6153_v52 }
 0x43e   :  { %6166 = vrcp.f32 %v1251_v44  ;;  %v1263_v43 = vadd.f32 1.0, %v6155_v61  ;;  %v6157_v51 = vpop.eup %6156 }
 0x43f   :  { %6168 = vrcp.f32 %v1262_v42  ;;  %v6159_v41 = vpop.eup %6158 }
 0x440   :  { %6170 = vrcp.f32 %v1263_v43  ;;  %v6161_v62 = vpop.eup %6160 }
 0x441   :  { %v6163_v47 = vpop.eup %6162  ;;  %v1276_v32 = vadd.f32 1.0, %v6161_v62  ;;  %v2448_v62 = vsel %vm373_vm0, %v7042_v36, %v7099_v28  ;;  %v8050_v36 = vmov 0.0  }
 0x442   :  { %v1277_v38 = vadd.f32 1.0, %v6163_v47 }
 0x443   :  { %6172 = vrcp.f32 %v1276_v32 }
 0x444   :  { %6174 = vrcp.f32 %v1277_v38 }
 0x447   :  { %v6165_v58 = vpop.eup %6164 }
 0x448   :  { %v6167_v7 = vpop.eup %6166  ;;  %v1290_v8 = vmul.f32 %v6165_v58, %v6157_v51  ;;  %v2449_v58 = vsel %vm373_vm0, %v7044_v33, %v7101_v40  ;;  %v8051_v33 = vld [vmem:[#allocation13_spill] sm:$0xff] }
 0x449   :  { %v6169_v27 = vpop.eup %6168  ;;  %v1291_v53 = vmul.f32 %v6167_v7, %v6159_v41 }
 0x44a   :  { %v6171_v24 = vpop.eup %6170  ;;  %v1288_v52 = vmul.f32 %v6169_v27, %v1284_v12 }
 0x44b   :  { %v1289_v44 = vmul.f32 %v6171_v24, %v1285_v9 }
 0x44c   :  { %v7150_v61 = vadd.f32 %v1290_v8, %v1288_v52 }
 0x44d   :  { %v7152_v42 = vadd.f32 %v1291_v53, %v1289_v44  ;;  %v6173_v29 = vpop.eup %6172 }
 0x44e   :  { %6176 = vtanh.f32 %v7150_v61  ;;  %v6175_v43 = vpop.eup %6174 }
 0x44f   :  { %6178 = vtanh.f32 %v7152_v42 }
 0x458   :  { %v6177_v51 = vpop.eup %6176 }
 0x459   :  { %v6179_v41 = vpop.eup %6178  ;;  %v1296_v20 = vmul.f32 %v6177_v51, %v6173_v29 }
 0x45a   :  { %v1297_v47 = vmul.f32 %v6179_v41, %v6175_v43 }
 0x45b   :  { %v1300_v7 = vrot.slane %v1296_v20, 2  ;;  %v7162_v8 = vsel %vm2450_vm3, %v2448_v62, %v1296_v20 }
 0x45c   :  { %v1301_v12 = vrot.slane %v1297_v47, 1  ;;  %v7164_v32 = vsel %vm2450_vm3, %v2449_v58, %v1297_v47 }
 0x45e   :  { %v1302_v27 = vsel %vm846_vm2, %v1301_v12, %v1300_v7 }
 0x45f   :  { %1369 = vmatmul.mubr.f32.vlgmr.msra.gmra.mrb[10].mxu1 %v1302_v27  ;;  %1440 = vmatmul.mubr.f32.vlgmr.msra.gmra.mrb[12].mxu0 %v1302_v27 }
 0x460   :  { %5198 = vmatpush1.bf16.msra.mxu1 %v6863_v55  ;;  %5230 = vmatpush1.bf16.msra.mxu0 %v6865_v56 }
 0x461   :  { %5200 = vmatprep.subr.bf16.mxu1 %v6867_v0  ;;  %5232 = vmatprep.subr.bf16.mxu0 %v6869_v1 }
 0x462   :  { %1598 = vmatprep.mubr.f32.mxu1 %v8050_v36  ;;  %1669 = vmatprep.mubr.f32.mxu0 %v8050_v36 }
 0x464   :  { %5202 = vmatpush1.bf16.msra.mxu1 %v6873_v5  ;;  %5234 = vmatpush1.bf16.msra.mxu0 %v6875_v6 }
 0x465   :  { %5204 = vmatprep.subr.bf16.mxu1 %v6879_v10  ;;  %5236 = vmatprep.subr.bf16.mxu0 %v6881_v11 }
 0x468   :  { %5206 = vmatpush1.bf16.msra.mxu1 %v6887_v18  ;;  %5238 = vmatpush1.bf16.msra.mxu0 %v6889_v19 }
 0x469   :  { %5208 = vmatprep.subr.bf16.mxu1 %v6893_v22  ;;  %5240 = vmatprep.subr.bf16.mxu0 %v6895_v23 }
 0x46c   :  { %5210 = vmatpush1.bf16.msra.mxu1 %v6901_v30  ;;  %5242 = vmatpush1.bf16.msra.mxu0 %v6903_v31 }
 0x46d   :  { %5212 = vmatprep.subr.bf16.mxu1 %v6907_v34  ;;  %5244 = vmatprep.subr.bf16.mxu0 %v6909_v35 }
 0x470   :  { %5214 = vmatpush1.bf16.msra.mxu1 %v6913_v45  ;;  %5246 = vmatpush1.bf16.msra.mxu0 %v6915_v46 }
 0x471   :  { %5216 = vmatprep.subr.bf16.mxu1 %v6919_v49  ;;  %5248 = vmatprep.subr.bf16.mxu0 %v6921_v50 }
 0x474   :  { %5218 = vmatpush1.bf16.msra.mxu1 %v6925_v59  ;;  %5250 = vmatpush1.bf16.msra.mxu0 %v6927_v60 }
 0x475   :  { %5220 = vmatprep.subr.bf16.mxu1 %v6931_v63  ;;  %5252 = vmatprep.subr.bf16.mxu0 %v6933_v2 }
 0x478   :  { %5222 = vmatpush1.bf16.msra.mxu1 %v6937_v13  ;;  %5254 = vmatpush1.bf16.msra.mxu0 %v6939_v14 }
 0x479   :  { %5224 = vmatprep.subr.bf16.mxu1 %v6943_v16  ;;  %5256 = vmatprep.subr.bf16.mxu0 %v6945_v17 }
 0x47c   :  { %5226 = vmatpush1.bf16.msra.mxu1 %v6949_v25  ;;  %5258 = vmatpush1.bf16.msra.mxu0 %v6951_v26 }
 0x47d   :  { %5260 = vmatprep.subr.bf16.mxu1 %v6852_v39  ;;  %5292 = vmatprep.subr.bf16.mxu0 %v8051_v33 }
 0x532   :  { %v1370_v28 = vpop.f32.mrb[10].mxu1  ;;  %v1441_v40 = vpop.f32.mrb[12].mxu0 }
 0x533   :  { %v1450_v53 = vrot.slane %v1370_v28, 5  ;;  %v1454_v9 = vrot.slane %v1370_v28, 6  ;;  %v1372_v38 = vpop.f32.mrb[11].mxu1  ;;  %v1443_v24 = vpop.f32.mrb[13].mxu0  ;;  %v1452_v27 = vrot.slane %v1441_v40, 5  ;;  %v1456_v28 = vrot.slane %v1441_v40, 6 }
 0x534   :  { %v1451_v52 = vrot.slane %v1372_v38, 5  ;;  %v1455_v44 = vrot.slane %v1372_v38, 6  ;;  %v1453_v7 = vrot.slane %v1443_v24, 5  ;;  %v1457_v12 = vrot.slane %v1443_v24, 6 }
 0x535   :  { %v1466_v29 = vadd.f32 %v1450_v53, %v7007_v54  ;;  %v1470_v43 = vadd.f32 %v1454_v9, %v7012_v3  ;;  %v1468_v38 = vadd.f32 %v1452_v27, %v7029_v4 }
 0x536   :  { %v1467_v51 = vadd.f32 %v1451_v52, %v7009_v57  ;;  %v1471_v41 = vadd.f32 %v1455_v44, %v7017_v15  ;;  %v1469_v53 = vadd.f32 %v1453_v7, %v7024_v48  ;;  %v1473_v9 = vadd.f32 %v1457_v12, %v7026_v37 }
 0x537   :  { %v4684_v20 = vmul.f32 -1.442695, %v1466_v29  ;;  %v4685_v62 = vmul.f32 -1.442695, %v1470_v43  ;;  %v1472_v52 = vadd.f32 %v1456_v28, %v7033_v21 }
 0x538   :  { %v4686_v47 = vmul.f32 -1.442695, %v1467_v51  ;;  %v4687_v58 = vmul.f32 -1.442695, %v1471_v41  ;;  %v4688_v44 = vmul.f32 -1.442695, %v1469_v53 }
 0x539   :  { %6180 = vpow2.f32 %v4684_v20  ;;  %v4689_v29 = vmul.f32 -1.442695, %v1473_v9 }
 0x53a   :  { %6182 = vpow2.f32 %v4685_v62 }
 0x53b   :  { %6184 = vpow2.f32 %v4686_v47 }
 0x53c   :  { %6186 = vpow2.f32 %v4687_v58 }
 0x53d   :  { %6188 = vtanh.f32 %v1468_v38  ;;  %v1514_v38 = vrot.slane %v7150_v61, 7 }
 0x53e   :  { %6190 = vtanh.f32 %v1472_v52 }
 0x53f   :  { %6192 = vpow2.f32 %v4688_v44 }
 0x540   :  { %6194 = vpow2.f32 %v4689_v29  ;;  %v1515_v29 = vrot.slane %v7152_v42, 7 }
 0x543   :  { %v6181_v43 = vpop.eup %6180 }
 0x544   :  { %v6183_v51 = vpop.eup %6182  ;;  %v1480_v24 = vadd.f32 1.0, %v6181_v43 }
 0x545   :  { %v6185_v41 = vpop.eup %6184  ;;  %v1481_v40 = vadd.f32 1.0, %v6183_v51 }
 0x546   :  { %v6187_v20 = vpop.eup %6186  ;;  %6196 = vrcp.f32 %v1480_v24  ;;  %v1492_v62 = vadd.f32 1.0, %v6185_v41 }
 0x547   :  { %6198 = vrcp.f32 %v1481_v40  ;;  %v1493_v47 = vadd.f32 1.0, %v6187_v20  ;;  %v6189_v58 = vpop.eup %6188 }
 0x548   :  { %6200 = vrcp.f32 %v1492_v62  ;;  %v6191_v7 = vpop.eup %6190 }
 0x549   :  { %6202 = vrcp.f32 %v1493_v47  ;;  %v6193_v12 = vpop.eup %6192 }
 0x54a   :  { %v6195_v27 = vpop.eup %6194  ;;  %v1506_v52 = vadd.f32 1.0, %v6193_v12 }
 0x54b   :  { %v1507_v51 = vadd.f32 1.0, %v6195_v27 }
 0x54c   :  { %6204 = vrcp.f32 %v1506_v52 }
 0x54d   :  { %6206 = vrcp.f32 %v1507_v51 }
 0x550   :  { %v6197_v28 = vpop.eup %6196 }
 0x551   :  { %v6199_v53 = vpop.eup %6198  ;;  %v1520_v9 = vmul.f32 %v6197_v28, %v6189_v58 }
 0x552   :  { %v6201_v44 = vpop.eup %6200  ;;  %v1521_v43 = vmul.f32 %v6199_v53, %v6191_v7 }
 0x553   :  { %v6203_v24 = vpop.eup %6202  ;;  %v1518_v41 = vmul.f32 %v6201_v44, %v1514_v38 }
 0x554   :  { %v1519_v40 = vmul.f32 %v6203_v24, %v1515_v29 }
 0x555   :  { %v7211_v20 = vadd.f32 %v1520_v9, %v1518_v41 }
 0x556   :  { %v7213_v62 = vadd.f32 %v1521_v43, %v1519_v40  ;;  %v6205_v61 = vpop.eup %6204 }
 0x557   :  { %6208 = vtanh.f32 %v7211_v20  ;;  %v6207_v47 = vpop.eup %6206 }
 0x558   :  { %6210 = vtanh.f32 %v7213_v62 }
 0x561   :  { %v6209_v58 = vpop.eup %6208 }
 0x562   :  { %v6211_v7 = vpop.eup %6210  ;;  %v1526_v42 = vmul.f32 %v6209_v58, %v6205_v61 }
 0x563   :  { %v1527_v12 = vmul.f32 %v6211_v7, %v6207_v47 }
 0x564   :  { %v1530_v27 = vrot.slane %v1526_v42, 3  ;;  %v7218_v28 = vsel %vm2453_vm4, %v7162_v8, %v1526_v42 }
 0x565   :  { %v1531_v53 = vrot.slane %v1527_v12, 2  ;;  %v7221_v9 = vsel %vm2453_vm4, %v7164_v32, %v1527_v12 }
 0x567   :  { %v1532_v38 = vsel %vm846_vm2, %v1531_v53, %v1530_v27 }
 0x568   :  { %1599 = vmatmul.mubr.f32.vlgmr.msra.gmra.mrb[12].mxu1 %v1532_v38  ;;  %1670 = vmatmul.mubr.f32.vlgmr.msra.gmra.mrb[14].mxu0 %v1532_v38 }
 0x569   :  { %5262 = vmatpush1.bf16.msra.mxu1 %v6863_v55  ;;  %5294 = vmatpush1.bf16.msra.mxu0 %v6865_v56 }
 0x56a   :  { %5264 = vmatprep.subr.bf16.mxu1 %v6867_v0  ;;  %5296 = vmatprep.subr.bf16.mxu0 %v6869_v1 }
 0x56b   :  { %1828 = vmatprep.mubr.f32.mxu1 %v8050_v36  ;;  %1899 = vmatprep.mubr.f32.mxu0 %v8050_v36 }
 0x56d   :  { %5266 = vmatpush1.bf16.msra.mxu1 %v6873_v5  ;;  %5298 = vmatpush1.bf16.msra.mxu0 %v6875_v6 }
 0x56e   :  { %5268 = vmatprep.subr.bf16.mxu1 %v6879_v10  ;;  %5300 = vmatprep.subr.bf16.mxu0 %v6881_v11 }
 0x571   :  { %5270 = vmatpush1.bf16.msra.mxu1 %v6887_v18  ;;  %5302 = vmatpush1.bf16.msra.mxu0 %v6889_v19 }
 0x572   :  { %5272 = vmatprep.subr.bf16.mxu1 %v6893_v22  ;;  %5304 = vmatprep.subr.bf16.mxu0 %v6895_v23 }
 0x575   :  { %5274 = vmatpush1.bf16.msra.mxu1 %v6901_v30  ;;  %5306 = vmatpush1.bf16.msra.mxu0 %v6903_v31 }
 0x576   :  { %5276 = vmatprep.subr.bf16.mxu1 %v6907_v34  ;;  %5308 = vmatprep.subr.bf16.mxu0 %v6909_v35 }
 0x579   :  { %5278 = vmatpush1.bf16.msra.mxu1 %v6913_v45  ;;  %5310 = vmatpush1.bf16.msra.mxu0 %v6915_v46 }
 0x57a   :  { %5280 = vmatprep.subr.bf16.mxu1 %v6919_v49  ;;  %5312 = vmatprep.subr.bf16.mxu0 %v6921_v50 }
 0x57d   :  { %5282 = vmatpush1.bf16.msra.mxu1 %v6925_v59  ;;  %5314 = vmatpush1.bf16.msra.mxu0 %v6927_v60 }
 0x57e   :  { %5284 = vmatprep.subr.bf16.mxu1 %v6931_v63  ;;  %5316 = vmatprep.subr.bf16.mxu0 %v6933_v2 }
 0x581   :  { %5286 = vmatpush1.bf16.msra.mxu1 %v6937_v13  ;;  %5318 = vmatpush1.bf16.msra.mxu0 %v6939_v14 }
 0x582   :  { %5288 = vmatprep.subr.bf16.mxu1 %v6943_v16  ;;  %5320 = vmatprep.subr.bf16.mxu0 %v6945_v17 }
 0x585   :  { %5290 = vmatpush1.bf16.msra.mxu1 %v6949_v25  ;;  %5322 = vmatpush1.bf16.msra.mxu0 %v6951_v26 }
 0x586   :  { %5324 = vmatprep.subr.bf16.mxu1 %v6852_v39  ;;  %5356 = vmatprep.subr.bf16.mxu0 %v8051_v33 }
 0x63b   :  { %v1600_v8 = vpop.f32.mrb[12].mxu1  ;;  %v1671_v32 = vpop.f32.mrb[14].mxu0 }
 0x63c   :  { %v1680_v52 = vrot.slane %v1600_v8, 4  ;;  %v1684_v44 = vrot.slane %v1600_v8, 5  ;;  %v1602_v43 = vpop.f32.mrb[13].mxu1  ;;  %v1673_v29 = vpop.f32.mrb[15].mxu0  ;;  %v1682_v38 = vrot.slane %v1671_v32, 4  ;;  %v1686_v8 = vrot.slane %v1671_v32, 5 }
 0x63d   :  { %v1681_v51 = vrot.slane %v1602_v43, 4  ;;  %v1685_v24 = vrot.slane %v1602_v43, 5  ;;  %v1683_v27 = vrot.slane %v1673_v29, 4  ;;  %v1687_v53 = vrot.slane %v1673_v29, 5 }
 0x63e   :  { %v1696_v41 = vadd.f32 %v1680_v52, %v7007_v54  ;;  %v1700_v40 = vadd.f32 %v1684_v44, %v7012_v3  ;;  %v1698_v43 = vadd.f32 %v1682_v38, %v7029_v4 }
 0x63f   :  { %v1697_v61 = vadd.f32 %v1681_v51, %v7009_v57  ;;  %v1701_v47 = vadd.f32 %v1685_v24, %v7017_v15  ;;  %v1699_v52 = vadd.f32 %v1683_v27, %v7024_v48  ;;  %v1703_v44 = vadd.f32 %v1687_v53, %v7026_v37 }
 0x640   :  { %v4690_v58 = vmul.f32 -1.442695, %v1696_v41  ;;  %v4691_v7 = vmul.f32 -1.442695, %v1700_v40  ;;  %v1702_v51 = vadd.f32 %v1686_v8, %v7033_v21 }
 0x641   :  { %v4692_v42 = vmul.f32 -1.442695, %v1697_v61  ;;  %v4693_v12 = vmul.f32 -1.442695, %v1701_v47  ;;  %v4694_v24 = vmul.f32 -1.442695, %v1699_v52 }
 0x642   :  { %6212 = vpow2.f32 %v4690_v58  ;;  %v4695_v41 = vmul.f32 -1.442695, %v1703_v44 }
 0x643   :  { %6214 = vpow2.f32 %v4691_v7 }
 0x644   :  { %6216 = vpow2.f32 %v4692_v42 }
 0x645   :  { %6218 = vpow2.f32 %v4693_v12 }
 0x646   :  { %6220 = vtanh.f32 %v1698_v43  ;;  %v1744_v43 = vrot.slane %v7211_v20, 7 }
 0x647   :  { %6222 = vtanh.f32 %v1702_v51 }
 0x648   :  { %6224 = vpow2.f32 %v4694_v24 }
 0x649   :  { %6226 = vpow2.f32 %v4695_v41  ;;  %v1745_v41 = vrot.slane %v7213_v62, 7 }
 0x64c   :  { %v6213_v40 = vpop.eup %6212 }
 0x64d   :  { %v6215_v61 = vpop.eup %6214  ;;  %v1710_v29 = vadd.f32 1.0, %v6213_v40 }
 0x64e   :  { %v6217_v47 = vpop.eup %6216  ;;  %v1711_v32 = vadd.f32 1.0, %v6215_v61 }
 0x64f   :  { %v6219_v58 = vpop.eup %6218  ;;  %6228 = vrcp.f32 %v1710_v29  ;;  %v1722_v7 = vadd.f32 1.0, %v6217_v47 }
 0x650   :  { %6230 = vrcp.f32 %v1711_v32  ;;  %v1723_v42 = vadd.f32 1.0, %v6219_v58  ;;  %v6221_v12 = vpop.eup %6220 }
 0x651   :  { %6232 = vrcp.f32 %v1722_v7  ;;  %v6223_v27 = vpop.eup %6222 }
 0x652   :  { %6234 = vrcp.f32 %v1723_v42  ;;  %v6225_v53 = vpop.eup %6224 }
 0x653   :  { %v6227_v38 = vpop.eup %6226  ;;  %v1736_v51 = vadd.f32 1.0, %v6225_v53 }
 0x654   :  { %v1737_v61 = vadd.f32 1.0, %v6227_v38 }
 0x655   :  { %6236 = vrcp.f32 %v1736_v51 }
 0x656   :  { %6238 = vrcp.f32 %v1737_v61 }
 0x659   :  { %v6229_v8 = vpop.eup %6228 }
 0x65a   :  { %v6231_v52 = vpop.eup %6230  ;;  %v1750_v44 = vmul.f32 %v6229_v8, %v6221_v12 }
 0x65b   :  { %v6233_v24 = vpop.eup %6232  ;;  %v1751_v40 = vmul.f32 %v6231_v52, %v6223_v27 }
 0x65c   :  { %v6235_v29 = vpop.eup %6234  ;;  %v1748_v47 = vmul.f32 %v6233_v24, %v1744_v43 }
 0x65d   :  { %v1749_v32 = vmul.f32 %v6235_v29, %v1745_v41 }
 0x65e   :  { %v7268_v58 = vadd.f32 %v1750_v44, %v1748_v47 }
 0x65f   :  { %v7270_v7 = vadd.f32 %v1751_v40, %v1749_v32  ;;  %v6237_v20 = vpop.eup %6236 }
 0x660   :  { %6240 = vtanh.f32 %v7268_v58  ;;  %v6239_v42 = vpop.eup %6238 }
 0x661   :  { %6242 = vtanh.f32 %v7270_v7 }
 0x66a   :  { %v6241_v12 = vpop.eup %6240 }
 0x66b   :  { %v6243_v27 = vpop.eup %6242  ;;  %v1756_v62 = vmul.f32 %v6241_v12, %v6237_v20 }
 0x66c   :  { %v1757_v53 = vmul.f32 %v6243_v27, %v6239_v42 }
 0x66d   :  { %v1760_v38 = vrot.slane %v1756_v62, 4  ;;  %v7275_v8 = vsel %vm2456_vm5, %v7218_v28, %v1756_v62 }
 0x66e   :  { %v1761_v52 = vrot.slane %v1757_v53, 3  ;;  %v7278_v44 = vsel %vm2456_vm5, %v7221_v9, %v1757_v53 }
 0x670   :  { %v1762_v43 = vsel %vm846_vm2, %v1761_v52, %v1760_v38 }
 0x671   :  { %1829 = vmatmul.mubr.f32.vlgmr.msra.gmra.mrb[14].mxu1 %v1762_v43  ;;  %1900 = vmatmul.mubr.f32.vlgmr.msra.gmra.mrb[16].mxu0 %v1762_v43 }
 0x672   :  { %5326 = vmatpush1.bf16.msra.mxu1 %v6863_v55  ;;  %5358 = vmatpush1.bf16.msra.mxu0 %v6865_v56 }
 0x673   :  { %5328 = vmatprep.subr.bf16.mxu1 %v6867_v0  ;;  %5360 = vmatprep.subr.bf16.mxu0 %v6869_v1 }
 0x674   :  { %2058 = vmatprep.mubr.f32.mxu1 %v8050_v36  ;;  %2129 = vmatprep.mubr.f32.mxu0 %v8050_v36 }
 0x676   :  { %5330 = vmatpush1.bf16.msra.mxu1 %v6873_v5  ;;  %5362 = vmatpush1.bf16.msra.mxu0 %v6875_v6 }
 0x677   :  { %5332 = vmatprep.subr.bf16.mxu1 %v6879_v10  ;;  %5364 = vmatprep.subr.bf16.mxu0 %v6881_v11 }
 0x67a   :  { %5334 = vmatpush1.bf16.msra.mxu1 %v6887_v18  ;;  %5366 = vmatpush1.bf16.msra.mxu0 %v6889_v19 }
 0x67b   :  { %5336 = vmatprep.subr.bf16.mxu1 %v6893_v22  ;;  %5368 = vmatprep.subr.bf16.mxu0 %v6895_v23 }
 0x67e   :  { %5338 = vmatpush1.bf16.msra.mxu1 %v6901_v30  ;;  %5370 = vmatpush1.bf16.msra.mxu0 %v6903_v31 }
 0x67f   :  { %5340 = vmatprep.subr.bf16.mxu1 %v6907_v34  ;;  %5372 = vmatprep.subr.bf16.mxu0 %v6909_v35 }
 0x682   :  { %5342 = vmatpush1.bf16.msra.mxu1 %v6913_v45  ;;  %5374 = vmatpush1.bf16.msra.mxu0 %v6915_v46 }
 0x683   :  { %5344 = vmatprep.subr.bf16.mxu1 %v6919_v49  ;;  %5376 = vmatprep.subr.bf16.mxu0 %v6921_v50 }
 0x686   :  { %5346 = vmatpush1.bf16.msra.mxu1 %v6925_v59  ;;  %5378 = vmatpush1.bf16.msra.mxu0 %v6927_v60 }
 0x687   :  { %5348 = vmatprep.subr.bf16.mxu1 %v6931_v63  ;;  %5380 = vmatprep.subr.bf16.mxu0 %v6933_v2 }
 0x68a   :  { %5350 = vmatpush1.bf16.msra.mxu1 %v6937_v13  ;;  %5382 = vmatpush1.bf16.msra.mxu0 %v6939_v14 }
 0x68b   :  { %5352 = vmatprep.subr.bf16.mxu1 %v6943_v16  ;;  %5384 = vmatprep.subr.bf16.mxu0 %v6945_v17 }
 0x68e   :  { %5354 = vmatpush1.bf16.msra.mxu1 %v6949_v25  ;;  %5386 = vmatpush1.bf16.msra.mxu0 %v6951_v26 }
 0x68f   :  { %5388 = vmatprep.subr.bf16.mxu1 %v6852_v39  ;;  %5420 = vmatprep.subr.bf16.mxu0 %v8051_v33 }
 0x744   :  { %v1830_v28 = vpop.f32.mrb[14].mxu1  ;;  %v1901_v9 = vpop.f32.mrb[16].mxu0 }
 0x745   :  { %v1910_v51 = vrot.slane %v1830_v28, 3  ;;  %v1914_v24 = vrot.slane %v1830_v28, 4  ;;  %v1832_v40 = vpop.f32.mrb[15].mxu1  ;;  %v1903_v41 = vpop.f32.mrb[17].mxu0  ;;  %v1912_v38 = vrot.slane %v1901_v9, 3  ;;  %v1916_v52 = vrot.slane %v1901_v9, 4 }
 0x746   :  { %v1911_v61 = vrot.slane %v1832_v40, 3  ;;  %v1915_v29 = vrot.slane %v1832_v40, 4  ;;  %v1913_v62 = vrot.slane %v1903_v41, 3  ;;  %v1917_v53 = vrot.slane %v1903_v41, 4 }
 0x747   :  { %v1926_v47 = vadd.f32 %v1910_v51, %v7007_v54  ;;  %v1930_v32 = vadd.f32 %v1914_v24, %v7012_v3  ;;  %v1928_v51 = vadd.f32 %v1912_v38, %v7029_v4  ;;  %v1932_v24 = vadd.f32 %v1916_v52, %v7033_v21 }
 0x748   :  { %v1927_v20 = vadd.f32 %v1911_v61, %v7009_v57  ;;  %v1931_v42 = vadd.f32 %v1915_v29, %v7017_v15  ;;  %v1929_v43 = vadd.f32 %v1913_v62, %v7024_v48  ;;  %v1933_v28 = vadd.f32 %v1917_v53, %v7026_v37 }
 0x749   :  { %v4696_v12 = vmul.f32 -1.442695, %v1926_v47  ;;  %v4697_v39 = vmul.f32 -1.442695, %v1930_v32 }
 0x74a   :  { %v4698_v27 = vmul.f32 -1.442695, %v1927_v20  ;;  %v4699_v33 = vmul.f32 -1.442695, %v1931_v42  ;;  %v4700_v40 = vmul.f32 -1.442695, %v1929_v43 }
 0x74b   :  { %6244 = vpow2.f32 %v4696_v12  ;;  %v4701_v61 = vmul.f32 -1.442695, %v1933_v28  ;;  %v1974_v43 = vrot.slane %v7268_v58, 7 }
 0x74c   :  { %6246 = vpow2.f32 %v4697_v39 }
 0x74d   :  { %6248 = vpow2.f32 %v4698_v27 }
 0x74e   :  { %6250 = vpow2.f32 %v4699_v33 }
 0x74f   :  { %6252 = vtanh.f32 %v1928_v51 }
 0x750   :  { %6254 = vtanh.f32 %v1932_v24 }
 0x751   :  { %6256 = vpow2.f32 %v4700_v40  ;;  %v1975_v40 = vrot.slane %v7270_v7, 7 }
 0x752   :  { %6258 = vpow2.f32 %v4701_v61 }
 0x755   :  { %v6245_v29 = vpop.eup %6244 }
 0x756   :  { %v6247_v47 = vpop.eup %6246  ;;  %v1940_v41 = vadd.f32 1.0, %v6245_v29 }
 0x757   :  { %v6249_v32 = vpop.eup %6248  ;;  %v1941_v9 = vadd.f32 1.0, %v6247_v47 }
 0x758   :  { %v6251_v20 = vpop.eup %6250  ;;  %6260 = vrcp.f32 %v1940_v41  ;;  %v1952_v42 = vadd.f32 1.0, %v6249_v32 }
 0x759   :  { %6262 = vrcp.f32 %v1941_v9  ;;  %v1953_v12 = vadd.f32 1.0, %v6251_v20  ;;  %v6253_v39 = vpop.eup %6252 }
 0x75a   :  { %6264 = vrcp.f32 %v1952_v42  ;;  %v6255_v27 = vpop.eup %6254 }
 0x75b   :  { %6266 = vrcp.f32 %v1953_v12  ;;  %v6257_v33 = vpop.eup %6256 }
 0x75c   :  { %v6259_v62 = vpop.eup %6258  ;;  %v1966_v28 = vadd.f32 1.0, %v6257_v33 }
 0x75d   :  { %v1967_v61 = vadd.f32 1.0, %v6259_v62 }
 0x75e   :  { %6268 = vrcp.f32 %v1966_v28 }
 0x75f   :  { %6270 = vrcp.f32 %v1967_v61 }
 0x762   :  { %v6261_v53 = vpop.eup %6260 }
 0x763   :  { %v6263_v38 = vpop.eup %6262  ;;  %v1980_v52 = vmul.f32 %v6261_v53, %v6253_v39 }
 0x764   :  { %v6265_v51 = vpop.eup %6264  ;;  %v1981_v24 = vmul.f32 %v6263_v38, %v6255_v27 }
 0x765   :  { %v6267_v29 = vpop.eup %6266  ;;  %v1978_v47 = vmul.f32 %v6265_v51, %v1974_v43 }
 0x766   :  { %v1979_v41 = vmul.f32 %v6267_v29, %v1975_v40 }
 0x767   :  { %v7325_v32 = vadd.f32 %v1980_v52, %v1978_v47 }
 0x768   :  { %v7327_v9 = vadd.f32 %v1981_v24, %v1979_v41  ;;  %v6269_v58 = vpop.eup %6268 }
 0x769   :  { %6272 = vtanh.f32 %v7325_v32  ;;  %v6271_v20 = vpop.eup %6270  ;;  %v2204_v41 = vrot.slane %v7325_v32, 7 }
 0x76a   :  { %6274 = vtanh.f32 %v7327_v9 }
 0x773   :  { %v6273_v42 = vpop.eup %6272 }
 0x774   :  { %v6275_v12 = vpop.eup %6274  ;;  %v1986_v7 = vmul.f32 %v6273_v42, %v6269_v58 }
 0x775   :  { %v1987_v39 = vmul.f32 %v6275_v12, %v6271_v20  ;;  %v2205_v12 = vrot.slane %v7327_v9, 7 }
 0x776   :  { %v1990_v27 = vrot.slane %v1986_v7, 5  ;;  %v7332_v33 = vsel %vm2459_vm6, %v7275_v8, %v1986_v7 }
 0x777   :  { %v1991_v62 = vrot.slane %v1987_v39, 4  ;;  %v7335_v53 = vsel %vm2459_vm6, %v7278_v44, %v1987_v39 }
 0x779   :  { %v1992_v38 = vsel %vm846_vm2, %v1991_v62, %v1990_v27 }
 0x77a   :  { %2059 = vmatmul.mubr.f32.vlgmr.msra.gmra.mrb[16].mxu1 %v1992_v38  ;;  %2130 = vmatmul.mubr.f32.vlgmr.msra.gmra.mrb[18].mxu0 %v1992_v38 }
 0x77b   :  { %5390 = vmatpush1.bf16.msra.mxu1 %v6863_v55  ;;  %5422 = vmatpush1.bf16.msra.mxu0 %v6865_v56 }
 0x77c   :  { %5392 = vmatprep.subr.bf16.mxu1 %v6867_v0  ;;  %5424 = vmatprep.subr.bf16.mxu0 %v6869_v1 }
 0x77d   :  { %2288 = vmatprep.mubr.f32.mxu1 %v8050_v36  ;;  %2359 = vmatprep.mubr.f32.mxu0 %v8050_v36 }
 0x77f   :  { %5394 = vmatpush1.bf16.msra.mxu1 %v6873_v5  ;;  %5426 = vmatpush1.bf16.msra.mxu0 %v6875_v6 }
 0x780   :  { %5396 = vmatprep.subr.bf16.mxu1 %v6879_v10  ;;  %5428 = vmatprep.subr.bf16.mxu0 %v6881_v11 }
 0x783   :  { %5398 = vmatpush1.bf16.msra.mxu1 %v6887_v18  ;;  %5430 = vmatpush1.bf16.msra.mxu0 %v6889_v19 }
 0x784   :  { %5400 = vmatprep.subr.bf16.mxu1 %v6893_v22  ;;  %5432 = vmatprep.subr.bf16.mxu0 %v6895_v23 }
 0x787   :  { %5402 = vmatpush1.bf16.msra.mxu1 %v6901_v30  ;;  %5434 = vmatpush1.bf16.msra.mxu0 %v6903_v31 }
 0x788   :  { %5404 = vmatprep.subr.bf16.mxu1 %v6907_v34  ;;  %5436 = vmatprep.subr.bf16.mxu0 %v6909_v35 }
 0x78b   :  { %5406 = vmatpush1.bf16.msra.mxu1 %v6913_v45  ;;  %5438 = vmatpush1.bf16.msra.mxu0 %v6915_v46 }
 0x78c   :  { %5408 = vmatprep.subr.bf16.mxu1 %v6919_v49  ;;  %5440 = vmatprep.subr.bf16.mxu0 %v6921_v50 }
 0x78f   :  { %5410 = vmatpush1.bf16.msra.mxu1 %v6925_v59  ;;  %5442 = vmatpush1.bf16.msra.mxu0 %v6927_v60 }
 0x790   :  { %5412 = vmatprep.subr.bf16.mxu1 %v6931_v63  ;;  %5444 = vmatprep.subr.bf16.mxu0 %v6933_v2 }
 0x793   :  { %5414 = vmatpush1.bf16.msra.mxu1 %v6937_v13  ;;  %5446 = vmatpush1.bf16.msra.mxu0 %v6939_v14 }
 0x794   :  { %5416 = vmatprep.subr.bf16.mxu1 %v6943_v16  ;;  %5448 = vmatprep.subr.bf16.mxu0 %v6945_v17 }
 0x797   :  { %5418 = vmatpush1.bf16.msra.mxu1 %v6949_v25  ;;  %5450 = vmatpush1.bf16.msra.mxu0 %v6951_v26 }
 0x84d   :  { %v2060_v55 = vpop.f32.mrb[16].mxu1  ;;  %v2131_v56 = vpop.f32.mrb[18].mxu0 }
 0x84e   :  { %v2140_v0 = vrot.slane %v2060_v55, 2  ;;  %v2144_v1 = vrot.slane %v2060_v55, 3  ;;  %v2062_v5 = vpop.f32.mrb[17].mxu1  ;;  %v2133_v6 = vpop.f32.mrb[19].mxu0  ;;  %v2142_v49 = vrot.slane %v2131_v56, 2  ;;  %v2146_v50 = vrot.slane %v2131_v56, 3 }
 0x84f   :  { %v2141_v10 = vrot.slane %v2062_v5, 2  ;;  %v2145_v11 = vrot.slane %v2062_v5, 3  ;;  %v2143_v45 = vrot.slane %v2133_v6, 2  ;;  %v2147_v46 = vrot.slane %v2133_v6, 3 }
 0x850   :  { %v2156_v18 = vadd.f32 %v2140_v0, %v7007_v54  ;;  %v2160_v19 = vadd.f32 %v2144_v1, %v7012_v3  ;;  %v2158_v63 = vadd.f32 %v2142_v49, %v7029_v4  ;;  %v2162_v2 = vadd.f32 %v2146_v50, %v7033_v21  ;;  %v231_v49 = vld [vmem:[#allocation7 + $0x10] sm:$0xff] }
 0x851   :  { %v2157_v22 = vadd.f32 %v2141_v10, %v7009_v57  ;;  %v2161_v23 = vadd.f32 %v2145_v11, %v7017_v15  ;;  %v2159_v59 = vadd.f32 %v2143_v45, %v7024_v48  ;;  %v2163_v60 = vadd.f32 %v2147_v46, %v7026_v37 }
 0x852   :  { %v4702_v30 = vmul.f32 -1.442695, %v2156_v18  ;;  %v4703_v31 = vmul.f32 -1.442695, %v2160_v19 }
 0x853   :  { %v4704_v34 = vmul.f32 -1.442695, %v2157_v22  ;;  %v4705_v35 = vmul.f32 -1.442695, %v2161_v23  ;;  %v4706_v13 = vmul.f32 -1.442695, %v2159_v59 }
 0x854   :  { %6276 = vpow2.f32 %v4702_v30  ;;  %v4707_v14 = vmul.f32 -1.442695, %v2163_v60  ;;  %v230_v22 = vld [vmem:[#allocation7 + $0x8] sm:$0xff]  ;;  %v232_v30 = vld [vmem:[#allocation7 + $0x18] sm:$0xff] }
 0x855   :  { %6278 = vpow2.f32 %v4703_v31  ;;  %v234_v23 = vld [vmem:[#allocation7 + $0x28] sm:$0xff] }
 0x856   :  { %6280 = vpow2.f32 %v4704_v34  ;;  %v5451_v31 = vpack.c.bf16 %v234_v23, %v230_v22  ;;  %v236_v34 = vld [vmem:[#allocation7 + $0x38] sm:$0xff]  ;;  %v238_v59 = vld [vmem:[#allocation7 + $0x48] sm:$0xff] }
 0x857   :  { %6282 = vpow2.f32 %v4705_v35  ;;  %v229_v35 = vld [vmem:[#allocation7] sm:$0xff]  ;;  %v5483_v45 = vpack.c.bf16 %v236_v34, %v232_v30  ;;  %v242_v60 = vld [vmem:[#allocation7 + $0x68] sm:$0xff]  ;;  %v268_v23 = vld [vmem:[#allocation7 + $0x138] sm:$0xff] }
 0x858   :  { %6284 = vtanh.f32 %v2158_v63  ;;  %5452 = vmatprep.subr.bf16.mxu1 %v5451_v31  ;;  %v240_v63 = vld [vmem:[#allocation7 + $0x58] sm:$0xff]  ;;  %v261_v30 = vld [vmem:[#allocation7 + $0x100] sm:$0xff] }
 0x859   :  { %6286 = vtanh.f32 %v2162_v2  ;;  %5484 = vmatprep.subr.bf16.mxu0 %v5483_v45  ;;  %v5455_v2 = vpack.c.bf16 %v242_v60, %v238_v59  ;;  %v265_v31 = vld [vmem:[#allocation7 + $0x120] sm:$0xff]  ;;  %v267_v45 = vld [vmem:[#allocation7 + $0x130] sm:$0xff]  ;;  %v276_v59 = vld [vmem:[#allocation7 + $0x178] sm:$0xff] }
 0x85a   :  { %6288 = vpow2.f32 %v4706_v13  ;;  %v244_v13 = vld [vmem:[#allocation7 + $0x78] sm:$0xff] }
 0x85b   :  { %6290 = vpow2.f32 %v4707_v14  ;;  %v237_v14 = vld [vmem:[#allocation7 + $0x40] sm:$0xff] }
 0x85e   :  { %v6277_v16 = vpop.eup %6276 }
 0x85f   :  { %v6279_v17 = vpop.eup %6278  ;;  %v2170_v25 = vadd.f32 1.0, %v6277_v16  ;;  %v241_v16 = vld [vmem:[#allocation7 + $0x60] sm:$0xff] }
 0x860   :  { %v6281_v26 = vpop.eup %6280  ;;  %v2171_v8 = vadd.f32 1.0, %v6279_v17  ;;  %v5487_v17 = vpack.c.bf16 %v244_v13, %v240_v63  ;;  %v273_v13 = vld [vmem:[#allocation7 + $0x160] sm:$0xff] }
 0x861   :  { %v6283_v44 = vpop.eup %6282  ;;  %6292 = vrcp.f32 %v2170_v25  ;;  %v2182_v52 = vadd.f32 1.0, %v6281_v26  ;;  %v5457_v25 = vpack.c.bf16 %v241_v16, %v237_v14  ;;  %v239_v26 = vld [vmem:[#allocation7 + $0x50] sm:$0xff] }
 0x862   :  { %6294 = vrcp.f32 %v2171_v8  ;;  %v2183_v43 = vadd.f32 1.0, %v6283_v44  ;;  %v6285_v28 = vpop.eup %6284  ;;  %v243_v8 = vld [vmem:[#allocation7 + $0x70] sm:$0xff] }
 0x863   :  { %6296 = vrcp.f32 %v2182_v52  ;;  %v6287_v51 = vpop.eup %6286  ;;  %v5489_v44 = vpack.c.bf16 %v243_v8, %v239_v26  ;;  %v246_v52 = vld [vmem:[#allocation7 + $0x88] sm:$0xff]  ;;  %v271_v14 = vld [vmem:[#allocation7 + $0x150] sm:$0xff] }
 0x864   :  { %6298 = vrcp.f32 %v2183_v43  ;;  %v6289_v24 = vpop.eup %6288  ;;  %v250_v43 = vld [vmem:[#allocation7 + $0xa8] sm:$0xff] }
 0x865   :  { %v6291_v40 = vpop.eup %6290  ;;  %v2196_v58 = vadd.f32 1.0, %v6289_v24  ;;  %v252_v24 = vld [vmem:[#allocation7 + $0xb8] sm:$0xff]  ;;  %v282_v26 = vld [vmem:[#allocation7 + $0x1a8] sm:$0xff] }
 0x866   :  { %v2197_v7 = vadd.f32 1.0, %v6291_v40  ;;  %v245_v40 = vld [vmem:[#allocation7 + $0x80] sm:$0xff] }
 0x867   :  { %6300 = vrcp.f32 %v2196_v58  ;;  %v251_v58 = vld [vmem:[#allocation7 + $0xb0] sm:$0xff] }
 0x868   :  { %6302 = vrcp.f32 %v2197_v7  ;;  %v256_v7 = vld [vmem:[#allocation7 + $0xd8] sm:$0xff] }
 0x86b   :  { %v6293_v61 = vpop.eup %6292 }
 0x86c   :  { %v6295_v29 = vpop.eup %6294  ;;  %v2210_v47 = vmul.f32 %v6293_v61, %v6285_v28  ;;  %v248_v28 = vld [vmem:[#allocation7 + $0x98] sm:$0xff]  ;;  %v249_v61 = vld [vmem:[#allocation7 + $0xa0] sm:$0xff] }
 0x86d   :  { %v6297_v20 = vpop.eup %6296  ;;  %v2211_v42 = vmul.f32 %v6295_v29, %v6287_v51  ;;  %v5459_v51 = vpack.c.bf16 %v250_v43, %v246_v52  ;;  %v5491_v29 = vpack.c.bf16 %v252_v24, %v248_v28  ;;  %v280_v52 = vld [vmem:[#allocation7 + $0x198] sm:$0xff]  ;;  %v277_v28 = vld [vmem:[#allocation7 + $0x180] sm:$0xff] }
 0x86e   :  { %v6299_v39 = vpop.eup %6298  ;;  %v2208_v27 = vmul.f32 %v6297_v20, %v2204_v41  ;;  %v247_v41 = vld [vmem:[#allocation7 + $0x90] sm:$0xff]  ;;  %v284_v43 = vld [vmem:[#allocation7 + $0x1b8] sm:$0xff]  ;;  %v281_v24 = vld [vmem:[#allocation7 + $0x1a0] sm:$0xff] }
 0x86f   :  { %v2209_v62 = vmul.f32 %v6299_v39, %v2205_v12  ;;  %v5493_v20 = vpack.c.bf16 %v251_v58, %v247_v41  ;;  %v258_v12 = vld [vmem:[#allocation7 + $0xe8] sm:$0xff]  ;;  %v288_v58 = vld [vmem:[#allocation7 + $0x1d8] sm:$0xff] }
 0x870   :  { %v7380_v38 = vadd.f32 %v2210_v47, %v2208_v27  ;;  %v5461_v47 = vpack.c.bf16 %v249_v61, %v245_v40  ;;  %v260_v27 = vld [vmem:[#allocation7 + $0xf8] sm:$0xff]  ;;  %v279_v40 = vld [vmem:[#allocation7 + $0x190] sm:$0xff]  ;;  %v290_v41 = vld [vmem:[#allocation7 + $0x1e8] sm:$0xff] }
 0x871   :  { %v7382_v55 = vadd.f32 %v2211_v42, %v2209_v62  ;;  %v6301_v32 = vpop.eup %6300  ;;  %v254_v42 = vld [vmem:[#allocation7 + $0xc8] sm:$0xff]  ;;  %v253_v62 = vld [vmem:[#allocation7 + $0xc0] sm:$0xff]  ;;  %v283_v61 = vld [vmem:[#allocation7 + $0x1b0] sm:$0xff] }
 0x872   :  { %6304 = vtanh.f32 %v7380_v38  ;;  %v6303_v56 = vpop.eup %6302  ;;  %v5463_v39 = vpack.c.bf16 %v258_v12, %v254_v42  ;;  %v292_v12 = vld [vmem:[#allocation7 + $0x1f8] sm:$0xff] }
 0x873   :  { %6306 = vtanh.f32 %v7382_v55 }
 0x87c   :  { %v6305_v0 = vpop.eup %6304 }
 0x87d   :  { %v6307_v1 = vpop.eup %6306  ;;  %v2216_v9 = vmul.f32 %v6305_v0, %v6301_v32  ;;  %v257_v32 = vld [vmem:[#allocation7 + $0xe0] sm:$0xff] }
 0x87e   :  { %v2217_v5 = vmul.f32 %v6307_v1, %v6303_v56  ;;  %v5495_v56 = vpack.c.bf16 %v260_v27, %v256_v7  ;;  %v5465_v0 = vpack.c.bf16 %v257_v32, %v253_v62  ;;  %v255_v1 = vld [vmem:[#allocation7 + $0xd0] sm:$0xff]  ;;  %v285_v7 = vld [vmem:[#allocation7 + $0x1c0] sm:$0xff]  ;;  %v5511_v27 = vpack.c.bf16 %v292_v12, %v288_v58 }
 0x87f   :  { %v2220_v6 = vrot.slane %v2216_v9, 6  ;;  %v7387_v10 = vsel %vm2462_vm7, %v7332_v33, %v2216_v9  ;;  %v233_v33 = vld [vmem:[#allocation7 + $0x20] sm:$0xff]  ;;  %v259_v9 = vld [vmem:[#allocation7 + $0xf0] sm:$0xff]  ;;  %v2435_v12 = vrot.slane %v7382_v55, 7  ;;  %v306_v55 = vld [vmem:[#allocation8 + $0x68] sm:$0xff] }
 0x880   :  { %v2221_v11 = vrot.slane %v2217_v5, 5  ;;  %v7390_v18 = vsel %vm2462_vm7, %v7335_v53, %v2217_v5  ;;  %v5453_v46 = vpack.c.bf16 %v233_v33, %v229_v35  ;;  %v235_v53 = vld [vmem:[#allocation7 + $0x30] sm:$0xff]  ;;  %v5497_v5 = vpack.c.bf16 %v259_v9, %v255_v1  ;;  %v296_v1 = vld [vmem:[#allocation8 + $0x18] sm:$0xff] }
 0x881   :  { %v5485_v50 = vpack.c.bf16 %v235_v53, %v231_v49  ;;  %v5469_v35 = vpack.c.bf16 %v265_v31, %v261_v30  ;;  %v263_v33 = vld [vmem:[#allocation7 + $0x110] sm:$0xff]  ;;  %v274_v53 = vld [vmem:[#allocation7 + $0x168] sm:$0xff]  ;;  %v300_v9 = vld [vmem:[#allocation8 + $0x38] sm:$0xff] }
 0x882   :  { %v2222_v19 = vsel %vm846_vm2, %v2221_v11, %v2220_v6  ;;  %v262_v6 = vld [vmem:[#allocation7 + $0x108] sm:$0xff]  ;;  %v5501_v49 = vpack.c.bf16 %v267_v45, %v263_v33  ;;  %v287_v62 = vld [vmem:[#allocation7 + $0x1d0] sm:$0xff] }
 0x883   :  { %2289 = vmatmul.mubr.f32.vlgmr.msra.gmra.mrb[18].mxu1 %v2222_v19  ;;  %2360 = vmatmul.mubr.f32.vlgmr.msra.gmra.mrb[20].mxu0 %v2222_v19  ;;  %v266_v11 = vld [vmem:[#allocation7 + $0x128] sm:$0xff]  ;;  %v264_v19 = vld [vmem:[#allocation7 + $0x118] sm:$0xff]  ;;  %v291_v32 = vld [vmem:[#allocation7 + $0x1f0] sm:$0xff] }
 0x884   :  { %2553 = vmatprep.mubr.f32.mxu1 %v8050_v36  ;;  %2630 = vmatprep.mubr.f32.mxu0 %v8050_v36  ;;  %v5467_v22 = vpack.c.bf16 %v266_v11, %v262_v6  ;;  %v5499_v34 = vpack.c.bf16 %v268_v23, %v264_v19  ;;  %v5513_v6 = vpack.c.bf16 %v291_v32, %v287_v62 }
 0x885   :  { %5454 = vmatpush1.bf16.msra.mxu1 %v5453_v46  ;;  %5486 = vmatpush1.bf16.msra.mxu0 %v5485_v50  ;;  %v270_v46 = vld [vmem:[#allocation7 + $0x148] sm:$0xff]  ;;  %v272_v50 = vld [vmem:[#allocation7 + $0x158] sm:$0xff]  ;;  %v7397_v19 = vpack.c.bf16 %v300_v9, %v296_v1  ;;  %v297_v9 = vld [vmem:[#allocation8 + $0x20] sm:$0xff] }
 0x886   :  { %5456 = vmatprep.subr.bf16.mxu1 %v5455_v2  ;;  %5488 = vmatprep.subr.bf16.mxu0 %v5487_v17  ;;  %v5471_v60 = vpack.c.bf16 %v274_v53, %v270_v46  ;;  %v5503_v63 = vpack.c.bf16 %v276_v59, %v272_v50  ;;  %v269_v2 = vld [vmem:[#allocation7 + $0x140] sm:$0xff]  ;;  %v275_v17 = vld [vmem:[#allocation7 + $0x170] sm:$0xff] }
 0x887   :  { %v5473_v16 = vpack.c.bf16 %v273_v13, %v269_v2  ;;  %v5505_v8 = vpack.c.bf16 %v275_v17, %v271_v14 }
 0x889   :  { %5458 = vmatpush1.bf16.msra.mxu1 %v5457_v25  ;;  %5490 = vmatpush1.bf16.msra.mxu0 %v5489_v44  ;;  %v278_v25 = vld [vmem:[#allocation7 + $0x188] sm:$0xff] }
 0x88a   :  { %5460 = vmatprep.subr.bf16.mxu1 %v5459_v51  ;;  %5492 = vmatprep.subr.bf16.mxu0 %v5491_v29  ;;  %v5475_v44 = vpack.c.bf16 %v282_v26, %v278_v25  ;;  %v5507_v51 = vpack.c.bf16 %v284_v43, %v280_v52  ;;  %v5477_v29 = vpack.c.bf16 %v281_v24, %v277_v28 }
 0x88d   :  { %5462 = vmatpush1.bf16.msra.mxu1 %v5461_v47  ;;  %5494 = vmatpush1.bf16.msra.mxu0 %v5493_v20  ;;  %v286_v47 = vld [vmem:[#allocation7 + $0x1c8] sm:$0xff]  ;;  %v5509_v20 = vpack.c.bf16 %v283_v61, %v279_v40 }
 0x88e   :  { %5464 = vmatprep.subr.bf16.mxu1 %v5463_v39  ;;  %5496 = vmatprep.subr.bf16.mxu0 %v5495_v56  ;;  %v5479_v42 = vpack.c.bf16 %v290_v41, %v286_v47  ;;  %v289_v39 = vld [vmem:[#allocation7 + $0x1e0] sm:$0xff]  ;;  %v294_v56 = vld [vmem:[#allocation8 + $0x8] sm:$0xff]  ;;  %v2434_v41 = vrot.slane %v7380_v38, 7  ;;  %v299_v38 = vld [vmem:[#allocation8 + $0x30] sm:$0xff] }
 0x891   :  { %5466 = vmatpush1.bf16.msra.mxu1 %v5465_v0  ;;  %5498 = vmatpush1.bf16.msra.mxu0 %v5497_v5  ;;  %v298_v0 = vld [vmem:[#allocation8 + $0x28] sm:$0xff]  ;;  %v5481_v5 = vpack.c.bf16 %v289_v39, %v285_v7 }
 0x892   :  { %5468 = vmatprep.subr.bf16.mxu1 %v5467_v22  ;;  %5500 = vmatprep.subr.bf16.mxu0 %v5499_v34  ;;  %v7395_v11 = vpack.c.bf16 %v298_v0, %v294_v56  ;;  %v293_v0 = vld [vmem:[#allocation8] sm:$0xff] }
 0x895   :  { %5470 = vmatpush1.bf16.msra.mxu1 %v5469_v35  ;;  %5502 = vmatpush1.bf16.msra.mxu0 %v5501_v49 }
 0x896   :  { %5472 = vmatprep.subr.bf16.mxu1 %v5471_v60  ;;  %5504 = vmatprep.subr.bf16.mxu0 %v5503_v63 }
 0x899   :  { %5474 = vmatpush1.bf16.msra.mxu1 %v5473_v16  ;;  %5506 = vmatpush1.bf16.msra.mxu0 %v5505_v8 }
 0x89a   :  { %5476 = vmatprep.subr.bf16.mxu1 %v5475_v44  ;;  %5508 = vmatprep.subr.bf16.mxu0 %v5507_v51 }
 0x89d   :  { %5478 = vmatpush1.bf16.msra.mxu1 %v5477_v29  ;;  %5510 = vmatpush1.bf16.msra.mxu0 %v5509_v20 }
 0x89e   :  { %5480 = vmatprep.subr.bf16.mxu1 %v5479_v42  ;;  %5512 = vmatprep.subr.bf16.mxu0 %v5511_v27 }
 0x8a1   :  { %5482 = vmatpush1.bf16.msra.mxu1 %v5481_v5  ;;  %5514 = vmatpush1.bf16.msra.mxu0 %v5513_v6  ;;  %v295_v5 = vld [vmem:[#allocation8 + $0x10] sm:$0xff] }
 0x8a2   :  { %5516 = vmatprep.subr.bf16.mxu1 %v7395_v11  ;;  %5548 = vmatprep.subr.bf16.mxu0 %v7397_v19 }
 0x956   :  { %v2290_v22 = vpop.f32.mrb[18].mxu1  ;;  %v2361_v23 = vpop.f32.mrb[20].mxu0 }
 0x957   :  { %v2370_v30 = vrot.slane %v2290_v22, 1  ;;  %v2374_v31 = vrot.slane %v2290_v22, 2  ;;  %v2292_v34 = vpop.f32.mrb[19].mxu1  ;;  %v2363_v35 = vpop.f32.mrb[21].mxu0  ;;  %v2372_v16 = vrot.slane %v2361_v23, 1  ;;  %v2376_v17 = vrot.slane %v2361_v23, 2 }
 0x958   :  { %v2371_v33 = vrot.slane %v2292_v34, 1  ;;  %v2375_v45 = vrot.slane %v2292_v34, 2  ;;  %v2373_v13 = vrot.slane %v2363_v35, 1  ;;  %v2377_v14 = vrot.slane %v2363_v35, 2  ;;  %v302_v22 = vld [vmem:[#allocation8 + $0x48] sm:$0xff] }
 0x959   :  { %v2386_v46 = vadd.f32 %v2370_v30, %v7007_v54  ;;  %v2390_v49 = vadd.f32 %v2374_v31, %v7012_v3  ;;  %v304_v30 = vld [vmem:[#allocation8 + $0x58] sm:$0xff] }
 0x95a   :  { %v2387_v53 = vadd.f32 %v2371_v33, %v7009_v57  ;;  %v2391_v50 = vadd.f32 %v2375_v45, %v7017_v15  ;;  %v2389_v54 = vadd.f32 %v2373_v13, %v7024_v48  ;;  %v2393_v3 = vadd.f32 %v2377_v14, %v7026_v37  ;;  %v308_v31 = vld [vmem:[#allocation8 + $0x78] sm:$0xff]  ;;  %v314_v14 = vld [vmem:[#allocation8 + $0xa8] sm:$0xff] }
 0x95b   :  { %v4708_v59 = vmul.f32 -1.442695, %v2386_v46  ;;  %v4709_v60 = vmul.f32 -1.442695, %v2390_v49  ;;  %v2388_v57 = vadd.f32 %v2372_v16, %v7029_v4  ;;  %v2392_v15 = vadd.f32 %v2376_v17, %v7033_v21  ;;  %v301_v46 = vld [vmem:[#allocation8 + $0x40] sm:$0xff]  ;;  %v312_v16 = vld [vmem:[#allocation8 + $0x98] sm:$0xff] }
 0x95c   :  { %v4710_v63 = vmul.f32 -1.442695, %v2387_v53  ;;  %v4711_v2 = vmul.f32 -1.442695, %v2391_v50  ;;  %v4712_v25 = vmul.f32 -1.442695, %v2389_v54  ;;  %v7411_v33 = vpack.c.bf16 %v297_v9, %v293_v0 }
 0x95d   :  { %6308 = vpow2.f32 %v4708_v59  ;;  %v4713_v26 = vmul.f32 -1.442695, %v2393_v3  ;;  %v7413_v45 = vpack.c.bf16 %v299_v38, %v295_v5  ;;  %v305_v49 = vld [vmem:[#allocation8 + $0x60] sm:$0xff]  ;;  %v303_v50 = vld [vmem:[#allocation8 + $0x50] sm:$0xff]  ;;  %v7419_v13 = vpack.c.bf16 %v308_v31, %v304_v30  ;;  %v316_v17 = vld [vmem:[#allocation8 + $0xb8] sm:$0xff] }
 0x95e   :  { %6310 = vpow2.f32 %v4709_v60  ;;  %v307_v59 = vld [vmem:[#allocation8 + $0x70] sm:$0xff]  ;;  %v310_v60 = vld [vmem:[#allocation8 + $0x88] sm:$0xff]  ;;  %v336_v38 = vld [vmem:[#allocation8 + $0x158] sm:$0xff] }
 0x95f   :  { %6312 = vpow2.f32 %v4710_v63  ;;  %v327_v0 = vld [vmem:[#allocation8 + $0x110] sm:$0xff]  ;;  %v334_v9 = vld [vmem:[#allocation8 + $0x148] sm:$0xff]  ;;  %v337_v30 = vld [vmem:[#allocation8 + $0x160] sm:$0xff] }
 0x960   :  { %6314 = vpow2.f32 %v4711_v2  ;;  %v7417_v2 = vpack.c.bf16 %v306_v55, %v302_v22  ;;  %v338_v5 = vld [vmem:[#allocation8 + $0x168] sm:$0xff]  ;;  %v333_v55 = vld [vmem:[#allocation8 + $0x140] sm:$0xff] }
 0x961   :  { %6316 = vtanh.f32 %v2388_v57  ;;  %v7474_v31 = vpack.c.bf16 %v338_v5, %v334_v9 }
 0x962   :  { %6318 = vtanh.f32 %v2392_v15  ;;  %v7425_v15 = vpack.c.bf16 %v305_v49, %v301_v46  ;;  %v339_v46 = vld [vmem:[#allocation8 + $0x170] sm:$0xff]  ;;  %v342_v49 = vld [vmem:[#allocation8 + $0x188] sm:$0xff] }
 0x963   :  { %6320 = vpow2.f32 %v4712_v25  ;;  %v309_v25 = vld [vmem:[#allocation8 + $0x80] sm:$0xff] }
 0x964   :  { %6322 = vpow2.f32 %v4713_v26  ;;  %v313_v26 = vld [vmem:[#allocation8 + $0xa0] sm:$0xff] }
 0x967   :  { %v6309_v8 = vpop.eup %6308 }
 0x968   :  { %v6311_v44 = vpop.eup %6310  ;;  %v2400_v52 = vadd.f32 1.0, %v6309_v8  ;;  %v7431_v8 = vpack.c.bf16 %v314_v14, %v310_v60  ;;  %v7480_v60 = vpack.c.bf16 %v337_v30, %v333_v55  ;;  %v341_v14 = vld [vmem:[#allocation8 + $0x180] sm:$0xff] }
 0x969   :  { %v6313_v43 = vpop.eup %6312  ;;  %v2401_v28 = vadd.f32 1.0, %v6311_v44  ;;  %v7433_v44 = vpack.c.bf16 %v316_v17, %v312_v16  ;;  %v345_v16 = vld [vmem:[#allocation8 + $0x1a0] sm:$0xff] }
 0x96a   :  { %v6315_v51 = vpop.eup %6314  ;;  %6324 = vrcp.f32 %v2400_v52  ;;  %v2412_v48 = vadd.f32 1.0, %v6313_v43  ;;  %v315_v52 = vld [vmem:[#allocation8 + $0xb0] sm:$0xff]  ;;  %v318_v43 = vld [vmem:[#allocation8 + $0xc8] sm:$0xff] }
 0x96b   :  { %6326 = vrcp.f32 %v2401_v28  ;;  %v2413_v37 = vadd.f32 1.0, %v6315_v51  ;;  %v6317_v4 = vpop.eup %6316  ;;  %v322_v51 = vld [vmem:[#allocation8 + $0xe8] sm:$0xff] }
 0x96c   :  { %6328 = vrcp.f32 %v2412_v48  ;;  %v6319_v21 = vpop.eup %6318  ;;  %v320_v48 = vld [vmem:[#allocation8 + $0xd8] sm:$0xff] }
 0x96d   :  { %6330 = vrcp.f32 %v2413_v37  ;;  %v6321_v24 = vpop.eup %6320  ;;  %v324_v37 = vld [vmem:[#allocation8 + $0xf8] sm:$0xff] }
 0x96e   :  { %v6323_v40 = vpop.eup %6322  ;;  %v2426_v58 = vadd.f32 1.0, %v6321_v24  ;;  %v317_v24 = vld [vmem:[#allocation8 + $0xc0] sm:$0xff] }
 0x96f   :  { %v2427_v7 = vadd.f32 1.0, %v6323_v40  ;;  %v321_v40 = vld [vmem:[#allocation8 + $0xe0] sm:$0xff] }
 0x970   :  { %6332 = vrcp.f32 %v2426_v58  ;;  %v326_v58 = vld [vmem:[#allocation8 + $0x108] sm:$0xff] }
 0x971   :  { %6334 = vrcp.f32 %v2427_v7  ;;  %v7456_v7 = vpack.c.bf16 %v321_v40, %v317_v24  ;;  %v353_v40 = vld [vmem:[#allocation8 + $0x1e0] sm:$0xff] }
 0x974   :  { %v6325_v61 = vpop.eup %6324 }
 0x975   :  { %v6327_v29 = vpop.eup %6326  ;;  %v2440_v47 = vmul.f32 %v6325_v61, %v6317_v4  ;;  %v7442_v4 = vpack.c.bf16 %v313_v26, %v309_v25  ;;  %v7448_v61 = vpack.c.bf16 %v322_v51, %v318_v43  ;;  %v350_v25 = vld [vmem:[#allocation8 + $0x1c8] sm:$0xff]  ;;  %v7492_v43 = vpack.c.bf16 %v345_v16, %v341_v14 }
 0x976   :  { %v6329_v20 = vpop.eup %6328  ;;  %v2441_v42 = vmul.f32 %v6327_v29, %v6319_v21  ;;  %v7450_v29 = vpack.c.bf16 %v324_v37, %v320_v48  ;;  %v354_v26 = vld [vmem:[#allocation8 + $0x1e8] sm:$0xff]  ;;  %v349_v48 = vld [vmem:[#allocation8 + $0x1c0] sm:$0xff] }
 0x977   :  { %v6331_v39 = vpop.eup %6330  ;;  %v2438_v27 = vmul.f32 %v6329_v20, %v2434_v41  ;;  %v323_v41 = vld [vmem:[#allocation8 + $0xf0] sm:$0xff]  ;;  %v330_v20 = vld [vmem:[#allocation8 + $0x128] sm:$0xff]  ;;  %v7498_v37 = vpack.c.bf16 %v354_v26, %v350_v25 }
 0x978   :  { %v2439_v62 = vmul.f32 %v6331_v39, %v2435_v12  ;;  %v332_v12 = vld [vmem:[#allocation8 + $0x138] sm:$0xff] }
 0x979   :  { %v2442_v32 = vadd.f32 %v2440_v47, %v2438_v27  ;;  %v319_v47 = vld [vmem:[#allocation8 + $0xd0] sm:$0xff]  ;;  %v325_v27 = vld [vmem:[#allocation8 + $0x100] sm:$0xff] }
 0x97a   :  { %v2443_v56 = vadd.f32 %v2441_v42, %v2439_v62  ;;  %v6333_v1 = vpop.eup %6332  ;;  %v328_v42 = vld [vmem:[#allocation8 + $0x118] sm:$0xff]  ;;  %v7458_v39 = vpack.c.bf16 %v323_v41, %v319_v47  ;;  %v329_v62 = vld [vmem:[#allocation8 + $0x120] sm:$0xff]  ;;  %v351_v47 = vld [vmem:[#allocation8 + $0x1d0] sm:$0xff] }
 0x97b   :  { %6336 = vtanh.f32 %v2442_v32  ;;  %v6335_v6 = vpop.eup %6334  ;;  %v7462_v32 = vpack.c.bf16 %v330_v20, %v326_v58  ;;  %v7468_v22 = vpack.c.bf16 %v329_v62, %v325_v27  ;;  %v355_v41 = vld [vmem:[#allocation8 + $0x1f0] sm:$0xff]  ;;  %v7504_v58 = vpack.c.bf16 %v353_v40, %v349_v48 }
 0x97c   :  { %6338 = vtanh.f32 %v2443_v56  ;;  %v7464_v56 = vpack.c.bf16 %v332_v12, %v328_v42  ;;  %v7506_v20 = vpack.c.bf16 %v355_v41, %v351_v47 }
 0x985   :  { %v6337_v23 = vpop.eup %6336 }
 0x986   :  { %v6339_v34 = vpop.eup %6338  ;;  %v2446_v35 = vmul.f32 %v6337_v23, %v6333_v1  ;;  %v331_v1 = vld [vmem:[#allocation8 + $0x130] sm:$0xff] }
 0x987   :  { %v2447_v53 = vmul.f32 %v6339_v34, %v6335_v6  ;;  %v340_v6 = vld [vmem:[#allocation8 + $0x178] sm:$0xff]  ;;  %v7470_v23 = vpack.c.bf16 %v331_v1, %v327_v0 }
 0x988   :  { %v2466_v63 = vsel %vm2465_vm8, %v7387_v10, %v2446_v35  ;;  %v4571_v54 = vrot.slane %v2446_v35, 7  ;;  %v7427_v10 = vpack.c.bf16 %v307_v59, %v303_v50  ;;  %v7476_v34 = vpack.c.bf16 %v340_v6, %v336_v38  ;;  %v335_v35 = vld [vmem:[#allocation8 + $0x150] sm:$0xff]  ;;  %v344_v50 = vld [vmem:[#allocation8 + $0x198] sm:$0xff]  ;;  %v8052_v6 = vld [vmem:[#allocation14_spill] sm:$0xff] }
 0x989   :  { %2554 = vmatmul.mubr.f32.vlgmr.msra.gmra.mrb[20].mxu1 %v2466_v63  ;;  %2631 = vmatmul.mubr.f32.vlgmr.msra.gmra.mrb[22].mxu0 %v2466_v63  ;;  %v2467_v3 = vsel %vm2465_vm8, %v7390_v18, %v2447_v53  ;;  %v4572_v57 = vrot.slane %v2447_v53, 6  ;;  %v311_v18 = vld [vmem:[#allocation8 + $0x90] sm:$0xff]  ;;  %v346_v53 = vld [vmem:[#allocation8 + $0x1a8] sm:$0xff]  ;;  %v348_v59 = vld [vmem:[#allocation8 + $0x1b8] sm:$0xff]  ;;  %v7482_v63 = vpack.c.bf16 %v339_v46, %v335_v35  ;;  %v8053_v55 = vsub.s32 0, %v8052_v6 }
 0x98a   :  { %5518 = vmatpush1.bf16.msra.mxu1 %v7411_v33  ;;  %5550 = vmatpush1.bf16.msra.mxu0 %v7413_v45  ;;  %v7444_v21 = vpack.c.bf16 %v315_v52, %v311_v18  ;;  %v7486_v17 = vpack.c.bf16 %v346_v53, %v342_v49  ;;  %v352_v18 = vld [vmem:[#allocation8 + $0x1d8] sm:$0xff]  ;;  %v8054_v35 = vsub.s32 1, %v8052_v6  ;;  %v8055_v26 = vsub.s32 3, %v8052_v6 }
 0x98b   :  { %2559 = vmatprep.mubr.f32.mxu1 %v8050_v36  ;;  %2636 = vmatprep.mubr.f32.mxu0 %v8050_v36  ;;  %v7436_v28 = vsel %vm846_vm2, %v4572_v57, %v4571_v54  ;;  %v7488_v54 = vpack.c.bf16 %v348_v59, %v344_v50  ;;  %v347_v57 = vld [vmem:[#allocation8 + $0x1b0] sm:$0xff]  ;;  %v356_v52 = vld [vmem:[#allocation8 + $0x1f8] sm:$0xff] }
 0x98c   :  { %5520 = vmatprep.subr.bf16.mxu1 %v7417_v2  ;;  %5552 = vmatprep.subr.bf16.mxu0 %v7419_v13  ;;  %v7500_v24 = vpack.c.bf16 %v356_v52, %v352_v18  ;;  %v357_v38 = vld [vmem:[%s8033_s8] sm:$0xf] }
 0x98d   :  { %2560 = vmatmul.mubr.f32.gmra.mrb[22].mxu1 %v2467_v3  ;;  %2637 = vmatmul.mubr.f32.gmra.mrb[24].mxu0 %v2467_v3  ;;  %v343_v3 = vld [vmem:[#allocation8 + $0x190] sm:$0xff]  ;;  %v2472_v30 = vrot.slane %v357_v38, %v8053_v55  ;;  %v2476_v46 = vrot.slane %v357_v38, %v8054_v35  ;;  %v2484_v18 = vrot.slane %v357_v38, %v8055_v26 }
 0x98e   :  { %5522 = vmatpush1.bf16.msra.mxu1 %v7425_v15  ;;  %5554 = vmatpush1.bf16.msra.mxu0 %v7427_v10  ;;  %v7494_v51 = vpack.c.bf16 %v347_v57, %v343_v3 }
 0x98f   :  { %5524 = vmatprep.subr.bf16.mxu1 %v7431_v8  ;;  %5556 = vmatprep.subr.bf16.mxu0 %v7433_v44 }
 0x990   :  { %2707 = vmatprep.mubr.f32.mxu1 %v8050_v36  ;;  %2778 = vmatprep.mubr.f32.mxu0 %v8050_v36 }
 0x992   :  { %5526 = vmatpush1.bf16.msra.mxu1 %v7442_v4  ;;  %5558 = vmatpush1.bf16.msra.mxu0 %v7444_v21 }
 0x993   :  { %5528 = vmatprep.subr.bf16.mxu1 %v7448_v61  ;;  %5560 = vmatprep.subr.bf16.mxu0 %v7450_v29 }
 0x996   :  { %5530 = vmatpush1.bf16.msra.mxu1 %v7456_v7  ;;  %5562 = vmatpush1.bf16.msra.mxu0 %v7458_v39 }
 0x997   :  { %5532 = vmatprep.subr.bf16.mxu1 %v7462_v32  ;;  %5564 = vmatprep.subr.bf16.mxu0 %v7464_v56 }
 0x99a   :  { %5534 = vmatpush1.bf16.msra.mxu1 %v7468_v22  ;;  %5566 = vmatpush1.bf16.msra.mxu0 %v7470_v23 }
 0x99b   :  { %5536 = vmatprep.subr.bf16.mxu1 %v7474_v31  ;;  %5568 = vmatprep.subr.bf16.mxu0 %v7476_v34 }
 0x99e   :  { %5538 = vmatpush1.bf16.msra.mxu1 %v7480_v60  ;;  %5570 = vmatpush1.bf16.msra.mxu0 %v7482_v63 }
 0x99f   :  { %5540 = vmatprep.subr.bf16.mxu1 %v7486_v17  ;;  %5572 = vmatprep.subr.bf16.mxu0 %v7488_v54 }
 0x9a2   :  { %5542 = vmatpush1.bf16.msra.mxu1 %v7492_v43  ;;  %5574 = vmatpush1.bf16.msra.mxu0 %v7494_v51 }
 0x9a3   :  { %5544 = vmatprep.subr.bf16.mxu1 %v7498_v37  ;;  %5576 = vmatprep.subr.bf16.mxu0 %v7500_v24 }
 0x9a6   :  { %5546 = vmatpush1.bf16.msra.mxu1 %v7504_v58  ;;  %5578 = vmatpush1.bf16.msra.mxu0 %v7506_v20 }
 0x9a7   :  { %5580 = vmatprep.subr.bf16.mxu1 %v7395_v11  ;;  %5612 = vmatprep.subr.bf16.mxu0 %v7397_v19 }
 0x9a9   :  { %2708 = vmatmul.mubr.f32.vlgmr.msra.gmra.mrb[24].mxu1 %v8050_v36  ;;  %2779 = vmatmul.mubr.f32.vlgmr.msra.gmra.mrb[26].mxu0 %v8050_v36 }
 0x9aa   :  { %5582 = vmatpush1.bf16.msra.mxu1 %v7411_v33  ;;  %5614 = vmatpush1.bf16.msra.mxu0 %v7413_v45 }
 0x9ab   :  { %5584 = vmatprep.subr.bf16.mxu1 %v7417_v2  ;;  %5616 = vmatprep.subr.bf16.mxu0 %v7419_v13 }
 0x9ac   :  { %2926 = vmatprep.mubr.f32.mxu1 %v8050_v36  ;;  %2997 = vmatprep.mubr.f32.mxu0 %v8050_v36 }
 0x9ae   :  { %5586 = vmatpush1.bf16.msra.mxu1 %v7425_v15  ;;  %5618 = vmatpush1.bf16.msra.mxu0 %v7427_v10 }
 0x9af   :  { %5588 = vmatprep.subr.bf16.mxu1 %v7431_v8  ;;  %5620 = vmatprep.subr.bf16.mxu0 %v7433_v44 }
 0x9b2   :  { %5590 = vmatpush1.bf16.msra.mxu1 %v7442_v4  ;;  %5622 = vmatpush1.bf16.msra.mxu0 %v7444_v21 }
 0x9b3   :  { %5592 = vmatprep.subr.bf16.mxu1 %v7448_v61  ;;  %5624 = vmatprep.subr.bf16.mxu0 %v7450_v29 }
 0x9b6   :  { %5594 = vmatpush1.bf16.msra.mxu1 %v7456_v7  ;;  %5626 = vmatpush1.bf16.msra.mxu0 %v7458_v39 }
 0x9b7   :  { %5596 = vmatprep.subr.bf16.mxu1 %v7462_v32  ;;  %5628 = vmatprep.subr.bf16.mxu0 %v7464_v56 }
 0x9ba   :  { %5598 = vmatpush1.bf16.msra.mxu1 %v7468_v22  ;;  %5630 = vmatpush1.bf16.msra.mxu0 %v7470_v23 }
 0x9bb   :  { %5600 = vmatprep.subr.bf16.mxu1 %v7474_v31  ;;  %5632 = vmatprep.subr.bf16.mxu0 %v7476_v34 }
 0x9be   :  { %5602 = vmatpush1.bf16.msra.mxu1 %v7480_v60  ;;  %5634 = vmatpush1.bf16.msra.mxu0 %v7482_v63 }
 0x9bf   :  { %5604 = vmatprep.subr.bf16.mxu1 %v7486_v17  ;;  %5636 = vmatprep.subr.bf16.mxu0 %v7488_v54 }
 0x9c2   :  { %5606 = vmatpush1.bf16.msra.mxu1 %v7492_v43  ;;  %5638 = vmatpush1.bf16.msra.mxu0 %v7494_v51 }
 0x9c3   :  { %5608 = vmatprep.subr.bf16.mxu1 %v7498_v37  ;;  %5640 = vmatprep.subr.bf16.mxu0 %v7500_v24 }
 0x9c6   :  { %5610 = vmatpush1.bf16.msra.mxu1 %v7504_v58  ;;  %5642 = vmatpush1.bf16.msra.mxu0 %v7506_v20 }
 0x9c7   :  { %5644 = vmatprep.subr.bf16.mxu1 %v7395_v11  ;;  %5676 = vmatprep.subr.bf16.mxu0 %v7397_v19 }
 0xa5c   :  { %v2555_v42 = vpop.f32.mrb[20].mxu1  ;;  %v2632_v12 = vpop.f32.mrb[22].mxu0 }
 0xa5d   :  { %v2557_v27 = vpop.f32.mrb[21].mxu1  ;;  %v2634_v62 = vpop.f32.mrb[23].mxu0  ;;  %v7557_v49 = vadd.f32 %v2555_v42, %v2472_v30 }
 0xa5e   :  { %v7559_v53 = vadd.f32 %v2557_v27, %v2476_v46 }
 0xa60   :  { %v2561_v0 = vpop.f32.mrb[22].mxu1  ;;  %v2638_v1 = vpop.f32.mrb[24].mxu0 }
 0xa61   :  { %v2563_v9 = vpop.f32.mrb[23].mxu1  ;;  %v2640_v5 = vpop.f32.mrb[25].mxu0  ;;  %v7561_v14 = vadd.f32 %v2561_v0, %v2472_v30  ;;  %v8056_v0 = vsub.s32 2, %v8052_v6 }
 0xa62   :  { %v7566_v52 = vadd.f32 %v2563_v9, %v2476_v46  ;;  %v7575_v9 = vadd.f32 %v2640_v5, %v2484_v18 }
 0xa63   :  { %v2480_v55 = vrot.slane %v357_v38, %v8056_v0 }
 0xa7c   :  { %v2709_v50 = vpop.f32.mrb[24].mxu1  ;;  %v2780_v59 = vpop.f32.mrb[26].mxu0 }
 0xa7d   :  { %v2789_v16 = vrot.slane %v2709_v50, 1  ;;  %v2801_v3 = vadd.f32 %v2709_v50, %v7557_v49  ;;  %v2711_v57 = vpop.f32.mrb[25].mxu1  ;;  %v2782_v25 = vpop.f32.mrb[27].mxu0  ;;  %v7573_v50 = vadd.f32 %v2634_v62, %v2484_v18 }
 0xa7e   :  { %v2790_v48 = vrot.slane %v2711_v57, 1  ;;  %v2802_v40 = vadd.f32 %v2711_v57, %v7559_v53  ;;  %v2792_v35 = vrot.slane %v2782_v25, 1  ;;  %v2791_v57 = vrot.slane %v2780_v59, 1 }
 0xa7f   :  { %v2805_v47 = vadd.f32 %v2789_v16, %v7561_v14  ;;  %v4714_v41 = vmul.f32 -1.442695, %v2801_v3  ;;  %v2804_v46 = vadd.f32 %v2782_v25, %v7573_v50  ;;  %v7578_v16 = vadd.f32 %v2632_v12, %v2480_v55 }
 0xa80   :  { %v2806_v42 = vadd.f32 %v2790_v48, %v7566_v52  ;;  %v4716_v27 = vmul.f32 -1.442695, %v2802_v40  ;;  %v2808_v3 = vadd.f32 %v2792_v35, %v7575_v9  ;;  %v7582_v48 = vadd.f32 %v2638_v1, %v2480_v55 }
 0xa81   :  { %6340 = vpow2.f32 %v4714_v41  ;;  %v4715_v30 = vmul.f32 -1.442695, %v2805_v47  ;;  %v2803_v38 = vadd.f32 %v2780_v59, %v7578_v16  ;;  %v4718_v6 = vmul.f32 -1.442695, %v2804_v46 }
 0xa82   :  { %v4717_v26 = vmul.f32 -1.442695, %v2806_v42  ;;  %v4719_v62 = vmul.f32 -1.442695, %v2808_v3  ;;  %v2807_v5 = vadd.f32 %v2791_v57, %v7582_v48 }
 0xa83   :  { %6342 = vpow2.f32 %v4715_v30 }
 0xa84   :  { %6344 = vpow2.f32 %v4716_v27 }
 0xa85   :  { %6346 = vpow2.f32 %v4717_v26 }
 0xa86   :  { %6348 = vtanh.f32 %v2803_v38 }
 0xa87   :  { %6350 = vpow2.f32 %v4718_v6 }
 0xa88   :  { %6352 = vpow2.f32 %v4719_v62 }
 0xa8b   :  { %v6341_v40 = vpop.eup %6340 }
 0xa8c   :  { %v2815_v18 = vadd.f32 1.0, %v6341_v40 }
 0xa8d   :  { %v6343_v47 = vpop.eup %6342 }
 0xa8e   :  { %v6345_v12 = vpop.eup %6344  ;;  %v2816_v25 = vadd.f32 1.0, %v6343_v47  ;;  %6354 = vrcp.f32 %v2815_v18 }
 0xa8f   :  { %v6347_v41 = vpop.eup %6346  ;;  %6356 = vtanh.f32 %v2807_v5  ;;  %v2827_v42 = vadd.f32 1.0, %v6345_v12 }
 0xa90   :  { %6358 = vrcp.f32 %v2816_v25  ;;  %v2828_v59 = vadd.f32 1.0, %v6347_v41  ;;  %v6349_v1 = vpop.eup %6348 }
 0xa91   :  { %6360 = vrcp.f32 %v2827_v42  ;;  %v6351_v27 = vpop.eup %6350 }
 0xa92   :  { %6362 = vrcp.f32 %v2828_v59  ;;  %v6353_v0 = vpop.eup %6352  ;;  %v2841_v46 = vadd.f32 1.0, %v6351_v27 }
 0xa93   :  { %v2842_v38 = vadd.f32 1.0, %v6353_v0 }
 0xa94   :  { %6364 = vrcp.f32 %v2841_v46 }
 0xa95   :  { %6366 = vrcp.f32 %v2842_v38 }
 0xa98   :  { %v6355_v55 = vpop.eup %6354 }
 0xa99   :  { %v6357_v30 = vpop.eup %6356  ;;  %v2849_v35 = vmul.f32 %v6355_v55, %v6349_v1 }
 0xa9a   :  { %v6359_v26 = vpop.eup %6358 }
 0xa9b   :  { %v6361_v3 = vpop.eup %6360  ;;  %v2850_v57 = vmul.f32 %v6359_v26, %v6357_v30 }
 0xa9c   :  { %v6363_v6 = vpop.eup %6362  ;;  %v2847_v62 = vmul.f32 0.0, %v6361_v3 }
 0xa9d   :  { %v2848_v40 = vmul.f32 0.0, %v6363_v6 }
 0xa9e   :  { %v7585_v5 = vadd.f32 %v2849_v35, %v2847_v62  ;;  %v6365_v47 = vpop.eup %6364 }
 0xa9f   :  { %v7587_v18 = vadd.f32 %v2850_v57, %v2848_v40  ;;  %v6367_v12 = vpop.eup %6366 }
 0xaa0   :  { %6368 = vtanh.f32 %v7585_v5 }
 0xaa1   :  { %6370 = vtanh.f32 %v7587_v18 }
 0xaaa   :  { %v6369_v25 = vpop.eup %6368 }
 0xaab   :  { %v6371_v41 = vpop.eup %6370  ;;  %v2855_v42 = vmul.f32 %v6369_v25, %v6365_v47 }
 0xaac   :  { %v2856_v59 = vmul.f32 %v6371_v41, %v6367_v12 }
 0xaae   :  { %v2859_v1 = vrot.slane %v2856_v59, 7 }
 0xab0   :  { %v2860_v27 = vsel %vm846_vm2, %v2859_v1, %v2855_v42 }
 0xab1   :  { %2927 = vmatmul.mubr.f32.vlgmr.msra.gmra.mrb[26].mxu1 %v2860_v27  ;;  %2998 = vmatmul.mubr.f32.vlgmr.msra.gmra.mrb[28].mxu0 %v2860_v27 }
 0xab2   :  { %5646 = vmatpush1.bf16.msra.mxu1 %v7411_v33  ;;  %5678 = vmatpush1.bf16.msra.mxu0 %v7413_v45 }
 0xab3   :  { %5648 = vmatprep.subr.bf16.mxu1 %v7417_v2  ;;  %5680 = vmatprep.subr.bf16.mxu0 %v7419_v13 }
 0xab4   :  { %3151 = vmatprep.mubr.f32.mxu1 %v8050_v36  ;;  %3222 = vmatprep.mubr.f32.mxu0 %v8050_v36 }
 0xab6   :  { %5650 = vmatpush1.bf16.msra.mxu1 %v7425_v15  ;;  %5682 = vmatpush1.bf16.msra.mxu0 %v7427_v10 }
 0xab7   :  { %5652 = vmatprep.subr.bf16.mxu1 %v7431_v8  ;;  %5684 = vmatprep.subr.bf16.mxu0 %v7433_v44 }
 0xaba   :  { %5654 = vmatpush1.bf16.msra.mxu1 %v7442_v4  ;;  %5686 = vmatpush1.bf16.msra.mxu0 %v7444_v21 }
 0xabb   :  { %5656 = vmatprep.subr.bf16.mxu1 %v7448_v61  ;;  %5688 = vmatprep.subr.bf16.mxu0 %v7450_v29 }
 0xabe   :  { %5658 = vmatpush1.bf16.msra.mxu1 %v7456_v7  ;;  %5690 = vmatpush1.bf16.msra.mxu0 %v7458_v39 }
 0xabf   :  { %5660 = vmatprep.subr.bf16.mxu1 %v7462_v32  ;;  %5692 = vmatprep.subr.bf16.mxu0 %v7464_v56 }
 0xac2   :  { %5662 = vmatpush1.bf16.msra.mxu1 %v7468_v22  ;;  %5694 = vmatpush1.bf16.msra.mxu0 %v7470_v23 }
 0xac3   :  { %5664 = vmatprep.subr.bf16.mxu1 %v7474_v31  ;;  %5696 = vmatprep.subr.bf16.mxu0 %v7476_v34 }
 0xac6   :  { %5666 = vmatpush1.bf16.msra.mxu1 %v7480_v60  ;;  %5698 = vmatpush1.bf16.msra.mxu0 %v7482_v63 }
 0xac7   :  { %5668 = vmatprep.subr.bf16.mxu1 %v7486_v17  ;;  %5700 = vmatprep.subr.bf16.mxu0 %v7488_v54 }
 0xaca   :  { %5670 = vmatpush1.bf16.msra.mxu1 %v7492_v43  ;;  %5702 = vmatpush1.bf16.msra.mxu0 %v7494_v51 }
 0xacb   :  { %5672 = vmatprep.subr.bf16.mxu1 %v7498_v37  ;;  %5704 = vmatprep.subr.bf16.mxu0 %v7500_v24 }
 0xace   :  { %5674 = vmatpush1.bf16.msra.mxu1 %v7504_v58  ;;  %5706 = vmatpush1.bf16.msra.mxu0 %v7506_v20 }
 0xacf   :  { %5708 = vmatprep.subr.bf16.mxu1 %v7395_v11  ;;  %5740 = vmatprep.subr.bf16.mxu0 %v7397_v19 }
 0xb84   :  { %v2928_v0 = vpop.f32.mrb[26].mxu1  ;;  %v2999_v55 = vpop.f32.mrb[28].mxu0 }
 0xb85   :  { %v3008_v30 = vrot.slane %v2928_v0, 7  ;;  %v3024_v35 = vadd.f32 %v2928_v0, %v7561_v14  ;;  %v2930_v26 = vpop.f32.mrb[27].mxu1  ;;  %v3001_v46 = vpop.f32.mrb[29].mxu0  ;;  %v3010_v59 = vrot.slane %v2999_v55, 7  ;;  %v3026_v1 = vadd.f32 %v2999_v55, %v7582_v48 }
 0xb86   :  { %v3009_v3 = vrot.slane %v2930_v26, 7  ;;  %v3025_v57 = vadd.f32 %v2930_v26, %v7566_v52  ;;  %v3011_v40 = vrot.slane %v3001_v46, 7  ;;  %v3027_v42 = vadd.f32 %v3001_v46, %v7575_v9 }
 0xb87   :  { %v3020_v38 = vadd.f32 %v3008_v30, %v7557_v49  ;;  %v4721_v6 = vmul.f32 -1.442695, %v3024_v35  ;;  %v3022_v35 = vadd.f32 %v3010_v59, %v7578_v16  ;;  %v3068_v59 = vrot.slane %v7585_v5, 7 }
 0xb88   :  { %v3021_v62 = vadd.f32 %v3009_v3, %v7559_v53  ;;  %v4723_v12 = vmul.f32 -1.442695, %v3025_v57  ;;  %v3023_v41 = vadd.f32 %v3011_v40, %v7573_v50  ;;  %v4725_v0 = vmul.f32 -1.442695, %v3027_v42 }
 0xb89   :  { %v4720_v47 = vmul.f32 -1.442695, %v3020_v38  ;;  %6372 = vpow2.f32 %v4721_v6 }
 0xb8a   :  { %v4722_v25 = vmul.f32 -1.442695, %v3021_v62  ;;  %v4724_v27 = vmul.f32 -1.442695, %v3023_v41 }
 0xb8b   :  { %6374 = vpow2.f32 %v4720_v47 }
 0xb8c   :  { %6376 = vpow2.f32 %v4722_v25 }
 0xb8d   :  { %6378 = vpow2.f32 %v4723_v12 }
 0xb8e   :  { %6380 = vtanh.f32 %v3026_v1 }
 0xb8f   :  { %6382 = vpow2.f32 %v4724_v27 }
 0xb90   :  { %6384 = vpow2.f32 %v4725_v0  ;;  %v3069_v0 = vrot.slane %v7587_v18, 7 }
 0xb93   :  { %v6373_v30 = vpop.eup %6372 }
 0xb94   :  { %v3035_v26 = vadd.f32 1.0, %v6373_v30 }
 0xb95   :  { %v6375_v3 = vpop.eup %6374 }
 0xb96   :  { %v6377_v57 = vpop.eup %6376  ;;  %v3034_v38 = vadd.f32 1.0, %v6375_v3  ;;  %6386 = vrcp.f32 %v3035_v26 }
 0xb97   :  { %v6379_v6 = vpop.eup %6378  ;;  %6388 = vtanh.f32 %v3022_v35  ;;  %v3046_v62 = vadd.f32 1.0, %v6377_v57 }
 0xb98   :  { %6390 = vrcp.f32 %v3034_v38  ;;  %v3047_v46 = vadd.f32 1.0, %v6379_v6  ;;  %v6381_v55 = vpop.eup %6380 }
 0xb99   :  { %6392 = vrcp.f32 %v3046_v62  ;;  %v6383_v40 = vpop.eup %6382 }
 0xb9a   :  { %6394 = vrcp.f32 %v3047_v46  ;;  %v6385_v47 = vpop.eup %6384  ;;  %v3060_v1 = vadd.f32 1.0, %v6383_v40 }
 0xb9b   :  { %v3061_v35 = vadd.f32 1.0, %v6385_v47 }
 0xb9c   :  { %6396 = vrcp.f32 %v3060_v1 }
 0xb9d   :  { %6398 = vrcp.f32 %v3061_v35 }
 0xba0   :  { %v6387_v12 = vpop.eup %6386 }
 0xba1   :  { %v6389_v25 = vpop.eup %6388  ;;  %v3075_v41 = vmul.f32 %v6387_v12, %v6381_v55 }
 0xba2   :  { %v6391_v42 = vpop.eup %6390 }
 0xba3   :  { %v6393_v27 = vpop.eup %6392  ;;  %v3074_v30 = vmul.f32 %v6391_v42, %v6389_v25 }
 0xba4   :  { %v6395_v26 = vpop.eup %6394  ;;  %v3072_v3 = vmul.f32 %v6393_v27, %v3068_v59 }
 0xba5   :  { %v3073_v57 = vmul.f32 %v6395_v26, %v3069_v0 }
 0xba6   :  { %v7636_v38 = vadd.f32 %v3074_v30, %v3072_v3  ;;  %v6397_v5 = vpop.eup %6396 }
 0xba7   :  { %v7638_v6 = vadd.f32 %v3075_v41, %v3073_v57  ;;  %v6399_v62 = vpop.eup %6398 }
 0xba8   :  { %6400 = vtanh.f32 %v7636_v38 }
 0xba9   :  { %6402 = vtanh.f32 %v7638_v6 }
 0xbb2   :  { %v6401_v46 = vpop.eup %6400 }
 0xbb3   :  { %v6403_v55 = vpop.eup %6402  ;;  %v3080_v18 = vmul.f32 %v6401_v46, %v6397_v5 }
 0xbb4   :  { %v3081_v40 = vmul.f32 %v6403_v55, %v6399_v62 }
 0xbb5   :  { %v3084_v47 = vrot.slane %v3080_v18, 1 }
 0xbb7   :  { %v3085_v12 = vsel %vm846_vm2, %v3081_v40, %v3084_v47 }
 0xbb8   :  { %3152 = vmatmul.mubr.f32.vlgmr.msra.gmra.mrb[28].mxu1 %v3085_v12  ;;  %3223 = vmatmul.mubr.f32.vlgmr.msra.gmra.mrb[30].mxu0 %v3085_v12 }
 0xbb9   :  { %5710 = vmatpush1.bf16.msra.mxu1 %v7411_v33  ;;  %5742 = vmatpush1.bf16.msra.mxu0 %v7413_v45 }
 0xbba   :  { %5712 = vmatprep.subr.bf16.mxu1 %v7417_v2  ;;  %5744 = vmatprep.subr.bf16.mxu0 %v7419_v13 }
 0xbbb   :  { %3381 = vmatprep.mubr.f32.mxu1 %v8050_v36  ;;  %3452 = vmatprep.mubr.f32.mxu0 %v8050_v36 }
 0xbbd   :  { %5714 = vmatpush1.bf16.msra.mxu1 %v7425_v15  ;;  %5746 = vmatpush1.bf16.msra.mxu0 %v7427_v10 }
 0xbbe   :  { %5716 = vmatprep.subr.bf16.mxu1 %v7431_v8  ;;  %5748 = vmatprep.subr.bf16.mxu0 %v7433_v44 }
 0xbc1   :  { %5718 = vmatpush1.bf16.msra.mxu1 %v7442_v4  ;;  %5750 = vmatpush1.bf16.msra.mxu0 %v7444_v21 }
 0xbc2   :  { %5720 = vmatprep.subr.bf16.mxu1 %v7448_v61  ;;  %5752 = vmatprep.subr.bf16.mxu0 %v7450_v29 }
 0xbc5   :  { %5722 = vmatpush1.bf16.msra.mxu1 %v7456_v7  ;;  %5754 = vmatpush1.bf16.msra.mxu0 %v7458_v39 }
 0xbc6   :  { %5724 = vmatprep.subr.bf16.mxu1 %v7462_v32  ;;  %5756 = vmatprep.subr.bf16.mxu0 %v7464_v56 }
 0xbc9   :  { %5726 = vmatpush1.bf16.msra.mxu1 %v7468_v22  ;;  %5758 = vmatpush1.bf16.msra.mxu0 %v7470_v23 }
 0xbca   :  { %5728 = vmatprep.subr.bf16.mxu1 %v7474_v31  ;;  %5760 = vmatprep.subr.bf16.mxu0 %v7476_v34 }
 0xbcd   :  { %5730 = vmatpush1.bf16.msra.mxu1 %v7480_v60  ;;  %5762 = vmatpush1.bf16.msra.mxu0 %v7482_v63 }
 0xbce   :  { %5732 = vmatprep.subr.bf16.mxu1 %v7486_v17  ;;  %5764 = vmatprep.subr.bf16.mxu0 %v7488_v54 }
 0xbd1   :  { %5734 = vmatpush1.bf16.msra.mxu1 %v7492_v43  ;;  %5766 = vmatpush1.bf16.msra.mxu0 %v7494_v51 }
 0xbd2   :  { %5736 = vmatprep.subr.bf16.mxu1 %v7498_v37  ;;  %5768 = vmatprep.subr.bf16.mxu0 %v7500_v24 }
 0xbd5   :  { %5738 = vmatpush1.bf16.msra.mxu1 %v7504_v58  ;;  %5770 = vmatpush1.bf16.msra.mxu0 %v7506_v20 }
 0xbd6   :  { %5772 = vmatprep.subr.bf16.mxu1 %v7395_v11  ;;  %5804 = vmatprep.subr.bf16.mxu0 %v7397_v19 }
 0xc8b   :  { %v3153_v25 = vpop.f32.mrb[28].mxu1  ;;  %v3224_v41 = vpop.f32.mrb[30].mxu0 }
 0xc8c   :  { %v3233_v42 = vrot.slane %v3153_v25, 6  ;;  %v3237_v59 = vrot.slane %v3153_v25, 7  ;;  %v3155_v1 = vpop.f32.mrb[29].mxu1  ;;  %v3226_v27 = vpop.f32.mrb[31].mxu0  ;;  %v3235_v47 = vrot.slane %v3224_v41, 6  ;;  %v3239_v12 = vrot.slane %v3224_v41, 7 }
 0xc8d   :  { %v3234_v0 = vrot.slane %v3155_v1, 6  ;;  %v3238_v30 = vrot.slane %v3155_v1, 7  ;;  %v3236_v18 = vrot.slane %v3226_v27, 6  ;;  %v3240_v40 = vrot.slane %v3226_v27, 7 }
 0xc8e   :  { %v3249_v35 = vadd.f32 %v3233_v42, %v7557_v49  ;;  %v3253_v26 = vadd.f32 %v3237_v59, %v7561_v14  ;;  %v3251_v59 = vadd.f32 %v3235_v47, %v7578_v16  ;;  %v3255_v1 = vadd.f32 %v3239_v12, %v7582_v48 }
 0xc8f   :  { %v3250_v3 = vadd.f32 %v3234_v0, %v7559_v53  ;;  %v3254_v57 = vadd.f32 %v3238_v30, %v7566_v52  ;;  %v3252_v25 = vadd.f32 %v3236_v18, %v7573_v50  ;;  %v3256_v42 = vadd.f32 %v3240_v40, %v7575_v9 }
 0xc90   :  { %v4726_v5 = vmul.f32 -1.442695, %v3249_v35  ;;  %v4727_v62 = vmul.f32 -1.442695, %v3253_v26 }
 0xc91   :  { %v4728_v46 = vmul.f32 -1.442695, %v3250_v3  ;;  %v4729_v55 = vmul.f32 -1.442695, %v3254_v57  ;;  %v4730_v0 = vmul.f32 -1.442695, %v3252_v25 }
 0xc92   :  { %6404 = vpow2.f32 %v4726_v5  ;;  %v4731_v30 = vmul.f32 -1.442695, %v3256_v42  ;;  %v3297_v42 = vrot.slane %v7636_v38, 7 }
 0xc93   :  { %6406 = vpow2.f32 %v4727_v62 }
 0xc94   :  { %6408 = vpow2.f32 %v4728_v46 }
 0xc95   :  { %6410 = vpow2.f32 %v4729_v55 }
 0xc96   :  { %6412 = vtanh.f32 %v3251_v59 }
 0xc97   :  { %6414 = vtanh.f32 %v3255_v1 }
 0xc98   :  { %6416 = vpow2.f32 %v4730_v0 }
 0xc99   :  { %6418 = vpow2.f32 %v4731_v30  ;;  %v3298_v30 = vrot.slane %v7638_v6, 7 }
 0xc9c   :  { %v6405_v35 = vpop.eup %6404 }
 0xc9d   :  { %v6407_v26 = vpop.eup %6406  ;;  %v3263_v27 = vadd.f32 1.0, %v6405_v35 }
 0xc9e   :  { %v6409_v3 = vpop.eup %6408  ;;  %v3264_v41 = vadd.f32 1.0, %v6407_v26 }
 0xc9f   :  { %v6411_v57 = vpop.eup %6410  ;;  %6420 = vrcp.f32 %v3263_v27  ;;  %v3275_v5 = vadd.f32 1.0, %v6409_v3 }
 0xca0   :  { %6422 = vrcp.f32 %v3264_v41  ;;  %v3276_v62 = vadd.f32 1.0, %v6411_v57  ;;  %v6413_v46 = vpop.eup %6412 }
 0xca1   :  { %6424 = vrcp.f32 %v3275_v5  ;;  %v6415_v55 = vpop.eup %6414 }
 0xca2   :  { %6426 = vrcp.f32 %v3276_v62  ;;  %v6417_v18 = vpop.eup %6416 }
 0xca3   :  { %v6419_v40 = vpop.eup %6418  ;;  %v3289_v59 = vadd.f32 1.0, %v6417_v18 }
 0xca4   :  { %v3290_v35 = vadd.f32 1.0, %v6419_v40 }
 0xca5   :  { %6428 = vrcp.f32 %v3289_v59 }
 0xca6   :  { %6430 = vrcp.f32 %v3290_v35 }
 0xca9   :  { %v6421_v47 = vpop.eup %6420 }
 0xcaa   :  { %v6423_v12 = vpop.eup %6422  ;;  %v3303_v25 = vmul.f32 %v6421_v47, %v6413_v46 }
 0xcab   :  { %v6425_v1 = vpop.eup %6424  ;;  %v3304_v0 = vmul.f32 %v6423_v12, %v6415_v55 }
 0xcac   :  { %v6427_v26 = vpop.eup %6426  ;;  %v3301_v27 = vmul.f32 %v6425_v1, %v3297_v42 }
 0xcad   :  { %v3302_v3 = vmul.f32 %v6427_v26, %v3298_v30 }
 0xcae   :  { %v7687_v41 = vadd.f32 %v3303_v25, %v3301_v27 }
 0xcaf   :  { %v7689_v57 = vadd.f32 %v3304_v0, %v3302_v3  ;;  %v6429_v38 = vpop.eup %6428 }
 0xcb0   :  { %6432 = vtanh.f32 %v7687_v41  ;;  %v6431_v5 = vpop.eup %6430 }
 0xcb1   :  { %6434 = vtanh.f32 %v7689_v57 }
 0xcba   :  { %v6433_v62 = vpop.eup %6432 }
 0xcbb   :  { %v6435_v46 = vpop.eup %6434  ;;  %v3309_v55 = vmul.f32 %v6433_v62, %v6429_v38 }
 0xcbc   :  { %v3310_v6 = vmul.f32 %v6435_v46, %v6431_v5 }
 0xcbd   :  { %v3313_v18 = vrot.slane %v3309_v55, 2 }
 0xcbe   :  { %v3314_v40 = vrot.slane %v3310_v6, 1 }
 0xcc0   :  { %v3315_v47 = vsel %vm846_vm2, %v3314_v40, %v3313_v18 }
 0xcc1   :  { %3382 = vmatmul.mubr.f32.vlgmr.msra.gmra.mrb[30].mxu1 %v3315_v47  ;;  %3453 = vmatmul.mubr.f32.vlgmr.msra.gmra.mrb[32].mxu0 %v3315_v47 }
 0xcc2   :  { %5774 = vmatpush1.bf16.msra.mxu1 %v7411_v33  ;;  %5806 = vmatpush1.bf16.msra.mxu0 %v7413_v45 }
 0xcc3   :  { %5776 = vmatprep.subr.bf16.mxu1 %v7417_v2  ;;  %5808 = vmatprep.subr.bf16.mxu0 %v7419_v13 }
 0xcc4   :  { %3611 = vmatprep.mubr.f32.mxu1 %v8050_v36  ;;  %3682 = vmatprep.mubr.f32.mxu0 %v8050_v36 }
 0xcc6   :  { %5778 = vmatpush1.bf16.msra.mxu1 %v7425_v15  ;;  %5810 = vmatpush1.bf16.msra.mxu0 %v7427_v10 }
 0xcc7   :  { %5780 = vmatprep.subr.bf16.mxu1 %v7431_v8  ;;  %5812 = vmatprep.subr.bf16.mxu0 %v7433_v44 }
 0xcca   :  { %5782 = vmatpush1.bf16.msra.mxu1 %v7442_v4  ;;  %5814 = vmatpush1.bf16.msra.mxu0 %v7444_v21 }
 0xccb   :  { %5784 = vmatprep.subr.bf16.mxu1 %v7448_v61  ;;  %5816 = vmatprep.subr.bf16.mxu0 %v7450_v29 }
 0xcce   :  { %5786 = vmatpush1.bf16.msra.mxu1 %v7456_v7  ;;  %5818 = vmatpush1.bf16.msra.mxu0 %v7458_v39 }
 0xccf   :  { %5788 = vmatprep.subr.bf16.mxu1 %v7462_v32  ;;  %5820 = vmatprep.subr.bf16.mxu0 %v7464_v56 }
 0xcd2   :  { %5790 = vmatpush1.bf16.msra.mxu1 %v7468_v22  ;;  %5822 = vmatpush1.bf16.msra.mxu0 %v7470_v23 }
 0xcd3   :  { %5792 = vmatprep.subr.bf16.mxu1 %v7474_v31  ;;  %5824 = vmatprep.subr.bf16.mxu0 %v7476_v34 }
 0xcd6   :  { %5794 = vmatpush1.bf16.msra.mxu1 %v7480_v60  ;;  %5826 = vmatpush1.bf16.msra.mxu0 %v7482_v63 }
 0xcd7   :  { %5796 = vmatprep.subr.bf16.mxu1 %v7486_v17  ;;  %5828 = vmatprep.subr.bf16.mxu0 %v7488_v54 }
 0xcda   :  { %5798 = vmatpush1.bf16.msra.mxu1 %v7492_v43  ;;  %5830 = vmatpush1.bf16.msra.mxu0 %v7494_v51 }
 0xcdb   :  { %5800 = vmatprep.subr.bf16.mxu1 %v7498_v37  ;;  %5832 = vmatprep.subr.bf16.mxu0 %v7500_v24 }
 0xcde   :  { %5802 = vmatpush1.bf16.msra.mxu1 %v7504_v58  ;;  %5834 = vmatpush1.bf16.msra.mxu0 %v7506_v20 }
 0xcdf   :  { %5836 = vmatprep.subr.bf16.mxu1 %v7395_v11  ;;  %5868 = vmatprep.subr.bf16.mxu0 %v7397_v19 }
 0xd94   :  { %v3383_v12 = vpop.f32.mrb[30].mxu1  ;;  %v3454_v25 = vpop.f32.mrb[32].mxu0 }
 0xd95   :  { %v3463_v42 = vrot.slane %v3383_v12, 5  ;;  %v3467_v59 = vrot.slane %v3383_v12, 6  ;;  %v3385_v1 = vpop.f32.mrb[31].mxu1  ;;  %v3456_v0 = vpop.f32.mrb[33].mxu0  ;;  %v3465_v40 = vrot.slane %v3454_v25, 5  ;;  %v3469_v47 = vrot.slane %v3454_v25, 6 }
 0xd96   :  { %v3464_v30 = vrot.slane %v3385_v1, 5  ;;  %v3468_v35 = vrot.slane %v3385_v1, 6  ;;  %v3466_v6 = vrot.slane %v3456_v0, 5  ;;  %v3470_v18 = vrot.slane %v3456_v0, 6 }
 0xd97   :  { %v3479_v26 = vadd.f32 %v3463_v42, %v7557_v49  ;;  %v3483_v27 = vadd.f32 %v3467_v59, %v7561_v14  ;;  %v3481_v59 = vadd.f32 %v3465_v40, %v7578_v16  ;;  %v3485_v1 = vadd.f32 %v3469_v47, %v7582_v48 }
 0xd98   :  { %v3480_v3 = vadd.f32 %v3464_v30, %v7559_v53  ;;  %v3484_v38 = vadd.f32 %v3468_v35, %v7566_v52  ;;  %v3482_v12 = vadd.f32 %v3466_v6, %v7573_v50  ;;  %v3486_v42 = vadd.f32 %v3470_v18, %v7575_v9 }
 0xd99   :  { %v4732_v5 = vmul.f32 -1.442695, %v3479_v26  ;;  %v4733_v62 = vmul.f32 -1.442695, %v3483_v27 }
 0xd9a   :  { %v4734_v46 = vmul.f32 -1.442695, %v3480_v3  ;;  %v4735_v55 = vmul.f32 -1.442695, %v3484_v38  ;;  %v4736_v30 = vmul.f32 -1.442695, %v3482_v12 }
 0xd9b   :  { %6436 = vpow2.f32 %v4732_v5  ;;  %v4737_v35 = vmul.f32 -1.442695, %v3486_v42  ;;  %v3527_v42 = vrot.slane %v7687_v41, 7 }
 0xd9c   :  { %6438 = vpow2.f32 %v4733_v62 }
 0xd9d   :  { %6440 = vpow2.f32 %v4734_v46 }
 0xd9e   :  { %6442 = vpow2.f32 %v4735_v55 }
 0xd9f   :  { %6444 = vtanh.f32 %v3481_v59 }
 0xda0   :  { %6446 = vtanh.f32 %v3485_v1 }
 0xda1   :  { %6448 = vpow2.f32 %v4736_v30 }
 0xda2   :  { %6450 = vpow2.f32 %v4737_v35  ;;  %v3528_v35 = vrot.slane %v7689_v57, 7 }
 0xda5   :  { %v6437_v26 = vpop.eup %6436 }
 0xda6   :  { %v6439_v27 = vpop.eup %6438  ;;  %v3493_v0 = vadd.f32 1.0, %v6437_v26 }
 0xda7   :  { %v6441_v3 = vpop.eup %6440  ;;  %v3494_v25 = vadd.f32 1.0, %v6439_v27 }
 0xda8   :  { %v6443_v38 = vpop.eup %6442  ;;  %6452 = vrcp.f32 %v3493_v0  ;;  %v3505_v5 = vadd.f32 1.0, %v6441_v3 }
 0xda9   :  { %6454 = vrcp.f32 %v3494_v25  ;;  %v3506_v62 = vadd.f32 1.0, %v6443_v38  ;;  %v6445_v46 = vpop.eup %6444 }
 0xdaa   :  { %6456 = vrcp.f32 %v3505_v5  ;;  %v6447_v55 = vpop.eup %6446 }
 0xdab   :  { %6458 = vrcp.f32 %v3506_v62  ;;  %v6449_v6 = vpop.eup %6448 }
 0xdac   :  { %v6451_v18 = vpop.eup %6450  ;;  %v3519_v59 = vadd.f32 1.0, %v6449_v6 }
 0xdad   :  { %v3520_v26 = vadd.f32 1.0, %v6451_v18 }
 0xdae   :  { %6460 = vrcp.f32 %v3519_v59 }
 0xdaf   :  { %6462 = vrcp.f32 %v3520_v26 }
 0xdb2   :  { %v6453_v40 = vpop.eup %6452 }
 0xdb3   :  { %v6455_v47 = vpop.eup %6454  ;;  %v3533_v12 = vmul.f32 %v6453_v40, %v6445_v46 }
 0xdb4   :  { %v6457_v1 = vpop.eup %6456  ;;  %v3534_v30 = vmul.f32 %v6455_v47, %v6447_v55 }
 0xdb5   :  { %v6459_v27 = vpop.eup %6458  ;;  %v3531_v0 = vmul.f32 %v6457_v1, %v3527_v42 }
 0xdb6   :  { %v3532_v3 = vmul.f32 %v6459_v27, %v3528_v35 }
 0xdb7   :  { %v7738_v25 = vadd.f32 %v3533_v12, %v3531_v0 }
 0xdb8   :  { %v7740_v38 = vadd.f32 %v3534_v30, %v3532_v3  ;;  %v6461_v41 = vpop.eup %6460 }
 0xdb9   :  { %6464 = vtanh.f32 %v7738_v25  ;;  %v6463_v5 = vpop.eup %6462 }
 0xdba   :  { %6466 = vtanh.f32 %v7740_v38 }
 0xdc3   :  { %v6465_v62 = vpop.eup %6464 }
 0xdc4   :  { %v6467_v46 = vpop.eup %6466  ;;  %v3539_v55 = vmul.f32 %v6465_v62, %v6461_v41 }
 0xdc5   :  { %v3540_v57 = vmul.f32 %v6467_v46, %v6463_v5 }
 0xdc6   :  { %v3543_v6 = vrot.slane %v3539_v55, 3 }
 0xdc7   :  { %v3544_v18 = vrot.slane %v3540_v57, 2 }
 0xdc9   :  { %v3545_v40 = vsel %vm846_vm2, %v3544_v18, %v3543_v6 }
 0xdca   :  { %3612 = vmatmul.mubr.f32.vlgmr.msra.gmra.mrb[32].mxu1 %v3545_v40  ;;  %3683 = vmatmul.mubr.f32.vlgmr.msra.gmra.mrb[34].mxu0 %v3545_v40 }
 0xdcb   :  { %5838 = vmatpush1.bf16.msra.mxu1 %v7411_v33  ;;  %5870 = vmatpush1.bf16.msra.mxu0 %v7413_v45 }
 0xdcc   :  { %5840 = vmatprep.subr.bf16.mxu1 %v7417_v2  ;;  %5872 = vmatprep.subr.bf16.mxu0 %v7419_v13 }
 0xdcd   :  { %3841 = vmatprep.mubr.f32.mxu1 %v8050_v36  ;;  %3912 = vmatprep.mubr.f32.mxu0 %v8050_v36 }
 0xdcf   :  { %5842 = vmatpush1.bf16.msra.mxu1 %v7425_v15  ;;  %5874 = vmatpush1.bf16.msra.mxu0 %v7427_v10 }
 0xdd0   :  { %5844 = vmatprep.subr.bf16.mxu1 %v7431_v8  ;;  %5876 = vmatprep.subr.bf16.mxu0 %v7433_v44 }
 0xdd3   :  { %5846 = vmatpush1.bf16.msra.mxu1 %v7442_v4  ;;  %5878 = vmatpush1.bf16.msra.mxu0 %v7444_v21 }
 0xdd4   :  { %5848 = vmatprep.subr.bf16.mxu1 %v7448_v61  ;;  %5880 = vmatprep.subr.bf16.mxu0 %v7450_v29 }
 0xdd7   :  { %5850 = vmatpush1.bf16.msra.mxu1 %v7456_v7  ;;  %5882 = vmatpush1.bf16.msra.mxu0 %v7458_v39 }
 0xdd8   :  { %5852 = vmatprep.subr.bf16.mxu1 %v7462_v32  ;;  %5884 = vmatprep.subr.bf16.mxu0 %v7464_v56 }
 0xddb   :  { %5854 = vmatpush1.bf16.msra.mxu1 %v7468_v22  ;;  %5886 = vmatpush1.bf16.msra.mxu0 %v7470_v23 }
 0xddc   :  { %5856 = vmatprep.subr.bf16.mxu1 %v7474_v31  ;;  %5888 = vmatprep.subr.bf16.mxu0 %v7476_v34 }
 0xddf   :  { %5858 = vmatpush1.bf16.msra.mxu1 %v7480_v60  ;;  %5890 = vmatpush1.bf16.msra.mxu0 %v7482_v63 }
 0xde0   :  { %5860 = vmatprep.subr.bf16.mxu1 %v7486_v17  ;;  %5892 = vmatprep.subr.bf16.mxu0 %v7488_v54 }
 0xde3   :  { %5862 = vmatpush1.bf16.msra.mxu1 %v7492_v43  ;;  %5894 = vmatpush1.bf16.msra.mxu0 %v7494_v51 }
 0xde4   :  { %5864 = vmatprep.subr.bf16.mxu1 %v7498_v37  ;;  %5896 = vmatprep.subr.bf16.mxu0 %v7500_v24 }
 0xde7   :  { %5866 = vmatpush1.bf16.msra.mxu1 %v7504_v58  ;;  %5898 = vmatpush1.bf16.msra.mxu0 %v7506_v20 }
 0xde8   :  { %5900 = vmatprep.subr.bf16.mxu1 %v7395_v11  ;;  %5932 = vmatprep.subr.bf16.mxu0 %v7397_v19 }
 0xe9d   :  { %v3613_v47 = vpop.f32.mrb[32].mxu1  ;;  %v3684_v12 = vpop.f32.mrb[34].mxu0 }
 0xe9e   :  { %v3693_v42 = vrot.slane %v3613_v47, 4  ;;  %v3697_v59 = vrot.slane %v3613_v47, 5  ;;  %v3615_v1 = vpop.f32.mrb[33].mxu1  ;;  %v3686_v30 = vpop.f32.mrb[35].mxu0  ;;  %v3695_v18 = vrot.slane %v3684_v12, 4  ;;  %v3699_v40 = vrot.slane %v3684_v12, 5 }
 0xe9f   :  { %v3694_v35 = vrot.slane %v3615_v1, 4  ;;  %v3698_v26 = vrot.slane %v3615_v1, 5  ;;  %v3696_v57 = vrot.slane %v3686_v30, 4  ;;  %v3700_v6 = vrot.slane %v3686_v30, 5 }
 0xea0   :  { %v3709_v27 = vadd.f32 %v3693_v42, %v7557_v49  ;;  %v3713_v0 = vadd.f32 %v3697_v59, %v7561_v14  ;;  %v3711_v59 = vadd.f32 %v3695_v18, %v7578_v16  ;;  %v3715_v1 = vadd.f32 %v3699_v40, %v7582_v48 }
 0xea1   :  { %v3710_v3 = vadd.f32 %v3694_v35, %v7559_v53  ;;  %v3714_v41 = vadd.f32 %v3698_v26, %v7566_v52  ;;  %v3712_v47 = vadd.f32 %v3696_v57, %v7573_v50  ;;  %v3716_v42 = vadd.f32 %v3700_v6, %v7575_v9 }
 0xea2   :  { %v4738_v5 = vmul.f32 -1.442695, %v3709_v27  ;;  %v4739_v62 = vmul.f32 -1.442695, %v3713_v0 }
 0xea3   :  { %v4740_v46 = vmul.f32 -1.442695, %v3710_v3  ;;  %v4741_v55 = vmul.f32 -1.442695, %v3714_v41  ;;  %v4742_v35 = vmul.f32 -1.442695, %v3712_v47 }
 0xea4   :  { %6468 = vpow2.f32 %v4738_v5  ;;  %v4743_v26 = vmul.f32 -1.442695, %v3716_v42  ;;  %v3757_v42 = vrot.slane %v7738_v25, 7 }
 0xea5   :  { %6470 = vpow2.f32 %v4739_v62 }
 0xea6   :  { %6472 = vpow2.f32 %v4740_v46 }
 0xea7   :  { %6474 = vpow2.f32 %v4741_v55 }
 0xea8   :  { %6476 = vtanh.f32 %v3711_v59 }
 0xea9   :  { %6478 = vtanh.f32 %v3715_v1 }
 0xeaa   :  { %6480 = vpow2.f32 %v4742_v35 }
 0xeab   :  { %6482 = vpow2.f32 %v4743_v26  ;;  %v3758_v26 = vrot.slane %v7740_v38, 7 }
 0xeae   :  { %v6469_v27 = vpop.eup %6468 }
 0xeaf   :  { %v6471_v0 = vpop.eup %6470  ;;  %v3723_v30 = vadd.f32 1.0, %v6469_v27 }
 0xeb0   :  { %v6473_v3 = vpop.eup %6472  ;;  %v3724_v12 = vadd.f32 1.0, %v6471_v0 }
 0xeb1   :  { %v6475_v41 = vpop.eup %6474  ;;  %6484 = vrcp.f32 %v3723_v30  ;;  %v3735_v5 = vadd.f32 1.0, %v6473_v3 }
 0xeb2   :  { %6486 = vrcp.f32 %v3724_v12  ;;  %v3736_v62 = vadd.f32 1.0, %v6475_v41  ;;  %v6477_v46 = vpop.eup %6476 }
 0xeb3   :  { %6488 = vrcp.f32 %v3735_v5  ;;  %v6479_v55 = vpop.eup %6478 }
 0xeb4   :  { %6490 = vrcp.f32 %v3736_v62  ;;  %v6481_v57 = vpop.eup %6480 }
 0xeb5   :  { %v6483_v6 = vpop.eup %6482  ;;  %v3749_v59 = vadd.f32 1.0, %v6481_v57 }
 0xeb6   :  { %v3750_v27 = vadd.f32 1.0, %v6483_v6 }
 0xeb7   :  { %6492 = vrcp.f32 %v3749_v59 }
 0xeb8   :  { %6494 = vrcp.f32 %v3750_v27 }
 0xebb   :  { %v6485_v18 = vpop.eup %6484 }
 0xebc   :  { %v6487_v40 = vpop.eup %6486  ;;  %v3763_v47 = vmul.f32 %v6485_v18, %v6477_v46 }
 0xebd   :  { %v6489_v1 = vpop.eup %6488  ;;  %v3764_v35 = vmul.f32 %v6487_v40, %v6479_v55 }
 0xebe   :  { %v6491_v0 = vpop.eup %6490  ;;  %v3761_v30 = vmul.f32 %v6489_v1, %v3757_v42 }
 0xebf   :  { %v3762_v3 = vmul.f32 %v6491_v0, %v3758_v26 }
 0xec0   :  { %v7789_v12 = vadd.f32 %v3763_v47, %v3761_v30 }
 0xec1   :  { %v7791_v41 = vadd.f32 %v3764_v35, %v3762_v3  ;;  %v6493_v25 = vpop.eup %6492 }
 0xec2   :  { %6496 = vtanh.f32 %v7789_v12  ;;  %v6495_v5 = vpop.eup %6494 }
 0xec3   :  { %6498 = vtanh.f32 %v7791_v41 }
 0xecc   :  { %v6497_v62 = vpop.eup %6496 }
 0xecd   :  { %v6499_v46 = vpop.eup %6498  ;;  %v3769_v55 = vmul.f32 %v6497_v62, %v6493_v25 }
 0xece   :  { %v3770_v38 = vmul.f32 %v6499_v46, %v6495_v5 }
 0xecf   :  { %v3773_v57 = vrot.slane %v3769_v55, 4 }
 0xed0   :  { %v3774_v6 = vrot.slane %v3770_v38, 3 }
 0xed2   :  { %v3775_v18 = vsel %vm846_vm2, %v3774_v6, %v3773_v57 }
 0xed3   :  { %3842 = vmatmul.mubr.f32.vlgmr.msra.gmra.mrb[34].mxu1 %v3775_v18  ;;  %3913 = vmatmul.mubr.f32.vlgmr.msra.gmra.mrb[36].mxu0 %v3775_v18 }
 0xed4   :  { %5902 = vmatpush1.bf16.msra.mxu1 %v7411_v33  ;;  %5934 = vmatpush1.bf16.msra.mxu0 %v7413_v45 }
 0xed5   :  { %5904 = vmatprep.subr.bf16.mxu1 %v7417_v2  ;;  %5936 = vmatprep.subr.bf16.mxu0 %v7419_v13 }
 0xed6   :  { %4071 = vmatprep.mubr.f32.mxu1 %v8050_v36  ;;  %4142 = vmatprep.mubr.f32.mxu0 %v8050_v36 }
 0xed8   :  { %5906 = vmatpush1.bf16.msra.mxu1 %v7425_v15  ;;  %5938 = vmatpush1.bf16.msra.mxu0 %v7427_v10 }
 0xed9   :  { %5908 = vmatprep.subr.bf16.mxu1 %v7431_v8  ;;  %5940 = vmatprep.subr.bf16.mxu0 %v7433_v44 }
 0xedc   :  { %5910 = vmatpush1.bf16.msra.mxu1 %v7442_v4  ;;  %5942 = vmatpush1.bf16.msra.mxu0 %v7444_v21 }
 0xedd   :  { %5912 = vmatprep.subr.bf16.mxu1 %v7448_v61  ;;  %5944 = vmatprep.subr.bf16.mxu0 %v7450_v29 }
 0xee0   :  { %5914 = vmatpush1.bf16.msra.mxu1 %v7456_v7  ;;  %5946 = vmatpush1.bf16.msra.mxu0 %v7458_v39 }
 0xee1   :  { %5916 = vmatprep.subr.bf16.mxu1 %v7462_v32  ;;  %5948 = vmatprep.subr.bf16.mxu0 %v7464_v56 }
 0xee4   :  { %5918 = vmatpush1.bf16.msra.mxu1 %v7468_v22  ;;  %5950 = vmatpush1.bf16.msra.mxu0 %v7470_v23 }
 0xee5   :  { %5920 = vmatprep.subr.bf16.mxu1 %v7474_v31  ;;  %5952 = vmatprep.subr.bf16.mxu0 %v7476_v34 }
 0xee8   :  { %5922 = vmatpush1.bf16.msra.mxu1 %v7480_v60  ;;  %5954 = vmatpush1.bf16.msra.mxu0 %v7482_v63 }
 0xee9   :  { %5924 = vmatprep.subr.bf16.mxu1 %v7486_v17  ;;  %5956 = vmatprep.subr.bf16.mxu0 %v7488_v54 }
 0xeec   :  { %5926 = vmatpush1.bf16.msra.mxu1 %v7492_v43  ;;  %5958 = vmatpush1.bf16.msra.mxu0 %v7494_v51 }
 0xeed   :  { %5928 = vmatprep.subr.bf16.mxu1 %v7498_v37  ;;  %5960 = vmatprep.subr.bf16.mxu0 %v7500_v24 }
 0xef0   :  { %5930 = vmatpush1.bf16.msra.mxu1 %v7504_v58  ;;  %5962 = vmatpush1.bf16.msra.mxu0 %v7506_v20 }
 0xef1   :  { %5996 = vmatprep.subr.bf16.mxu0 %v7397_v19  ;;  %5964 = vmatprep.subr.bf16.mxu1 %v7395_v11 }
 0xfa6   :  { %v3843_v40 = vpop.f32.mrb[34].mxu1  ;;  %v3914_v47 = vpop.f32.mrb[36].mxu0 }
 0xfa7   :  { %v3923_v42 = vrot.slane %v3843_v40, 3  ;;  %v3927_v59 = vrot.slane %v3843_v40, 4  ;;  %v3845_v1 = vpop.f32.mrb[35].mxu1  ;;  %v3916_v35 = vpop.f32.mrb[37].mxu0  ;;  %v3925_v38 = vrot.slane %v3914_v47, 3  ;;  %v3929_v57 = vrot.slane %v3914_v47, 4 }
 0xfa8   :  { %v3924_v26 = vrot.slane %v3845_v1, 3  ;;  %v3928_v27 = vrot.slane %v3845_v1, 4  ;;  %v3926_v46 = vrot.slane %v3916_v35, 3  ;;  %v3930_v55 = vrot.slane %v3916_v35, 4 }
 0xfa9   :  { %v3939_v0 = vadd.f32 %v3923_v42, %v7557_v49  ;;  %v3943_v30 = vadd.f32 %v3927_v59, %v7561_v14  ;;  %v3941_v40 = vadd.f32 %v3925_v38, %v7578_v16  ;;  %v3945_v42 = vadd.f32 %v3929_v57, %v7582_v48 }
 0xfaa   :  { %v3940_v3 = vadd.f32 %v3924_v26, %v7559_v53  ;;  %v3944_v25 = vadd.f32 %v3928_v27, %v7566_v52  ;;  %v3942_v6 = vadd.f32 %v3926_v46, %v7573_v50  ;;  %v3946_v18 = vadd.f32 %v3930_v55, %v7575_v9 }
 0xfab   :  { %v4744_v5 = vmul.f32 -1.442695, %v3939_v0  ;;  %v4745_v19 = vmul.f32 -1.442695, %v3943_v30  ;;  %v3987_v57 = vrot.slane %v7789_v12, 7 }
 0xfac   :  { %v4746_v62 = vmul.f32 -1.442695, %v3940_v3  ;;  %v4747_v11 = vmul.f32 -1.442695, %v3944_v25  ;;  %v4748_v59 = vmul.f32 -1.442695, %v3942_v6 }
 0xfad   :  { %6500 = vpow2.f32 %v4744_v5  ;;  %v4749_v1 = vmul.f32 -1.442695, %v3946_v18 }
 0xfae   :  { %6502 = vpow2.f32 %v4745_v19 }
 0xfaf   :  { %6504 = vpow2.f32 %v4746_v62 }
 0xfb0   :  { %6506 = vpow2.f32 %v4747_v11 }
 0xfb1   :  { %6508 = vtanh.f32 %v3941_v40 }
 0xfb2   :  { %6510 = vtanh.f32 %v3945_v42  ;;  %v3988_v42 = vrot.slane %v7791_v41, 7 }
 0xfb3   :  { %6512 = vpow2.f32 %v4748_v59 }
 0xfb4   :  { %6514 = vpow2.f32 %v4749_v1 }
 0xfb7   :  { %v6501_v26 = vpop.eup %6500 }
 0xfb8   :  { %v6503_v27 = vpop.eup %6502  ;;  %v3953_v35 = vadd.f32 1.0, %v6501_v26 }
 0xfb9   :  { %v6505_v0 = vpop.eup %6504  ;;  %v3954_v47 = vadd.f32 1.0, %v6503_v27 }
 0xfba   :  { %v6507_v30 = vpop.eup %6506  ;;  %6516 = vrcp.f32 %v3953_v35  ;;  %v3965_v3 = vadd.f32 1.0, %v6505_v0 }
 0xfbb   :  { %6518 = vrcp.f32 %v3954_v47  ;;  %v3966_v25 = vadd.f32 1.0, %v6507_v30  ;;  %v6509_v5 = vpop.eup %6508 }
 0xfbc   :  { %6520 = vrcp.f32 %v3965_v3  ;;  %v6511_v19 = vpop.eup %6510 }
 0xfbd   :  { %6522 = vrcp.f32 %v3966_v25  ;;  %v6513_v62 = vpop.eup %6512 }
 0xfbe   :  { %v6515_v11 = vpop.eup %6514  ;;  %v3979_v6 = vadd.f32 1.0, %v6513_v62 }
 0xfbf   :  { %v3980_v59 = vadd.f32 1.0, %v6515_v11 }
 0xfc0   :  { %6524 = vrcp.f32 %v3979_v6 }
 0xfc1   :  { %6526 = vrcp.f32 %v3980_v59 }
 0xfc4   :  { %v6517_v46 = vpop.eup %6516 }
 0xfc5   :  { %v6519_v55 = vpop.eup %6518  ;;  %v3993_v38 = vmul.f32 %v6517_v46, %v6509_v5 }
 0xfc6   :  { %v6521_v18 = vpop.eup %6520  ;;  %v3994_v40 = vmul.f32 %v6519_v55, %v6511_v19 }
 0xfc7   :  { %v6523_v1 = vpop.eup %6522  ;;  %v3991_v26 = vmul.f32 %v6521_v18, %v3987_v57 }
 0xfc8   :  { %v3992_v27 = vmul.f32 %v6523_v1, %v3988_v42 }
 0xfc9   :  { %v7840_v35 = vadd.f32 %v3993_v38, %v3991_v26 }
 0xfca   :  { %v7842_v0 = vadd.f32 %v3994_v40, %v3992_v27  ;;  %v6525_v12 = vpop.eup %6524 }
 0xfcb   :  { %6528 = vtanh.f32 %v7840_v35  ;;  %v6527_v47 = vpop.eup %6526  ;;  %v4217_v27 = vrot.slane %v7840_v35, 7 }
 0xfcc   :  { %6530 = vtanh.f32 %v7842_v0 }
 0xfd5   :  { %v6529_v30 = vpop.eup %6528 }
 0xfd6   :  { %v6531_v3 = vpop.eup %6530  ;;  %v3999_v25 = vmul.f32 %v6529_v30, %v6525_v12 }
 0xfd7   :  { %v4000_v41 = vmul.f32 %v6531_v3, %v6527_v47  ;;  %v4218_v3 = vrot.slane %v7842_v0, 7  ;;  %v4461_v0 = vld [vmem:[%s8034_s9] sm:$0xff] }
 0xfd8   :  { %v4003_v5 = vrot.slane %v3999_v25, 5 }
 0xfd9   :  { %v4004_v19 = vrot.slane %v4000_v41, 4 }
 0xfdb   :  { %v4005_v62 = vsel %vm846_vm2, %v4004_v19, %v4003_v5 }
 0xfdc   :  { %4072 = vmatmul.mubr.f32.vlgmr.msra.gmra.mrb[36].mxu1 %v4005_v62  ;;  %4143 = vmatmul.mubr.f32.vlgmr.msra.gmra.mrb[38].mxu0 %v4005_v62 }
 0xfdd   :  { %5998 = vmatpush1.bf16.msra.mxu0 %v7413_v45  ;;  %5966 = vmatpush1.bf16.msra.mxu1 %v7411_v33  ;;  %v6697_v33 = vmov 0.0|0.0  }
 0xfde   :  { %6000 = vmatprep.subr.bf16.mxu0 %v7419_v13  ;;  %5968 = vmatprep.subr.bf16.mxu1 %v7417_v2 }
 0xfdf   :  { %4301 = vmatprep.mubr.f32.mxu1 %v8050_v36  ;;  %4372 = vmatprep.mubr.f32.mxu0 %v8050_v36 }
 0xfe1   :  { %6002 = vmatpush1.bf16.msra.mxu0 %v7427_v10  ;;  %5970 = vmatpush1.bf16.msra.mxu1 %v7425_v15 }
 0xfe2   :  { %6004 = vmatprep.subr.bf16.mxu0 %v7433_v44  ;;  %5972 = vmatprep.subr.bf16.mxu1 %v7431_v8 }
 0xfe5   :  { %6006 = vmatpush1.bf16.msra.mxu0 %v7444_v21  ;;  %5974 = vmatpush1.bf16.msra.mxu1 %v7442_v4 }
 0xfe6   :  { %6008 = vmatprep.subr.bf16.mxu0 %v7450_v29  ;;  %5976 = vmatprep.subr.bf16.mxu1 %v7448_v61 }
 0xfe9   :  { %6010 = vmatpush1.bf16.msra.mxu0 %v7458_v39  ;;  %5978 = vmatpush1.bf16.msra.mxu1 %v7456_v7 }
 0xfea   :  { %6012 = vmatprep.subr.bf16.mxu0 %v7464_v56  ;;  %5980 = vmatprep.subr.bf16.mxu1 %v7462_v32 }
 0xfed   :  { %6014 = vmatpush1.bf16.msra.mxu0 %v7470_v23  ;;  %5982 = vmatpush1.bf16.msra.mxu1 %v7468_v22 }
 0xfee   :  { %6016 = vmatprep.subr.bf16.mxu0 %v7476_v34  ;;  %5984 = vmatprep.subr.bf16.mxu1 %v7474_v31 }
 0xff1   :  { %6018 = vmatpush1.bf16.msra.mxu0 %v7482_v63  ;;  %5986 = vmatpush1.bf16.msra.mxu1 %v7480_v60 }
 0xff2   :  { %6020 = vmatprep.subr.bf16.mxu0 %v7488_v54  ;;  %5988 = vmatprep.subr.bf16.mxu1 %v7486_v17 }
 0xff5   :  { %6022 = vmatpush1.bf16.msra.mxu0 %v7494_v51  ;;  %5990 = vmatpush1.bf16.msra.mxu1 %v7492_v43 }
 0xff6   :  { %6024 = vmatprep.subr.bf16.mxu0 %v7500_v24  ;;  %5992 = vmatprep.subr.bf16.mxu1 %v7498_v37 }
 0xff9   :  { %6026 = vmatpush1.bf16.msra.mxu0 %v7506_v20  ;;  %5994 = vmatpush1.bf16.msra.mxu1 %v7504_v58 }
 0xffa   :  { %6051 = vmatprep.subr.bf16.mxu0 %v6697_v33  ;;  %6027 = vmatprep.subr.bf16.mxu1 %v6697_v33 }
0x10af   :  { %v4073_v45 = vpop.f32.mrb[36].mxu1  ;;  %v4144_v2 = vpop.f32.mrb[38].mxu0 }
0x10b0   :  { %v4153_v13 = vrot.slane %v4073_v45, 2  ;;  %v4157_v15 = vrot.slane %v4073_v45, 3  ;;  %v4075_v10 = vpop.f32.mrb[37].mxu1  ;;  %v4146_v8 = vpop.f32.mrb[39].mxu0  ;;  %v4155_v34 = vrot.slane %v4144_v2, 2  ;;  %v4159_v60 = vrot.slane %v4144_v2, 3 }
0x10b1   :  { %v4154_v44 = vrot.slane %v4075_v10, 2  ;;  %v4158_v4 = vrot.slane %v4075_v10, 3  ;;  %v4156_v23 = vrot.slane %v4146_v8, 2  ;;  %v4160_v31 = vrot.slane %v4146_v8, 3  ;;  %v4462_v8 = vld [vmem:[%s8034_s9 + $0x8] sm:$0xff] }
0x10b2   :  { %v4169_v21 = vadd.f32 %v4153_v13, %v7557_v49  ;;  %v4173_v61 = vadd.f32 %v4157_v15, %v7561_v14  ;;  %v4171_v54 = vadd.f32 %v4155_v34, %v7578_v16  ;;  %v4175_v43 = vadd.f32 %v4159_v60, %v7582_v48  ;;  %v4468_v34 = vld [vmem:[%s8034_s9 + $0x38] sm:$0xff] }
0x10b3   :  { %v4170_v29 = vadd.f32 %v4154_v44, %v7559_v53  ;;  %v4174_v7 = vadd.f32 %v4158_v4, %v7566_v52  ;;  %v4172_v63 = vadd.f32 %v4156_v23, %v7573_v50  ;;  %v4176_v17 = vadd.f32 %v4160_v31, %v7575_v9  ;;  %v4467_v31 = vld [vmem:[%s8034_s9 + $0x30] sm:$0xff] }
0x10b4   :  { %v4750_v39 = vmul.f32 -1.442695, %v4169_v21  ;;  %v4751_v32 = vmul.f32 -1.442695, %v4173_v61  ;;  %v6052_v61 = vpack.c.bf16 %v4462_v8, %v4461_v0  ;;  %v6061_v60 = vpack.c.bf16 %v4468_v34, %v4467_v31 }
0x10b5   :  { %v4752_v56 = vmul.f32 -1.442695, %v4170_v29  ;;  %v4753_v22 = vmul.f32 -1.442695, %v4174_v7  ;;  %v4754_v51 = vmul.f32 -1.442695, %v4172_v63 }
0x10b6   :  { %6532 = vpow2.f32 %v4750_v39  ;;  %v4755_v37 = vmul.f32 -1.442695, %v4176_v17  ;;  %v4463_v29 = vld [vmem:[%s8034_s9 + $0x10] sm:$0xff]  ;;  %v4464_v7 = vld [vmem:[%s8034_s9 + $0x18] sm:$0xff]  ;;  %v4470_v63 = vld [vmem:[%s8034_s9 + $0x48] sm:$0xff] }
0x10b7   :  { %6534 = vpow2.f32 %v4751_v32  ;;  %v6055_v32 = vpack.c.bf16 %v4464_v7, %v4463_v29 }
0x10b8   :  { %6536 = vpow2.f32 %v4752_v56  ;;  %v4465_v56 = vld [vmem:[%s8034_s9 + $0x20] sm:$0xff] }
0x10b9   :  { %6538 = vpow2.f32 %v4753_v22  ;;  %v4466_v22 = vld [vmem:[%s8034_s9 + $0x28] sm:$0xff] }
0x10ba   :  { %6540 = vtanh.f32 %v4171_v54  ;;  %v6058_v23 = vpack.c.bf16 %v4466_v22, %v4465_v56  ;;  %v4471_v54 = vld [vmem:[%s8034_s9 + $0x50] sm:$0xff] }
0x10bb   :  { %6542 = vtanh.f32 %v4175_v43  ;;  %v4472_v43 = vld [vmem:[%s8034_s9 + $0x58] sm:$0xff] }
0x10bc   :  { %6544 = vpow2.f32 %v4754_v51  ;;  %v6067_v51 = vpack.c.bf16 %v4472_v43, %v4471_v54 }
0x10bd   :  { %6546 = vpow2.f32 %v4755_v37  ;;  %v4473_v37 = vld [vmem:[%s8034_s9 + $0x60] sm:$0xff] }
0x10c0   :  { %v6533_v24 = vpop.eup %6532 }
0x10c1   :  { %v6535_v58 = vpop.eup %6534  ;;  %v4183_v20 = vadd.f32 1.0, %v6533_v24  ;;  %v4474_v24 = vld [vmem:[%s8034_s9 + $0x68] sm:$0xff] }
0x10c2   :  { %v6537_v11 = vpop.eup %6536  ;;  %v4184_v46 = vadd.f32 1.0, %v6535_v58  ;;  %v6070_v58 = vpack.c.bf16 %v4474_v24, %v4473_v37 }
0x10c3   :  { %v6539_v55 = vpop.eup %6538  ;;  %6548 = vrcp.f32 %v4183_v20  ;;  %v4195_v38 = vadd.f32 1.0, %v6537_v11  ;;  %v4475_v20 = vld [vmem:[%s8034_s9 + $0x70] sm:$0xff]  ;;  %v4476_v11 = vld [vmem:[%s8034_s9 + $0x78] sm:$0xff] }
0x10c4   :  { %6550 = vrcp.f32 %v4184_v46  ;;  %v4196_v57 = vadd.f32 1.0, %v6539_v55  ;;  %v6541_v6 = vpop.eup %6540  ;;  %v6073_v46 = vpack.c.bf16 %v4476_v11, %v4475_v20  ;;  %v4477_v55 = vld [vmem:[%s8035_s10] sm:$0xff] }
0x10c5   :  { %6552 = vrcp.f32 %v4195_v38  ;;  %v6543_v18 = vpop.eup %6542  ;;  %v4478_v38 = vld [vmem:[%s8035_s10 + $0x8] sm:$0xff] }
0x10c6   :  { %6554 = vrcp.f32 %v4196_v57  ;;  %v6545_v40 = vpop.eup %6544  ;;  %v6028_v57 = vpack.c.bf16 %v4478_v38, %v4477_v55 }
0x10c7   :  { %v6547_v42 = vpop.eup %6546  ;;  %v4209_v12 = vadd.f32 1.0, %v6545_v40  ;;  %v4481_v40 = vld [vmem:[%s8035_s10 + $0x20] sm:$0xff] }
0x10c8   :  { %v4210_v25 = vadd.f32 1.0, %v6547_v42  ;;  %v4482_v42 = vld [vmem:[%s8035_s10 + $0x28] sm:$0xff] }
0x10c9   :  { %6556 = vrcp.f32 %v4209_v12 }
0x10ca   :  { %6558 = vrcp.f32 %v4210_v25  ;;  %v4488_v25 = vld [vmem:[%s8035_s10 + $0x58] sm:$0xff] }
0x10cd   :  { %v6549_v59 = vpop.eup %6548 }
0x10ce   :  { %v6551_v1 = vpop.eup %6550  ;;  %v4223_v26 = vmul.f32 %v6549_v59, %v6541_v6  ;;  %v4479_v6 = vld [vmem:[%s8035_s10 + $0x10] sm:$0xff]  ;;  %v6034_v59 = vpack.c.bf16 %v4482_v42, %v4481_v40 }
0x10cf   :  { %v6553_v47 = vpop.eup %6552  ;;  %v4224_v30 = vmul.f32 %v6551_v1, %v6543_v18  ;;  %v4483_v1 = vld [vmem:[%s8035_s10 + $0x30] sm:$0xff] }
0x10d0   :  { %v6555_v41 = vpop.eup %6554  ;;  %v4221_v5 = vmul.f32 %v6553_v47, %v4217_v27  ;;  %v4485_v27 = vld [vmem:[%s8035_s10 + $0x40] sm:$0xff]  ;;  %v4486_v47 = vld [vmem:[%s8035_s10 + $0x48] sm:$0xff] }
0x10d1   :  { %v4222_v19 = vmul.f32 %v6555_v41, %v4218_v3  ;;  %v4487_v3 = vld [vmem:[%s8035_s10 + $0x50] sm:$0xff] }
0x10d2   :  { %v7891_v62 = vadd.f32 %v4223_v26, %v4221_v5  ;;  %v4484_v26 = vld [vmem:[%s8035_s10 + $0x38] sm:$0xff]  ;;  %v6043_v41 = vpack.c.bf16 %v4488_v25, %v4487_v3  ;;  %v4489_v5 = vld [vmem:[%s8035_s10 + $0x60] sm:$0xff] }
0x10d3   :  { %v7893_v45 = vadd.f32 %v4224_v30, %v4222_v19  ;;  %v6557_v35 = vpop.eup %6556  ;;  %v6037_v12 = vpack.c.bf16 %v4484_v26, %v4483_v1  ;;  %v6040_v30 = vpack.c.bf16 %v4486_v47, %v4485_v27  ;;  %v4490_v19 = vld [vmem:[%s8035_s10 + $0x68] sm:$0xff] }
0x10d4   :  { %6560 = vtanh.f32 %v7891_v62  ;;  %v6559_v2 = vpop.eup %6558 }
0x10d5   :  { %6562 = vtanh.f32 %v7893_v45  ;;  %v4448_v42 = vrot.slane %v7893_v45, 7 }
0x10de   :  { %v6561_v13 = vpop.eup %6560 }
0x10df   :  { %v6563_v15 = vpop.eup %6562  ;;  %v4229_v10 = vmul.f32 %v6561_v13, %v6557_v35  ;;  %v6046_v35 = vpack.c.bf16 %v4490_v19, %v4489_v5  ;;  %v4492_v13 = vld [vmem:[%s8035_s10 + $0x78] sm:$0xff] }
0x10e0   :  { %v4230_v44 = vmul.f32 %v6563_v15, %v6559_v2  ;;  %v4491_v2 = vld [vmem:[%s8035_s10 + $0x70] sm:$0xff] }
0x10e1   :  { %v4233_v4 = vrot.slane %v4229_v10, 6  ;;  %v6049_v15 = vpack.c.bf16 %v4492_v13, %v4491_v2 }
0x10e2   :  { %v4234_v21 = vrot.slane %v4230_v44, 5 }
0x10e4   :  { %v4235_v39 = vsel %vm846_vm2, %v4234_v21, %v4233_v4 }
0x10e5   :  { %4302 = vmatmul.mubr.f32.vlgmr.msra.gmra.mrb[38].mxu1 %v4235_v39  ;;  %4373 = vmatmul.mubr.f32.vlgmr.msra.gmra.mrb[40].mxu0 %v4235_v39 }
0x10e6   :  { %6053 = vmatpush3.bf16.msra.mxu0 %v6052_v61  ;;  %4872 = vmatprep.mubr.msk.f32.mxu0 %vm6698_vm9, %v8050_v36 }
0x10e7   :  { %6054 = vmatprep.subr.bf16.mxu0 %v6697_v33  ;;  %4837 = vmatprep.mubr.msk.f32.mxu1 %vm6698_vm9, %v8050_v36  ;;  %v4469_v36 = vld [vmem:[%s8034_s9 + $0x40] sm:$0xff] }
0x10e8   :  { %v6064_v17 = vpack.c.bf16 %v4470_v63, %v4469_v36  ;;  %6029 = vmatpush3.bf16.msra.mxu1 %v6028_v57 }
0x10e9   :  { %6030 = vmatprep.subr.bf16.mxu1 %v6697_v33 }
0x10ea   :  { %6056 = vmatpush3.bf16.msra.mxu0 %v6055_v32 }
0x10eb   :  { %6057 = vmatprep.subr.bf16.mxu0 %v6697_v33 }
0x10ee   :  { %6059 = vmatpush3.bf16.msra.mxu0 %v6058_v23 }
0x10ef   :  { %6060 = vmatprep.subr.bf16.mxu0 %v6697_v33 }
0x10f2   :  { %6062 = vmatpush3.bf16.msra.mxu0 %v6061_v60 }
0x10f3   :  { %6063 = vmatprep.subr.bf16.mxu0 %v6697_v33 }
0x10f6   :  { %6065 = vmatpush3.bf16.msra.mxu0 %v6064_v17 }
0x10f7   :  { %6066 = vmatprep.subr.bf16.mxu0 %v6697_v33 }
0x10fa   :  { %6068 = vmatpush3.bf16.msra.mxu0 %v6067_v51 }
0x10fb   :  { %6069 = vmatprep.subr.bf16.mxu0 %v6697_v33 }
0x10fe   :  { %6071 = vmatpush3.bf16.msra.mxu0 %v6070_v58 }
0x10ff   :  { %6072 = vmatprep.subr.bf16.mxu0 %v6697_v33 }
0x1102   :  { %6074 = vmatpush3.bf16.msra.mxu0 %v6073_v46 }
0x1105   :  { %4873 = vmatmul.mubr.f32.vlgmr.msra.gmra.mrb[42].mxu0 %v7436_v28  ;;  %v4480_v28 = vld [vmem:[%s8035_s10 + $0x18] sm:$0xff] }
0x1106   :  { %v6031_v18 = vpack.c.bf16 %v4480_v28, %v4479_v6  ;;  %v4447_v6 = vrot.slane %v7891_v62, 7 }
0x1108   :  { %6032 = vmatpush3.bf16.msra.mxu1 %v6031_v18 }
0x1109   :  { %6033 = vmatprep.subr.bf16.mxu1 %v6697_v33 }
0x110c   :  { %6035 = vmatpush3.bf16.msra.mxu1 %v6034_v59 }
0x110d   :  { %6036 = vmatprep.subr.bf16.mxu1 %v6697_v33 }
0x1110   :  { %6038 = vmatpush3.bf16.msra.mxu1 %v6037_v12 }
0x1111   :  { %6039 = vmatprep.subr.bf16.mxu1 %v6697_v33 }
0x1114   :  { %6041 = vmatpush3.bf16.msra.mxu1 %v6040_v30 }
0x1115   :  { %6042 = vmatprep.subr.bf16.mxu1 %v6697_v33 }
0x1118   :  { %6044 = vmatpush3.bf16.msra.mxu1 %v6043_v41 }
0x1119   :  { %6045 = vmatprep.subr.bf16.mxu1 %v6697_v33 }
0x111c   :  { %6047 = vmatpush3.bf16.msra.mxu1 %v6046_v35 }
0x111d   :  { %6048 = vmatprep.subr.bf16.mxu1 %v6697_v33 }
0x1120   :  { %6050 = vmatpush3.bf16.msra.mxu1 %v6049_v15 }
0x11b8   :  { %v4303_v10 = vpop.f32.mrb[38].mxu1  ;;  %v4374_v0 = vpop.f32.mrb[40].mxu0 }
0x11b9   :  { %v4383_v8 = vrot.slane %v4303_v10, 1  ;;  %v4387_v44 = vrot.slane %v4303_v10, 2  ;;  %v4305_v4 = vpop.f32.mrb[39].mxu1  ;;  %v4376_v21 = vpop.f32.mrb[41].mxu0  ;;  %v4385_v36 = vrot.slane %v4374_v0, 1  ;;  %v4389_v63 = vrot.slane %v4374_v0, 2 }
0x11ba   :  { %v4384_v61 = vrot.slane %v4305_v4, 1  ;;  %v4388_v29 = vrot.slane %v4305_v4, 2  ;;  %v4386_v34 = vrot.slane %v4376_v21, 1  ;;  %v4390_v60 = vrot.slane %v4376_v21, 2  ;;  %v4762_v10 = vld [vmem:[#allocation2] ss:$0 sm:$0xff] }
0x11bb   :  { %v4399_v7 = vadd.f32 %v4383_v8, %v7557_v49  ;;  %v4403_v39 = vadd.f32 %v4387_v44, %v7561_v14 }
0x11bc   :  { %v4400_v32 = vadd.f32 %v4384_v61, %v7559_v53  ;;  %v4404_v56 = vadd.f32 %v4388_v29, %v7566_v52  ;;  %v4402_v49 = vadd.f32 %v4386_v34, %v7573_v50  ;;  %v4406_v14 = vadd.f32 %v4390_v60, %v7575_v9 }
0x11bd   :  { %v4756_v22 = vmul.f32 -1.442695, %v4399_v7  ;;  %v4757_v23 = vmul.f32 -1.442695, %v4403_v39  ;;  %v4401_v53 = vadd.f32 %v4385_v36, %v7578_v16  ;;  %v4405_v52 = vadd.f32 %v4389_v63, %v7582_v48 }
0x11be   :  { %v4758_v33 = vmul.f32 -1.442695, %v4400_v32  ;;  %v4759_v31 = vmul.f32 -1.442695, %v4404_v56  ;;  %v4760_v17 = vmul.f32 -1.442695, %v4402_v49 }
0x11bf   :  { %6564 = vpow2.f32 %v4756_v22  ;;  %v4761_v54 = vmul.f32 -1.442695, %v4406_v14 }
0x11c0   :  { %6566 = vpow2.f32 %v4757_v23 }
0x11c1   :  { %6568 = vpow2.f32 %v4758_v33 }
0x11c2   :  { %6570 = vpow2.f32 %v4759_v31 }
0x11c3   :  { %6572 = vtanh.f32 %v4401_v53 }
0x11c4   :  { %6574 = vtanh.f32 %v4405_v52 }
0x11c5   :  { %6576 = vpow2.f32 %v4760_v17 }
0x11c6   :  { %6578 = vpow2.f32 %v4761_v54 }
0x11c9   :  { %v6565_v43 = vpop.eup %6564 }
0x11ca   :  { %v6567_v51 = vpop.eup %6566  ;;  %v4413_v37 = vadd.f32 1.0, %v6565_v43 }
0x11cb   :  { %v6569_v24 = vpop.eup %6568  ;;  %v4414_v58 = vadd.f32 1.0, %v6567_v51 }
0x11cc   :  { %v6571_v20 = vpop.eup %6570  ;;  %6580 = vrcp.f32 %v4413_v37  ;;  %v4425_v50 = vadd.f32 1.0, %v6569_v24 }
0x11cd   :  { %6582 = vrcp.f32 %v4414_v58  ;;  %v4426_v9 = vadd.f32 1.0, %v6571_v20  ;;  %v6573_v16 = vpop.eup %6572 }
0x11ce   :  { %6584 = vrcp.f32 %v4425_v50  ;;  %v6575_v48 = vpop.eup %6574 }
0x11cf   :  { %6586 = vrcp.f32 %v4426_v9  ;;  %v6577_v11 = vpop.eup %6576 }
0x11d0   :  { %v6579_v46 = vpop.eup %6578  ;;  %v4439_v28 = vadd.f32 1.0, %v6577_v11 }
0x11d1   :  { %v4440_v59 = vadd.f32 1.0, %v6579_v46 }
0x11d2   :  { %6588 = vrcp.f32 %v4439_v28 }
0x11d3   :  { %6590 = vrcp.f32 %v4440_v59 }
0x11d6   :  { %v6581_v55 = vpop.eup %6580 }
0x11d7   :  { %v6583_v38 = vpop.eup %6582  ;;  %v4453_v57 = vmul.f32 %v6581_v55, %v6573_v16 }
0x11d8   :  { %v6585_v18 = vpop.eup %6584  ;;  %v4454_v40 = vmul.f32 %v6583_v38, %v6575_v48  ;;  %v4641_v1 = vpop.f32.mrb[42].mxu0 }
0x11d9   :  { %v6587_v26 = vpop.eup %6586  ;;  %v4451_v27 = vmul.f32 %v6585_v18, %v4447_v6  ;;  %v4874_v12 = vpop.f32.mrb[43].mxu0 }
0x11da   :  { %v4452_v47 = vmul.f32 %v6587_v26, %v4448_v42 }
0x11db   :  { %v4455_v30 = vadd.f32 %v4453_v57, %v4451_v27 }
0x11dc   :  { %v4456_v3 = vadd.f32 %v4454_v40, %v4452_v47  ;;  %v6589_v25 = vpop.eup %6588 }
0x11dd   :  { %6592 = vtanh.f32 %v4455_v30  ;;  %v6591_v41 = vpop.eup %6590 }
0x11de   :  { %6594 = vtanh.f32 %v4456_v3 }
0x11e7   :  { %v6593_v62 = vpop.eup %6592 }
0x11e8   :  { %v6595_v5 = vpop.eup %6594  ;;  %v4459_v19 = vmul.f32 %v6593_v62, %v6589_v25 }
0x11e9   :  { %v4460_v35 = vmul.f32 %v6595_v5, %v6591_v41 }
0x11ea   :  { %v4495_v2 = vrot.slane %v4459_v19, 7 }
0x11eb   :  { %v4496_v45 = vrot.slane %v4460_v35, 6 }
0x11ed   :  { %v4497_v13 = vsel %vm846_vm2, %v4496_v45, %v4495_v2 }
0x11ee   :  { %4838 = vmatmul.mubr.f32.vlgmr.msra.gmra.mrb[40].mxu1 %v4497_v13 }
0x12c1   :  { %v4565_v15 = vpop.f32.mrb[40].mxu1 }
0x12c2   :  { %v4642_v0 = vadd.f32 %v4641_v1, %v4565_v15  ;;  %v4839_v8 = vpop.f32.mrb[41].mxu1 }
0x12c4   :  { %v4652_v44 = vadd.f32 %v4762_v10, %v4642_v0 }
0x12c6   :  { %4654 = vst.msk [vmem:[%s8037_s12] sm:$0x3] %vm4653_vm10, %v4652_v44 }
0x12c7   :  { %4659 = vsyncpa [#allocation4], 1 }
0x12c8   :  { %4660 = vsyncpa [#allocation6], 1 }
0x12c9   :  { %4661 = vsyncpa [#allocation9], 1 }

</bundles_post_ra>
